<compile_context>
chip_gen: v7x
topology: tpu7x:2x2x1
jax: 0.10.0
libtpu: 0.0.40
codegen_flags: <defaults>
</compile_context>

<pallas_src>
import functools
import math

import jax
import jax.numpy as jnp
from jax.experimental import pallas as pl
from jax.experimental.pallas import tpu as pltpu


# ----------------------------------------------------------------------------
# helpers
# ----------------------------------------------------------------------------
def _silu(x):
    return x * jax.nn.sigmoid(x)


def _softplus(x):
    return jnp.where(x > 20.0, x, jnp.log1p(jnp.exp(jnp.minimum(x, 20.0))))


def _layer_norm(r, g, b):
    mean = jnp.mean(r, axis=-1, keepdims=True)
    var = jnp.mean((r - mean) ** 2, axis=-1, keepdims=True)
    rn = (r - mean) * jax.lax.rsqrt(var + 1e-5)
    return rn * g + b


def _vmem_capacity_bytes():
    """Generation-aware VMEM capacity (64 MiB/TC on v7x, 128 MiB v5e/v6e)."""
    try:
        return int(pltpu.get_tpu_info().vmem_capacity_bytes)
    except Exception:
        return 64 * 1024 * 1024          # conservative (v7x-sized) fallback


def _pick_batch_block(B, L, d_state, d_inner, target_m=256):
    """Batch elements per grid step.

    Fill the MXU M dimension (~256 rows; on v5e 128 already fills a pass, the
    >=2-grid-steps rule below also helps there), but (a) keep the scan carry
    h = (Bb, d_state, d_inner) f32 modest and (b) keep at least two grid steps
    when B >= 2 so the 'parallel' grid axis can shard across the two
    TensorCores of a v7x chip and the BlockSpec pipeline has >= 2 iterations.
    """
    bb = max(1, min(B, target_m // max(L, 1)))
    state_cap = max(1, (512 * 1024) // max(1, d_state * d_inner * 4))
    bb = min(bb, state_cap)
    if B >= 2:
        bb = min(bb, max(1, B // 2))
    while B % bb:
        bb -= 1
    return bb


def _pick_scan_chunk(L, Bb, d_state, d_inner, budget_bytes):
    """Time-chunk for the scan precompute: two (Bb, chunk, d_state, d_inner)
    f32 buffers (dA and dBx) must fit the per-generation scan budget."""
    per_step = 2 * Bb * d_state * d_inner * 4
    chunk = min(L, max(8, (budget_bytes // max(per_step, 1)) // 8 * 8))
    while L % chunk:                     # single code path: chunk divides L
        chunk -= 8
    return chunk


def _weight_spec():
    # Whole array resident in VMEM once — no per-grid-step double buffering.
    return pl.BlockSpec(memory_space=pltpu.MemorySpace.VMEM)


STA_NAMES = ["wq", "bq", "wk", "bk", "wv", "bv", "wo", "bo", "ln_g", "ln_b"]
STM_NAMES = ["w_in", "conv_w", "conv_b", "w_x", "w_dt", "b_dt",
             "a_log_t", "d_param", "w_out", "ln_g", "ln_b"]


# ----------------------------------------------------------------------------
# fused per-layer kernel: [attention + res + LN] -> [Mamba + res + LN]
# ----------------------------------------------------------------------------
def tam_layer_kernel(x_ref,
                     # STA weights
                     wq_ref, bq_ref, wk_ref, bk_ref, wv_ref, bv_ref,
                     wo_ref, bo_ref, ln1_g_ref, ln1_b_ref,
                     # STM weights
                     w_in_ref, conv_w_ref, conv_b_ref, w_x_ref, w_dt_ref,
                     b_dt_ref, a_log_t_ref, d_param_ref, w_out_ref,
                     ln2_g_ref, ln2_b_ref,
                     # output
                     o_ref,
                     # scratch
                     xpad_ref, da_ref, dbx_ref, c_ref, y_ref,
                     *, Bb, L, E, H, d_inner, d_state, dt_rank, d_conv,
                     chunk):
    f32, bf16 = jnp.float32, jnp.bfloat16
    dk = E // H
    M = Bb * L
    pad = d_conv - 1

    xf = x_ref[...].reshape(M, E)                       # (M, E) f32

    # ------------------- STA: attention + residual + LN -------------------
    xb = xf.astype(bf16)
    q = jnp.dot(xb, wq_ref[...], preferred_element_type=f32) + bq_ref[...]
    k = jnp.dot(xb, wk_ref[...], preferred_element_type=f32) + bk_ref[...]
    v = jnp.dot(xb, wv_ref[...], preferred_element_type=f32) + bv_ref[...]

    scale = 1.0 / math.sqrt(dk)
    heads = []
    for hd in range(H):                                 # static loop over heads
        sl = slice(hd * dk, (hd + 1) * dk)
        qh = q[:, sl].reshape(Bb, L, dk)
        kh = k[:, sl].reshape(Bb, L, dk)
        vh = v[:, sl].reshape(Bb, L, dk)
        s = jnp.einsum("bqd,bkd->bqk", qh.astype(bf16), kh.astype(bf16),
                       preferred_element_type=f32) * scale
        m = jnp.max(s, axis=-1, keepdims=True)
        p = jnp.exp(s - m)
        # Reciprocal on the EUP slot.  approx=False keeps numerics bitwise
        # close to the f32 reference; approx=True is a further small win on
        # v6e/v7x after re-validating the tolerance.
        p = p * pl.reciprocal(jnp.sum(p, axis=-1, keepdims=True), approx=False)
        oh = jnp.einsum("bqk,bkd->bqd", p.astype(bf16), vh.astype(bf16),
                        preferred_element_type=f32)
        heads.append(oh.reshape(M, dk))
    att = jnp.concatenate(heads, axis=-1)               # one lane concat
    attn = jnp.dot(att.astype(bf16), wo_ref[...],
                   preferred_element_type=f32) + bo_ref[...]

    # residual (dropout == identity in eval) + LayerNorm(eps=1e-5)
    x1 = _layer_norm(xf + attn, ln1_g_ref[...], ln1_b_ref[...])     # (M, E)

    # ------------------- STM: Mamba + residual + LN -----------------------
    x1b = x1.astype(bf16)

    # in_proj fused: one MXU pass, split on the lane axis afterwards
    xz = jnp.dot(x1b, w_in_ref[...], preferred_element_type=f32)    # (M, 2di)
    xs = xz[:, :d_inner]
    z = xz[:, d_inner:]

    # causal depthwise conv1d + SiLU, vectorized over the whole batch block
    conv_w = conv_w_ref[...]                            # (d_conv, d_inner)
    conv_b = conv_b_ref[...]                            # (1, d_inner)
    xpad_ref[:, 0:pad, :] = jnp.zeros((Bb, pad, d_inner), f32)
    xpad_ref[:, pad:pad + L, :] = xs.reshape(Bb, L, d_inner)
    acc = jnp.zeros((Bb, L, d_inner), f32)
    for kk in range(d_conv):                            # static, tiny
        acc = acc + xpad_ref[:, kk:kk + L, :] * conv_w[kk:kk + 1, :]
    xc = _silu(acc + conv_b).reshape(M, d_inner)        # (M, d_inner) f32
    xcb = xc.astype(bf16)

    # x_proj fused (dt | B | C), then dt_proj + softplus
    dbc = jnp.dot(xcb, w_x_ref[...], preferred_element_type=f32)
    dt_lo = dbc[:, :dt_rank]
    Bm = dbc[:, dt_rank:dt_rank + d_state]              # (M, d_state)
    Cm = dbc[:, dt_rank + d_state:]                     # (M, d_state)
    dt = _softplus(jnp.dot(dt_lo.astype(bf16), w_dt_ref[...],
                           preferred_element_type=f32) + b_dt_ref[...])

    A_T = -jnp.exp(a_log_t_ref[...])                    # (d_state, d_inner)

    # ---- selective scan, vectorized over the Bb batch elements ----
    # dA / dBx are precomputed per time-chunk into VMEM scratch (parallel
    # EUP/VPU work); the serial fori_loop over time is only
    #     h = dA[t] * h + dBx[t];   y[t] = sum_s h * C[t]
    # with carry h of shape (Bb, d_state, d_inner).  Dynamic indices inside
    # the loop hit major dims only.
    dt3 = dt.reshape(Bb, L, d_inner)
    dtx3 = (dt * xc).reshape(Bb, L, d_inner)
    B3 = Bm.reshape(Bb, L, d_state)
    C3 = Cm.reshape(Bb, L, d_state)

    # C in time-major layout (static sublane-index stores, once, off the
    # serial path)
    for b in range(Bb):
        c_ref[:, b, :] = C3[b]

    n_chunks = L // chunk
    h = jnp.zeros((Bb, d_state, d_inner), f32)
    for c in range(n_chunks):                           # static, small
        s0 = c * chunk
        dt_c = dt3[:, s0:s0 + chunk, :]                 # (Bb, chunk, di)
        da_ref[...] = jnp.exp(dt_c[:, :, None, :] * A_T[None, None, :, :])
        dbx_ref[...] = (B3[:, s0:s0 + chunk, :, None]
                        * dtx3[:, s0:s0 + chunk, None, :])
        # TODO(synk): double-buffer da_ref/dbx_ref so the next chunk's
        # precompute overlaps this chunk's serial recurrence.

        def step(t, h):
            h = da_ref[:, t] * h + dbx_ref[:, t]        # (Bb, ds, di)
            c_row = c_ref[s0 + t]                       # (Bb, ds)
            y_ref[s0 + t] = jnp.sum(h * c_row[:, :, None], axis=1)
            return h

        h = jax.lax.fori_loop(0, chunk, step, h)

    # back to batch-major row order b*L + t (static sublane-index loads + one
    # lane-free concat along the row axis)
    ys = jnp.concatenate([y_ref[:, b, :] for b in range(Bb)], axis=0)

    # gating + out_proj
    y = (ys + d_param_ref[...] * xc) * _silu(z)
    out = jnp.dot(y.astype(bf16), w_out_ref[...], preferred_element_type=f32)

    # residual (dropout == identity in eval) + LayerNorm(eps=1e-5)
    o_ref[...] = _layer_norm(x1 + out, ln2_g_ref[...],
                             ln2_b_ref[...]).reshape(Bb, L, E)


def tam_layer_forward(x, sta_p, stm_p, meta, batch_block=None):
    B, L, E = x.shape
    H = meta["num_heads"]
    d_inner, d_state = meta["d_inner"], meta["d_state"]
    d_conv, dt_rank = meta["d_conv"], meta["dt_rank"]
    assert L % 8 == 0, "sequence length must be a multiple of 8"

    vmem_cap = _vmem_capacity_bytes()
    vmem_limit = min(vmem_cap * 3 // 4, 112 * 1024 * 1024)
    scan_budget = vmem_cap // 8

    Bb = batch_block or _pick_batch_block(B, L, d_state, d_inner)
    chunk = _pick_scan_chunk(L, Bb, d_state, d_inner, scan_budget)

    kernel = functools.partial(
        tam_layer_kernel, Bb=Bb, L=L, E=E, H=H, d_inner=d_inner,
        d_state=d_state, dt_rank=dt_rank, d_conv=d_conv, chunk=chunk)

    weights = [sta_p[n] for n in STA_NAMES] + [stm_p[n] for n in STM_NAMES]

    return pl.pallas_call(
        kernel,
        out_shape=jax.ShapeDtypeStruct((B, L, E), jnp.float32),
        grid_spec=pltpu.PrefetchScalarGridSpec(
            num_scalar_prefetch=0,
            grid=(B // Bb,),
            in_specs=[pl.BlockSpec((Bb, L, E), lambda i: (i, 0, 0))]
                     + [_weight_spec() for _ in weights],
            out_specs=pl.BlockSpec((Bb, L, E), lambda i: (i, 0, 0)),
            scratch_shapes=[
                pltpu.VMEM((Bb, d_conv - 1 + L, d_inner), jnp.float32),  # xpad
                pltpu.VMEM((Bb, chunk, d_state, d_inner), jnp.float32),  # dA
                pltpu.VMEM((Bb, chunk, d_state, d_inner), jnp.float32),  # dBx
                pltpu.VMEM((L, Bb, d_state), jnp.float32),               # C t-major
                pltpu.VMEM((L, Bb, d_inner), jnp.float32),               # scan y
            ],
        ),
        compiler_params=pltpu.CompilerParams(
            dimension_semantics=("parallel",),
            vmem_limit_bytes=vmem_limit),
    )(x, *weights)


# ----------------------------------------------------------------------------
# TAM forward = num_layers x (STA -> STM), final dropout = identity (eval)
# ----------------------------------------------------------------------------
def tam_forward(x, layers, meta):
    for lp in layers:
        x = tam_layer_forward(x, lp["sta"], lp["stm"], meta)
    # TODO(synk): train-mode nn.Dropout(p=0.5) RNG masking not implemented
    # (eval-mode identity used for all three dropout sites).
    return x


# ----------------------------------------------------------------------------
# parameters
# ----------------------------------------------------------------------------
def make_params(key, emb_dim, d_state, d_conv, expand, num_layers, num_heads):
    d_inner = expand * emb_dim
    dt_rank = math.ceil(emb_dim / 16)
    f32, bf16 = jnp.float32, jnp.bfloat16
    scale = 0.1

    def nrm(k, shape, dtype=bf16):
        return (scale * jax.random.normal(k, shape, f32)).astype(dtype)

    layers = []
    for _ in range(num_layers):
        key, *ks = jax.random.split(key, 16)
        sta = {
            "wq": nrm(ks[0], (emb_dim, emb_dim)), "bq": nrm(ks[1], (1, emb_dim), f32),
            "wk": nrm(ks[2], (emb_dim, emb_dim)), "bk": nrm(ks[3], (1, emb_dim), f32),
            "wv": nrm(ks[4], (emb_dim, emb_dim)), "bv": nrm(ks[5], (1, emb_dim), f32),
            "wo": nrm(ks[6], (emb_dim, emb_dim)), "bo": nrm(ks[7], (1, emb_dim), f32),
            "ln_g": jnp.ones((1, emb_dim), f32), "ln_b": jnp.zeros((1, emb_dim), f32),
        }
        stm = {
            "w_in": nrm(ks[8], (emb_dim, 2 * d_inner)),
            "conv_w": nrm(ks[9], (d_conv, d_inner), f32),
            "conv_b": nrm(ks[10], (1, d_inner), f32),
            "w_x": nrm(ks[11], (d_inner, dt_rank + 2 * d_state)),
            "w_dt": nrm(ks[12], (dt_rank, d_inner)),
            "b_dt": nrm(ks[13], (1, d_inner), f32),
            "a_log_t": jnp.broadcast_to(
                jnp.log(jnp.arange(1, d_state + 1, dtype=f32))[:, None],
                (d_state, d_inner)).copy(),
            "d_param": jnp.ones((1, d_inner), f32),
            "w_out": nrm(ks[14], (d_inner, emb_dim)),
            "ln_g": jnp.ones((1, emb_dim), f32),
            "ln_b": jnp.zeros((1, emb_dim), f32),
        }
        layers.append({"sta": sta, "stm": stm})
    meta = dict(d_inner=d_inner, d_state=d_state, d_conv=d_conv,
                dt_rank=dt_rank, num_heads=num_heads)
    return layers, meta


# ----------------------------------------------------------------------------
# pure-JAX reference (mirrors the kernels, including bf16 MXU inputs)
# ----------------------------------------------------------------------------
def _ref_sta(x, p, num_heads):
    B, L, E = x.shape
    dk = E // num_heads
    f32, bf16 = jnp.float32, jnp.bfloat16
    xf = x.reshape(B * L, E)
    xb = xf.astype(bf16)
    q = jnp.dot(xb, p["wq"], preferred_element_type=f32) + p["bq"]
    k = jnp.dot(xb, p["wk"], preferred_element_type=f32) + p["bk"]
    v = jnp.dot(xb, p["wv"], preferred_element_type=f32) + p["bv"]
    scale = 1.0 / math.sqrt(dk)
    outs = []
    for hd in range(num_heads):
        sl = slice(hd * dk, (hd + 1) * dk)
        qh = q[:, sl].reshape(B, L, dk)
        kh = k[:, sl].reshape(B, L, dk)
        vh = v[:, sl].reshape(B, L, dk)
        s = jnp.einsum("bqd,bkd->bqk", qh.astype(bf16), kh.astype(bf16),
                       preferred_element_type=f32) * scale
        m = jnp.max(s, axis=-1, keepdims=True)
        pw = jnp.exp(s - m)
        pw = pw / jnp.sum(pw, axis=-1, keepdims=True)
        oh = jnp.einsum("bqk,bkd->bqd", pw.astype(bf16), vh.astype(bf16),
                        preferred_element_type=f32)
        outs.append(oh.reshape(B * L, dk))
    att = jnp.concatenate(outs, axis=-1)
    out = jnp.dot(att.astype(bf16), p["wo"], preferred_element_type=f32) + p["bo"]
    return _layer_norm(xf + out, p["ln_g"], p["ln_b"]).reshape(B, L, E)


def _ref_stm(x, p, meta):
    d_inner, d_state, d_conv = meta["d_inner"], meta["d_state"], meta["d_conv"]
    dt_rank = meta["dt_rank"]
    f32, bf16 = jnp.float32, jnp.bfloat16
    B, L, E = x.shape

    def one(xs):                                        # (L, E)
        xb = xs.astype(bf16)
        xz = jnp.dot(xb, p["w_in"], preferred_element_type=f32)
        xin = xz[:, :d_inner]
        z = xz[:, d_inner:]
        pad = d_conv - 1
        xpad = jnp.concatenate([jnp.zeros((pad, d_inner), f32), xin], axis=0)
        acc = jnp.zeros((L, d_inner), f32)
        for kk in range(d_conv):
            acc = acc + xpad[kk:kk + L, :] * p["conv_w"][kk:kk + 1, :]
        xc = _silu(acc + p["conv_b"])
        xcb = xc.astype(bf16)
        dbc = jnp.dot(xcb, p["w_x"], preferred_element_type=f32)
        dt_lo = dbc[:, :dt_rank]
        Bm = dbc[:, dt_rank:dt_rank + d_state]
        Cm = dbc[:, dt_rank + d_state:]
        dt = _softplus(jnp.dot(dt_lo.astype(bf16), p["w_dt"],
                               preferred_element_type=f32) + p["b_dt"])
        A_T = -jnp.exp(p["a_log_t"])

        def step(h, inp):
            dt_t, B_t, C_t, x_t = inp
            h = (jnp.exp(dt_t[None, :] * A_T) * h
                 + B_t[:, None] * (dt_t * x_t)[None, :])
            return h, jnp.sum(h * C_t[:, None], axis=0)

        _, ys = jax.lax.scan(step, jnp.zeros((d_state, d_inner), f32),
                             (dt, Bm, Cm, xc))
        y = (ys + p["d_param"] * xc) * _silu(z)
        out = jnp.dot(y.astype(bf16), p["w_out"], preferred_element_type=f32)
        return _layer_norm(xs + out, p["ln_g"], p["ln_b"])

    return jax.vmap(one)(x)


def tam_reference(x, layers, meta):
    for lp in layers:
        x = _ref_sta(x, lp["sta"], meta["num_heads"])
        x = _ref_stm(x, lp["stm"], meta)
    return x


# ----------------------------------------------------------------------------
if __name__ == "__main__":
    # small shapes: batch=2, seq=8, emb_dim=32, heads=8, d_state=8, d_conv=4,
    # expand=2, num_layers=2
    B, L, EMB = 2, 8, 32
    D_STATE, D_CONV, EXPAND = 8, 4, 2
    NUM_LAYERS, NUM_HEADS = 2, 8

    key = jax.random.PRNGKey(0)
    kx, kp = jax.random.split(key)
    x = jax.random.normal(kx, (B, L, EMB), jnp.float32)
    layers, meta = make_params(kp, EMB, D_STATE, D_CONV, EXPAND,
                               NUM_LAYERS, NUM_HEADS)

    out = jax.block_until_ready(tam_forward(x, layers, meta))
    ref = jax.block_until_ready(tam_reference(x, layers, meta))

    assert out.shape == (B, L, EMB)
    err = float(jnp.max(jnp.abs(out - ref)))
    assert err < 2e-3, f"mismatch vs pure-JAX reference: {err}"
    print("KERNEL_OK")
</pallas_src>

<mosaic_0001>
module attributes {stable_mosaic.version = 11 : i64} {
  func.func @tam_layer_kernel(%arg0: i32, %arg1: memref<1x8x32xf32, #tpu.memory_space<vmem>>, %arg2: memref<32x32xbf16, #tpu.memory_space<vmem>>, %arg3: memref<1x32xf32, #tpu.memory_space<vmem>>, %arg4: memref<32x32xbf16, #tpu.memory_space<vmem>>, %arg5: memref<1x32xf32, #tpu.memory_space<vmem>>, %arg6: memref<32x32xbf16, #tpu.memory_space<vmem>>, %arg7: memref<1x32xf32, #tpu.memory_space<vmem>>, %arg8: memref<32x32xbf16, #tpu.memory_space<vmem>>, %arg9: memref<1x32xf32, #tpu.memory_space<vmem>>, %arg10: memref<1x32xf32, #tpu.memory_space<vmem>>, %arg11: memref<1x32xf32, #tpu.memory_space<vmem>>, %arg12: memref<32x128xbf16, #tpu.memory_space<vmem>>, %arg13: memref<4x64xf32, #tpu.memory_space<vmem>>, %arg14: memref<1x64xf32, #tpu.memory_space<vmem>>, %arg15: memref<64x18xbf16, #tpu.memory_space<vmem>>, %arg16: memref<2x64xbf16, #tpu.memory_space<vmem>>, %arg17: memref<1x64xf32, #tpu.memory_space<vmem>>, %arg18: memref<8x64xf32, #tpu.memory_space<vmem>>, %arg19: memref<1x64xf32, #tpu.memory_space<vmem>>, %arg20: memref<64x32xbf16, #tpu.memory_space<vmem>>, %arg21: memref<1x32xf32, #tpu.memory_space<vmem>>, %arg22: memref<1x32xf32, #tpu.memory_space<vmem>>, %arg23: memref<1x8x32xf32, #tpu.memory_space<vmem>>, %arg24: memref<1x11x64xf32, #tpu.memory_space<vmem>>, %arg25: memref<1x8x8x64xf32, #tpu.memory_space<vmem>>, %arg26: memref<1x8x8x64xf32, #tpu.memory_space<vmem>>, %arg27: memref<8x1x8xf32, #tpu.memory_space<vmem>>, %arg28: memref<8x1x64xf32, #tpu.memory_space<vmem>>) attributes {dimension_semantics = [#tpu.dimension_semantics<parallel>], iteration_bounds = array<i64: 2>, scalar_prefetch = 0 : i64, scratch_operands = 5 : i64, tpu.core_type = #tpu.core_type<tc>, window_params = [{transform_indices = @transform_0, window_bounds = array<i64: 1, 8, 32>}, {pipeline_mode = #tpu.pipeline_mode<synchronous>, transform_indices = @transform_1, window_bounds = array<i64: 32, 32>}, {pipeline_mode = #tpu.pipeline_mode<synchronous>, transform_indices = @transform_2, window_bounds = array<i64: 1, 32>}, {pipeline_mode = #tpu.pipeline_mode<synchronous>, transform_indices = @transform_3, window_bounds = array<i64: 32, 32>}, {pipeline_mode = #tpu.pipeline_mode<synchronous>, transform_indices = @transform_4, window_bounds = array<i64: 1, 32>}, {pipeline_mode = #tpu.pipeline_mode<synchronous>, transform_indices = @transform_5, window_bounds = array<i64: 32, 32>}, {pipeline_mode = #tpu.pipeline_mode<synchronous>, transform_indices = @transform_6, window_bounds = array<i64: 1, 32>}, {pipeline_mode = #tpu.pipeline_mode<synchronous>, transform_indices = @transform_7, window_bounds = array<i64: 32, 32>}, {pipeline_mode = #tpu.pipeline_mode<synchronous>, transform_indices = @transform_8, window_bounds = array<i64: 1, 32>}, {pipeline_mode = #tpu.pipeline_mode<synchronous>, transform_indices = @transform_9, window_bounds = array<i64: 1, 32>}, {pipeline_mode = #tpu.pipeline_mode<synchronous>, transform_indices = @transform_10, window_bounds = array<i64: 1, 32>}, {pipeline_mode = #tpu.pipeline_mode<synchronous>, transform_indices = @transform_11, window_bounds = array<i64: 32, 128>}, {pipeline_mode = #tpu.pipeline_mode<synchronous>, transform_indices = @transform_12, window_bounds = array<i64: 4, 64>}, {pipeline_mode = #tpu.pipeline_mode<synchronous>, transform_indices = @transform_13, window_bounds = array<i64: 1, 64>}, {pipeline_mode = #tpu.pipeline_mode<synchronous>, transform_indices = @transform_14, window_bounds = array<i64: 64, 18>}, {pipeline_mode = #tpu.pipeline_mode<synchronous>, transform_indices = @transform_15, window_bounds = array<i64: 2, 64>}, {pipeline_mode = #tpu.pipeline_mode<synchronous>, transform_indices = @transform_16, window_bounds = array<i64: 1, 64>}, {pipeline_mode = #tpu.pipeline_mode<synchronous>, transform_indices = @transform_17, window_bounds = array<i64: 8, 64>}, {pipeline_mode = #tpu.pipeline_mode<synchronous>, transform_indices = @transform_18, window_bounds = array<i64: 1, 64>}, {pipeline_mode = #tpu.pipeline_mode<synchronous>, transform_indices = @transform_19, window_bounds = array<i64: 64, 32>}, {pipeline_mode = #tpu.pipeline_mode<synchronous>, transform_indices = @transform_20, window_bounds = array<i64: 1, 32>}, {pipeline_mode = #tpu.pipeline_mode<synchronous>, transform_indices = @transform_21, window_bounds = array<i64: 1, 32>}, {transform_indices = @transform_22, window_bounds = array<i64: 1, 8, 32>}]} {
    %c0 = arith.constant 0 : index
    %c0_0 = arith.constant 0 : index
    %c0_1 = arith.constant 0 : index
    %0 = vector.load %arg1[%c0, %c0_0, %c0_1] : memref<1x8x32xf32, #tpu.memory_space<vmem>>, vector<1x8x32xf32>
    %1 = vector.shape_cast %0 : vector<1x8x32xf32> to vector<8x32xf32>
    %2 = arith.truncf %1 : vector<8x32xf32> to vector<8x32xbf16>
    %c0_2 = arith.constant 0 : index
    %c0_3 = arith.constant 0 : index
    %3 = vector.load %arg2[%c0_2, %c0_3] : memref<32x32xbf16, #tpu.memory_space<vmem>>, vector<32x32xbf16>
    %cst = arith.constant dense<0.000000e+00> : vector<8x32xf32>
    %4 = tpu.matmul %2, %3, %cst {dimension_numbers = #tpu.dot_dimension_numbers<[1], [0], [0], [1], [0, 0, 1, 1], [], []>} : vector<8x32xbf16>, vector<32x32xbf16>, vector<8x32xf32> -> vector<8x32xf32>
    %c0_4 = arith.constant 0 : index
    %c0_5 = arith.constant 0 : index
    %5 = vector.load %arg3[%c0_4, %c0_5] : memref<1x32xf32, #tpu.memory_space<vmem>>, vector<1x32xf32>
    %6 = vector.broadcast %5 : vector<1x32xf32> to vector<8x32xf32>
    %7 = arith.addf %4, %6 : vector<8x32xf32>
    %c0_6 = arith.constant 0 : index
    %c0_7 = arith.constant 0 : index
    %8 = vector.load %arg4[%c0_6, %c0_7] : memref<32x32xbf16, #tpu.memory_space<vmem>>, vector<32x32xbf16>
    %cst_8 = arith.constant dense<0.000000e+00> : vector<8x32xf32>
    %9 = tpu.matmul %2, %8, %cst_8 {dimension_numbers = #tpu.dot_dimension_numbers<[1], [0], [0], [1], [0, 0, 1, 1], [], []>} : vector<8x32xbf16>, vector<32x32xbf16>, vector<8x32xf32> -> vector<8x32xf32>
    %c0_9 = arith.constant 0 : index
    %c0_10 = arith.constant 0 : index
    %10 = vector.load %arg5[%c0_9, %c0_10] : memref<1x32xf32, #tpu.memory_space<vmem>>, vector<1x32xf32>
    %11 = vector.broadcast %10 : vector<1x32xf32> to vector<8x32xf32>
    %12 = arith.addf %9, %11 : vector<8x32xf32>
    %c0_11 = arith.constant 0 : index
    %c0_12 = arith.constant 0 : index
    %13 = vector.load %arg6[%c0_11, %c0_12] : memref<32x32xbf16, #tpu.memory_space<vmem>>, vector<32x32xbf16>
    %cst_13 = arith.constant dense<0.000000e+00> : vector<8x32xf32>
    %14 = tpu.matmul %2, %13, %cst_13 {dimension_numbers = #tpu.dot_dimension_numbers<[1], [0], [0], [1], [0, 0, 1, 1], [], []>} : vector<8x32xbf16>, vector<32x32xbf16>, vector<8x32xf32> -> vector<8x32xf32>
    %c0_14 = arith.constant 0 : index
    %c0_15 = arith.constant 0 : index
    %15 = vector.load %arg7[%c0_14, %c0_15] : memref<1x32xf32, #tpu.memory_space<vmem>>, vector<1x32xf32>
    %16 = vector.broadcast %15 : vector<1x32xf32> to vector<8x32xf32>
    %17 = arith.addf %14, %16 : vector<8x32xf32>
    %18 = vector.extract_strided_slice %7 {offsets = [0, 0], sizes = [8, 4], strides = [1, 1]} : vector<8x32xf32> to vector<8x4xf32>
    %19 = vector.shape_cast %18 : vector<8x4xf32> to vector<1x8x4xf32>
    %20 = vector.extract_strided_slice %12 {offsets = [0, 0], sizes = [8, 4], strides = [1, 1]} : vector<8x32xf32> to vector<8x4xf32>
    %21 = vector.shape_cast %20 : vector<8x4xf32> to vector<1x8x4xf32>
    %22 = vector.extract_strided_slice %17 {offsets = [0, 0], sizes = [8, 4], strides = [1, 1]} : vector<8x32xf32> to vector<8x4xf32>
    %23 = vector.shape_cast %22 : vector<8x4xf32> to vector<1x8x4xf32>
    %24 = arith.truncf %19 : vector<1x8x4xf32> to vector<1x8x4xbf16>
    %25 = arith.truncf %21 : vector<1x8x4xf32> to vector<1x8x4xbf16>
    "tpu.trace_start"() <{level = 10 : i32, message = "bqd,bkd->bqk"}> : () -> ()
    %cst_16 = arith.constant dense<0.000000e+00> : vector<1x8x8xf32>
    %26 = tpu.matmul %24, %25, %cst_16 {dimension_numbers = #tpu.dot_dimension_numbers<[2], [2], [1], [1], [0, 0, 0, 1, 1, 1], [0], [0]>} : vector<1x8x4xbf16>, vector<1x8x4xbf16>, vector<1x8x8xf32> -> vector<1x8x8xf32>
    "tpu.trace_stop"() : () -> ()
    %cst_17 = arith.constant 5.000000e-01 : f32
    %27 = vector.broadcast %cst_17 : f32 to vector<1x8x8xf32>
    %28 = arith.mulf %26, %27 : vector<1x8x8xf32>
    %cst_18 = arith.constant dense<0xFF800000> : vector<1x8xf32>
    %29 = vector.multi_reduction <maximumf>, %28, %cst_18 [2] : vector<1x8x8xf32> to vector<1x8xf32>
    %30 = vector.shape_cast %29 : vector<1x8xf32> to vector<1x8x1xf32>
    %31 = vector.broadcast %30 : vector<1x8x1xf32> to vector<1x8x8xf32>
    %32 = arith.subf %28, %31 : vector<1x8x8xf32>
    %33 = math.exp %32 : vector<1x8x8xf32>
    %cst_19 = arith.constant dense<0.000000e+00> : vector<1x8xf32>
    %34 = vector.multi_reduction <add>, %33, %cst_19 [2] : vector<1x8x8xf32> to vector<1x8xf32>
    %35 = vector.shape_cast %34 : vector<1x8xf32> to vector<1x8x1xf32>
    %36 = tpu.reciprocal %35 : vector<1x8x1xf32> -> vector<1x8x1xf32>
    %37 = vector.broadcast %36 : vector<1x8x1xf32> to vector<1x8x8xf32>
    %38 = arith.mulf %33, %37 : vector<1x8x8xf32>
    %39 = arith.truncf %38 : vector<1x8x8xf32> to vector<1x8x8xbf16>
    %40 = arith.truncf %23 : vector<1x8x4xf32> to vector<1x8x4xbf16>
    "tpu.trace_start"() <{level = 10 : i32, message = "bqk,bkd->bqd"}> : () -> ()
    %cst_20 = arith.constant dense<0.000000e+00> : vector<1x8x4xf32>
    %41 = tpu.matmul %39, %40, %cst_20 {dimension_numbers = #tpu.dot_dimension_numbers<[2], [1], [1], [2], [0, 0, 0, 1, 1, 2], [0], [0]>} : vector<1x8x8xbf16>, vector<1x8x4xbf16>, vector<1x8x4xf32> -> vector<1x8x4xf32>
    "tpu.trace_stop"() : () -> ()
    %42 = vector.shape_cast %41 : vector<1x8x4xf32> to vector<8x4xf32>
    %43 = vector.extract_strided_slice %7 {offsets = [0, 4], sizes = [8, 4], strides = [1, 1]} : vector<8x32xf32> to vector<8x4xf32>
    %44 = vector.shape_cast %43 : vector<8x4xf32> to vector<1x8x4xf32>
    %45 = vector.extract_strided_slice %12 {offsets = [0, 4], sizes = [8, 4], strides = [1, 1]} : vector<8x32xf32> to vector<8x4xf32>
    %46 = vector.shape_cast %45 : vector<8x4xf32> to vector<1x8x4xf32>
    %47 = vector.extract_strided_slice %17 {offsets = [0, 4], sizes = [8, 4], strides = [1, 1]} : vector<8x32xf32> to vector<8x4xf32>
    %48 = vector.shape_cast %47 : vector<8x4xf32> to vector<1x8x4xf32>
    %49 = arith.truncf %44 : vector<1x8x4xf32> to vector<1x8x4xbf16>
    %50 = arith.truncf %46 : vector<1x8x4xf32> to vector<1x8x4xbf16>
    "tpu.trace_start"() <{level = 10 : i32, message = "bqd,bkd->bqk"}> : () -> ()
    %cst_21 = arith.constant dense<0.000000e+00> : vector<1x8x8xf32>
    %51 = tpu.matmul %49, %50, %cst_21 {dimension_numbers = #tpu.dot_dimension_numbers<[2], [2], [1], [1], [0, 0, 0, 1, 1, 1], [0], [0]>} : vector<1x8x4xbf16>, vector<1x8x4xbf16>, vector<1x8x8xf32> -> vector<1x8x8xf32>
    "tpu.trace_stop"() : () -> ()
    %cst_22 = arith.constant 5.000000e-01 : f32
    %52 = vector.broadcast %cst_22 : f32 to vector<1x8x8xf32>
    %53 = arith.mulf %51, %52 : vector<1x8x8xf32>
    %cst_23 = arith.constant dense<0xFF800000> : vector<1x8xf32>
    %54 = vector.multi_reduction <maximumf>, %53, %cst_23 [2] : vector<1x8x8xf32> to vector<1x8xf32>
    %55 = vector.shape_cast %54 : vector<1x8xf32> to vector<1x8x1xf32>
    %56 = vector.broadcast %55 : vector<1x8x1xf32> to vector<1x8x8xf32>
    %57 = arith.subf %53, %56 : vector<1x8x8xf32>
    %58 = math.exp %57 : vector<1x8x8xf32>
    %cst_24 = arith.constant dense<0.000000e+00> : vector<1x8xf32>
    %59 = vector.multi_reduction <add>, %58, %cst_24 [2] : vector<1x8x8xf32> to vector<1x8xf32>
    %60 = vector.shape_cast %59 : vector<1x8xf32> to vector<1x8x1xf32>
    %61 = tpu.reciprocal %60 : vector<1x8x1xf32> -> vector<1x8x1xf32>
    %62 = vector.broadcast %61 : vector<1x8x1xf32> to vector<1x8x8xf32>
    %63 = arith.mulf %58, %62 : vector<1x8x8xf32>
    %64 = arith.truncf %63 : vector<1x8x8xf32> to vector<1x8x8xbf16>
    %65 = arith.truncf %48 : vector<1x8x4xf32> to vector<1x8x4xbf16>
    "tpu.trace_start"() <{level = 10 : i32, message = "bqk,bkd->bqd"}> : () -> ()
    %cst_25 = arith.constant dense<0.000000e+00> : vector<1x8x4xf32>
    %66 = tpu.matmul %64, %65, %cst_25 {dimension_numbers = #tpu.dot_dimension_numbers<[2], [1], [1], [2], [0, 0, 0, 1, 1, 2], [0], [0]>} : vector<1x8x8xbf16>, vector<1x8x4xbf16>, vector<1x8x4xf32> -> vector<1x8x4xf32>
    "tpu.trace_stop"() : () -> ()
    %67 = vector.shape_cast %66 : vector<1x8x4xf32> to vector<8x4xf32>
    %68 = vector.extract_strided_slice %7 {offsets = [0, 8], sizes = [8, 4], strides = [1, 1]} : vector<8x32xf32> to vector<8x4xf32>
    %69 = vector.shape_cast %68 : vector<8x4xf32> to vector<1x8x4xf32>
    %70 = vector.extract_strided_slice %12 {offsets = [0, 8], sizes = [8, 4], strides = [1, 1]} : vector<8x32xf32> to vector<8x4xf32>
    %71 = vector.shape_cast %70 : vector<8x4xf32> to vector<1x8x4xf32>
    %72 = vector.extract_strided_slice %17 {offsets = [0, 8], sizes = [8, 4], strides = [1, 1]} : vector<8x32xf32> to vector<8x4xf32>
    %73 = vector.shape_cast %72 : vector<8x4xf32> to vector<1x8x4xf32>
    %74 = arith.truncf %69 : vector<1x8x4xf32> to vector<1x8x4xbf16>
    %75 = arith.truncf %71 : vector<1x8x4xf32> to vector<1x8x4xbf16>
    "tpu.trace_start"() <{level = 10 : i32, message = "bqd,bkd->bqk"}> : () -> ()
    %cst_26 = arith.constant dense<0.000000e+00> : vector<1x8x8xf32>
    %76 = tpu.matmul %74, %75, %cst_26 {dimension_numbers = #tpu.dot_dimension_numbers<[2], [2], [1], [1], [0, 0, 0, 1, 1, 1], [0], [0]>} : vector<1x8x4xbf16>, vector<1x8x4xbf16>, vector<1x8x8xf32> -> vector<1x8x8xf32>
    "tpu.trace_stop"() : () -> ()
    %cst_27 = arith.constant 5.000000e-01 : f32
    %77 = vector.broadcast %cst_27 : f32 to vector<1x8x8xf32>
    %78 = arith.mulf %76, %77 : vector<1x8x8xf32>
    %cst_28 = arith.constant dense<0xFF800000> : vector<1x8xf32>
    %79 = vector.multi_reduction <maximumf>, %78, %cst_28 [2] : vector<1x8x8xf32> to vector<1x8xf32>
    %80 = vector.shape_cast %79 : vector<1x8xf32> to vector<1x8x1xf32>
    %81 = vector.broadcast %80 : vector<1x8x1xf32> to vector<1x8x8xf32>
    %82 = arith.subf %78, %81 : vector<1x8x8xf32>
    %83 = math.exp %82 : vector<1x8x8xf32>
    %cst_29 = arith.constant dense<0.000000e+00> : vector<1x8xf32>
    %84 = vector.multi_reduction <add>, %83, %cst_29 [2] : vector<1x8x8xf32> to vector<1x8xf32>
    %85 = vector.shape_cast %84 : vector<1x8xf32> to vector<1x8x1xf32>
    %86 = tpu.reciprocal %85 : vector<1x8x1xf32> -> vector<1x8x1xf32>
    %87 = vector.broadcast %86 : vector<1x8x1xf32> to vector<1x8x8xf32>
    %88 = arith.mulf %83, %87 : vector<1x8x8xf32>
    %89 = arith.truncf %88 : vector<1x8x8xf32> to vector<1x8x8xbf16>
    %90 = arith.truncf %73 : vector<1x8x4xf32> to vector<1x8x4xbf16>
    "tpu.trace_start"() <{level = 10 : i32, message = "bqk,bkd->bqd"}> : () -> ()
    %cst_30 = arith.constant dense<0.000000e+00> : vector<1x8x4xf32>
    %91 = tpu.matmul %89, %90, %cst_30 {dimension_numbers = #tpu.dot_dimension_numbers<[2], [1], [1], [2], [0, 0, 0, 1, 1, 2], [0], [0]>} : vector<1x8x8xbf16>, vector<1x8x4xbf16>, vector<1x8x4xf32> -> vector<1x8x4xf32>
    "tpu.trace_stop"() : () -> ()
    %92 = vector.shape_cast %91 : vector<1x8x4xf32> to vector<8x4xf32>
    %93 = vector.extract_strided_slice %7 {offsets = [0, 12], sizes = [8, 4], strides = [1, 1]} : vector<8x32xf32> to vector<8x4xf32>
    %94 = vector.shape_cast %93 : vector<8x4xf32> to vector<1x8x4xf32>
    %95 = vector.extract_strided_slice %12 {offsets = [0, 12], sizes = [8, 4], strides = [1, 1]} : vector<8x32xf32> to vector<8x4xf32>
    %96 = vector.shape_cast %95 : vector<8x4xf32> to vector<1x8x4xf32>
    %97 = vector.extract_strided_slice %17 {offsets = [0, 12], sizes = [8, 4], strides = [1, 1]} : vector<8x32xf32> to vector<8x4xf32>
    %98 = vector.shape_cast %97 : vector<8x4xf32> to vector<1x8x4xf32>
    %99 = arith.truncf %94 : vector<1x8x4xf32> to vector<1x8x4xbf16>
    %100 = arith.truncf %96 : vector<1x8x4xf32> to vector<1x8x4xbf16>
    "tpu.trace_start"() <{level = 10 : i32, message = "bqd,bkd->bqk"}> : () -> ()
    %cst_31 = arith.constant dense<0.000000e+00> : vector<1x8x8xf32>
    %101 = tpu.matmul %99, %100, %cst_31 {dimension_numbers = #tpu.dot_dimension_numbers<[2], [2], [1], [1], [0, 0, 0, 1, 1, 1], [0], [0]>} : vector<1x8x4xbf16>, vector<1x8x4xbf16>, vector<1x8x8xf32> -> vector<1x8x8xf32>
    "tpu.trace_stop"() : () -> ()
    %cst_32 = arith.constant 5.000000e-01 : f32
    %102 = vector.broadcast %cst_32 : f32 to vector<1x8x8xf32>
    %103 = arith.mulf %101, %102 : vector<1x8x8xf32>
    %cst_33 = arith.constant dense<0xFF800000> : vector<1x8xf32>
    %104 = vector.multi_reduction <maximumf>, %103, %cst_33 [2] : vector<1x8x8xf32> to vector<1x8xf32>
    %105 = vector.shape_cast %104 : vector<1x8xf32> to vector<1x8x1xf32>
    %106 = vector.broadcast %105 : vector<1x8x1xf32> to vector<1x8x8xf32>
    %107 = arith.subf %103, %106 : vector<1x8x8xf32>
    %108 = math.exp %107 : vector<1x8x8xf32>
    %cst_34 = arith.constant dense<0.000000e+00> : vector<1x8xf32>
    %109 = vector.multi_reduction <add>, %108, %cst_34 [2] : vector<1x8x8xf32> to vector<1x8xf32>
    %110 = vector.shape_cast %109 : vector<1x8xf32> to vector<1x8x1xf32>
    %111 = tpu.reciprocal %110 : vector<1x8x1xf32> -> vector<1x8x1xf32>
    %112 = vector.broadcast %111 : vector<1x8x1xf32> to vector<1x8x8xf32>
    %113 = arith.mulf %108, %112 : vector<1x8x8xf32>
    %114 = arith.truncf %113 : vector<1x8x8xf32> to vector<1x8x8xbf16>
    %115 = arith.truncf %98 : vector<1x8x4xf32> to vector<1x8x4xbf16>
    "tpu.trace_start"() <{level = 10 : i32, message = "bqk,bkd->bqd"}> : () -> ()
    %cst_35 = arith.constant dense<0.000000e+00> : vector<1x8x4xf32>
    %116 = tpu.matmul %114, %115, %cst_35 {dimension_numbers = #tpu.dot_dimension_numbers<[2], [1], [1], [2], [0, 0, 0, 1, 1, 2], [0], [0]>} : vector<1x8x8xbf16>, vector<1x8x4xbf16>, vector<1x8x4xf32> -> vector<1x8x4xf32>
    "tpu.trace_stop"() : () -> ()
    %117 = vector.shape_cast %116 : vector<1x8x4xf32> to vector<8x4xf32>
    %118 = vector.extract_strided_slice %7 {offsets = [0, 16], sizes = [8, 4], strides = [1, 1]} : vector<8x32xf32> to vector<8x4xf32>
    %119 = vector.shape_cast %118 : vector<8x4xf32> to vector<1x8x4xf32>
    %120 = vector.extract_strided_slice %12 {offsets = [0, 16], sizes = [8, 4], strides = [1, 1]} : vector<8x32xf32> to vector<8x4xf32>
    %121 = vector.shape_cast %120 : vector<8x4xf32> to vector<1x8x4xf32>
    %122 = vector.extract_strided_slice %17 {offsets = [0, 16], sizes = [8, 4], strides = [1, 1]} : vector<8x32xf32> to vector<8x4xf32>
    %123 = vector.shape_cast %122 : vector<8x4xf32> to vector<1x8x4xf32>
    %124 = arith.truncf %119 : vector<1x8x4xf32> to vector<1x8x4xbf16>
    %125 = arith.truncf %121 : vector<1x8x4xf32> to vector<1x8x4xbf16>
    "tpu.trace_start"() <{level = 10 : i32, message = "bqd,bkd->bqk"}> : () -> ()
    %cst_36 = arith.constant dense<0.000000e+00> : vector<1x8x8xf32>
    %126 = tpu.matmul %124, %125, %cst_36 {dimension_numbers = #tpu.dot_dimension_numbers<[2], [2], [1], [1], [0, 0, 0, 1, 1, 1], [0], [0]>} : vector<1x8x4xbf16>, vector<1x8x4xbf16>, vector<1x8x8xf32> -> vector<1x8x8xf32>
    "tpu.trace_stop"() : () -> ()
    %cst_37 = arith.constant 5.000000e-01 : f32
    %127 = vector.broadcast %cst_37 : f32 to vector<1x8x8xf32>
    %128 = arith.mulf %126, %127 : vector<1x8x8xf32>
    %cst_38 = arith.constant dense<0xFF800000> : vector<1x8xf32>
    %129 = vector.multi_reduction <maximumf>, %128, %cst_38 [2] : vector<1x8x8xf32> to vector<1x8xf32>
    %130 = vector.shape_cast %129 : vector<1x8xf32> to vector<1x8x1xf32>
    %131 = vector.broadcast %130 : vector<1x8x1xf32> to vector<1x8x8xf32>
    %132 = arith.subf %128, %131 : vector<1x8x8xf32>
    %133 = math.exp %132 : vector<1x8x8xf32>
    %cst_39 = arith.constant dense<0.000000e+00> : vector<1x8xf32>
    %134 = vector.multi_reduction <add>, %133, %cst_39 [2] : vector<1x8x8xf32> to vector<1x8xf32>
    %135 = vector.shape_cast %134 : vector<1x8xf32> to vector<1x8x1xf32>
    %136 = tpu.reciprocal %135 : vector<1x8x1xf32> -> vector<1x8x1xf32>
    %137 = vector.broadcast %136 : vector<1x8x1xf32> to vector<1x8x8xf32>
    %138 = arith.mulf %133, %137 : vector<1x8x8xf32>
    %139 = arith.truncf %138 : vector<1x8x8xf32> to vector<1x8x8xbf16>
    %140 = arith.truncf %123 : vector<1x8x4xf32> to vector<1x8x4xbf16>
    "tpu.trace_start"() <{level = 10 : i32, message = "bqk,bkd->bqd"}> : () -> ()
    %cst_40 = arith.constant dense<0.000000e+00> : vector<1x8x4xf32>
    %141 = tpu.matmul %139, %140, %cst_40 {dimension_numbers = #tpu.dot_dimension_numbers<[2], [1], [1], [2], [0, 0, 0, 1, 1, 2], [0], [0]>} : vector<1x8x8xbf16>, vector<1x8x4xbf16>, vector<1x8x4xf32> -> vector<1x8x4xf32>
    "tpu.trace_stop"() : () -> ()
    %142 = vector.shape_cast %141 : vector<1x8x4xf32> to vector<8x4xf32>
    %143 = vector.extract_strided_slice %7 {offsets = [0, 20], sizes = [8, 4], strides = [1, 1]} : vector<8x32xf32> to vector<8x4xf32>
    %144 = vector.shape_cast %143 : vector<8x4xf32> to vector<1x8x4xf32>
    %145 = vector.extract_strided_slice %12 {offsets = [0, 20], sizes = [8, 4], strides = [1, 1]} : vector<8x32xf32> to vector<8x4xf32>
    %146 = vector.shape_cast %145 : vector<8x4xf32> to vector<1x8x4xf32>
    %147 = vector.extract_strided_slice %17 {offsets = [0, 20], sizes = [8, 4], strides = [1, 1]} : vector<8x32xf32> to vector<8x4xf32>
    %148 = vector.shape_cast %147 : vector<8x4xf32> to vector<1x8x4xf32>
    %149 = arith.truncf %144 : vector<1x8x4xf32> to vector<1x8x4xbf16>
    %150 = arith.truncf %146 : vector<1x8x4xf32> to vector<1x8x4xbf16>
    "tpu.trace_start"() <{level = 10 : i32, message = "bqd,bkd->bqk"}> : () -> ()
    %cst_41 = arith.constant dense<0.000000e+00> : vector<1x8x8xf32>
    %151 = tpu.matmul %149, %150, %cst_41 {dimension_numbers = #tpu.dot_dimension_numbers<[2], [2], [1], [1], [0, 0, 0, 1, 1, 1], [0], [0]>} : vector<1x8x4xbf16>, vector<1x8x4xbf16>, vector<1x8x8xf32> -> vector<1x8x8xf32>
    "tpu.trace_stop"() : () -> ()
    %cst_42 = arith.constant 5.000000e-01 : f32
    %152 = vector.broadcast %cst_42 : f32 to vector<1x8x8xf32>
    %153 = arith.mulf %151, %152 : vector<1x8x8xf32>
    %cst_43 = arith.constant dense<0xFF800000> : vector<1x8xf32>
    %154 = vector.multi_reduction <maximumf>, %153, %cst_43 [2] : vector<1x8x8xf32> to vector<1x8xf32>
    %155 = vector.shape_cast %154 : vector<1x8xf32> to vector<1x8x1xf32>
    %156 = vector.broadcast %155 : vector<1x8x1xf32> to vector<1x8x8xf32>
    %157 = arith.subf %153, %156 : vector<1x8x8xf32>
    %158 = math.exp %157 : vector<1x8x8xf32>
    %cst_44 = arith.constant dense<0.000000e+00> : vector<1x8xf32>
    %159 = vector.multi_reduction <add>, %158, %cst_44 [2] : vector<1x8x8xf32> to vector<1x8xf32>
    %160 = vector.shape_cast %159 : vector<1x8xf32> to vector<1x8x1xf32>
    %161 = tpu.reciprocal %160 : vector<1x8x1xf32> -> vector<1x8x1xf32>
    %162 = vector.broadcast %161 : vector<1x8x1xf32> to vector<1x8x8xf32>
    %163 = arith.mulf %158, %162 : vector<1x8x8xf32>
    %164 = arith.truncf %163 : vector<1x8x8xf32> to vector<1x8x8xbf16>
    %165 = arith.truncf %148 : vector<1x8x4xf32> to vector<1x8x4xbf16>
    "tpu.trace_start"() <{level = 10 : i32, message = "bqk,bkd->bqd"}> : () -> ()
    %cst_45 = arith.constant dense<0.000000e+00> : vector<1x8x4xf32>
    %166 = tpu.matmul %164, %165, %cst_45 {dimension_numbers = #tpu.dot_dimension_numbers<[2], [1], [1], [2], [0, 0, 0, 1, 1, 2], [0], [0]>} : vector<1x8x8xbf16>, vector<1x8x4xbf16>, vector<1x8x4xf32> -> vector<1x8x4xf32>
    "tpu.trace_stop"() : () -> ()
    %167 = vector.shape_cast %166 : vector<1x8x4xf32> to vector<8x4xf32>
    %168 = vector.extract_strided_slice %7 {offsets = [0, 24], sizes = [8, 4], strides = [1, 1]} : vector<8x32xf32> to vector<8x4xf32>
    %169 = vector.shape_cast %168 : vector<8x4xf32> to vector<1x8x4xf32>
    %170 = vector.extract_strided_slice %12 {offsets = [0, 24], sizes = [8, 4], strides = [1, 1]} : vector<8x32xf32> to vector<8x4xf32>
    %171 = vector.shape_cast %170 : vector<8x4xf32> to vector<1x8x4xf32>
    %172 = vector.extract_strided_slice %17 {offsets = [0, 24], sizes = [8, 4], strides = [1, 1]} : vector<8x32xf32> to vector<8x4xf32>
    %173 = vector.shape_cast %172 : vector<8x4xf32> to vector<1x8x4xf32>
    %174 = arith.truncf %169 : vector<1x8x4xf32> to vector<1x8x4xbf16>
    %175 = arith.truncf %171 : vector<1x8x4xf32> to vector<1x8x4xbf16>
    "tpu.trace_start"() <{level = 10 : i32, message = "bqd,bkd->bqk"}> : () -> ()
    %cst_46 = arith.constant dense<0.000000e+00> : vector<1x8x8xf32>
    %176 = tpu.matmul %174, %175, %cst_46 {dimension_numbers = #tpu.dot_dimension_numbers<[2], [2], [1], [1], [0, 0, 0, 1, 1, 1], [0], [0]>} : vector<1x8x4xbf16>, vector<1x8x4xbf16>, vector<1x8x8xf32> -> vector<1x8x8xf32>
    "tpu.trace_stop"() : () -> ()
    %cst_47 = arith.constant 5.000000e-01 : f32
    %177 = vector.broadcast %cst_47 : f32 to vector<1x8x8xf32>
    %178 = arith.mulf %176, %177 : vector<1x8x8xf32>
    %cst_48 = arith.constant dense<0xFF800000> : vector<1x8xf32>
    %179 = vector.multi_reduction <maximumf>, %178, %cst_48 [2] : vector<1x8x8xf32> to vector<1x8xf32>
    %180 = vector.shape_cast %179 : vector<1x8xf32> to vector<1x8x1xf32>
    %181 = vector.broadcast %180 : vector<1x8x1xf32> to vector<1x8x8xf32>
    %182 = arith.subf %178, %181 : vector<1x8x8xf32>
    %183 = math.exp %182 : vector<1x8x8xf32>
    %cst_49 = arith.constant dense<0.000000e+00> : vector<1x8xf32>
    %184 = vector.multi_reduction <add>, %183, %cst_49 [2] : vector<1x8x8xf32> to vector<1x8xf32>
    %185 = vector.shape_cast %184 : vector<1x8xf32> to vector<1x8x1xf32>
    %186 = tpu.reciprocal %185 : vector<1x8x1xf32> -> vector<1x8x1xf32>
    %187 = vector.broadcast %186 : vector<1x8x1xf32> to vector<1x8x8xf32>
    %188 = arith.mulf %183, %187 : vector<1x8x8xf32>
    %189 = arith.truncf %188 : vector<1x8x8xf32> to vector<1x8x8xbf16>
    %190 = arith.truncf %173 : vector<1x8x4xf32> to vector<1x8x4xbf16>
    "tpu.trace_start"() <{level = 10 : i32, message = "bqk,bkd->bqd"}> : () -> ()
    %cst_50 = arith.constant dense<0.000000e+00> : vector<1x8x4xf32>
    %191 = tpu.matmul %189, %190, %cst_50 {dimension_numbers = #tpu.dot_dimension_numbers<[2], [1], [1], [2], [0, 0, 0, 1, 1, 2], [0], [0]>} : vector<1x8x8xbf16>, vector<1x8x4xbf16>, vector<1x8x4xf32> -> vector<1x8x4xf32>
    "tpu.trace_stop"() : () -> ()
    %192 = vector.shape_cast %191 : vector<1x8x4xf32> to vector<8x4xf32>
    %193 = vector.extract_strided_slice %7 {offsets = [0, 28], sizes = [8, 4], strides = [1, 1]} : vector<8x32xf32> to vector<8x4xf32>
    %194 = vector.shape_cast %193 : vector<8x4xf32> to vector<1x8x4xf32>
    %195 = vector.extract_strided_slice %12 {offsets = [0, 28], sizes = [8, 4], strides = [1, 1]} : vector<8x32xf32> to vector<8x4xf32>
    %196 = vector.shape_cast %195 : vector<8x4xf32> to vector<1x8x4xf32>
    %197 = vector.extract_strided_slice %17 {offsets = [0, 28], sizes = [8, 4], strides = [1, 1]} : vector<8x32xf32> to vector<8x4xf32>
    %198 = vector.shape_cast %197 : vector<8x4xf32> to vector<1x8x4xf32>
    %199 = arith.truncf %194 : vector<1x8x4xf32> to vector<1x8x4xbf16>
    %200 = arith.truncf %196 : vector<1x8x4xf32> to vector<1x8x4xbf16>
    "tpu.trace_start"() <{level = 10 : i32, message = "bqd,bkd->bqk"}> : () -> ()
    %cst_51 = arith.constant dense<0.000000e+00> : vector<1x8x8xf32>
    %201 = tpu.matmul %199, %200, %cst_51 {dimension_numbers = #tpu.dot_dimension_numbers<[2], [2], [1], [1], [0, 0, 0, 1, 1, 1], [0], [0]>} : vector<1x8x4xbf16>, vector<1x8x4xbf16>, vector<1x8x8xf32> -> vector<1x8x8xf32>
    "tpu.trace_stop"() : () -> ()
    %cst_52 = arith.constant 5.000000e-01 : f32
    %202 = vector.broadcast %cst_52 : f32 to vector<1x8x8xf32>
    %203 = arith.mulf %201, %202 : vector<1x8x8xf32>
    %cst_53 = arith.constant dense<0xFF800000> : vector<1x8xf32>
    %204 = vector.multi_reduction <maximumf>, %203, %cst_53 [2] : vector<1x8x8xf32> to vector<1x8xf32>
    %205 = vector.shape_cast %204 : vector<1x8xf32> to vector<1x8x1xf32>
    %206 = vector.broadcast %205 : vector<1x8x1xf32> to vector<1x8x8xf32>
    %207 = arith.subf %203, %206 : vector<1x8x8xf32>
    %208 = math.exp %207 : vector<1x8x8xf32>
    %cst_54 = arith.constant dense<0.000000e+00> : vector<1x8xf32>
    %209 = vector.multi_reduction <add>, %208, %cst_54 [2] : vector<1x8x8xf32> to vector<1x8xf32>
    %210 = vector.shape_cast %209 : vector<1x8xf32> to vector<1x8x1xf32>
    %211 = tpu.reciprocal %210 : vector<1x8x1xf32> -> vector<1x8x1xf32>
    %212 = vector.broadcast %211 : vector<1x8x1xf32> to vector<1x8x8xf32>
    %213 = arith.mulf %208, %212 : vector<1x8x8xf32>
    %214 = arith.truncf %213 : vector<1x8x8xf32> to vector<1x8x8xbf16>
    %215 = arith.truncf %198 : vector<1x8x4xf32> to vector<1x8x4xbf16>
    "tpu.trace_start"() <{level = 10 : i32, message = "bqk,bkd->bqd"}> : () -> ()
    %cst_55 = arith.constant dense<0.000000e+00> : vector<1x8x4xf32>
    %216 = tpu.matmul %214, %215, %cst_55 {dimension_numbers = #tpu.dot_dimension_numbers<[2], [1], [1], [2], [0, 0, 0, 1, 1, 2], [0], [0]>} : vector<1x8x8xbf16>, vector<1x8x4xbf16>, vector<1x8x4xf32> -> vector<1x8x4xf32>
    "tpu.trace_stop"() : () -> ()
    %217 = vector.shape_cast %216 : vector<1x8x4xf32> to vector<8x4xf32>
    %218 = tpu.concatenate %42, %67, %92, %117, %142, %167, %192, %217 in 1 : vector<8x4xf32>, vector<8x4xf32>, vector<8x4xf32>, vector<8x4xf32>, vector<8x4xf32>, vector<8x4xf32>, vector<8x4xf32>, vector<8x4xf32> -> vector<8x32xf32>
    %219 = arith.truncf %218 : vector<8x32xf32> to vector<8x32xbf16>
    %c0_56 = arith.constant 0 : index
    %c0_57 = arith.constant 0 : index
    %220 = vector.load %arg8[%c0_56, %c0_57] : memref<32x32xbf16, #tpu.memory_space<vmem>>, vector<32x32xbf16>
    %cst_58 = arith.constant dense<0.000000e+00> : vector<8x32xf32>
    %221 = tpu.matmul %219, %220, %cst_58 {dimension_numbers = #tpu.dot_dimension_numbers<[1], [0], [0], [1], [0, 0, 1, 1], [], []>} : vector<8x32xbf16>, vector<32x32xbf16>, vector<8x32xf32> -> vector<8x32xf32>
    %c0_59 = arith.constant 0 : index
    %c0_60 = arith.constant 0 : index
    %222 = vector.load %arg9[%c0_59, %c0_60] : memref<1x32xf32, #tpu.memory_space<vmem>>, vector<1x32xf32>
    %223 = vector.broadcast %222 : vector<1x32xf32> to vector<8x32xf32>
    %224 = arith.addf %221, %223 : vector<8x32xf32>
    %225 = arith.addf %1, %224 : vector<8x32xf32>
    %c0_61 = arith.constant 0 : index
    %c0_62 = arith.constant 0 : index
    %226 = vector.load %arg10[%c0_61, %c0_62] : memref<1x32xf32, #tpu.memory_space<vmem>>, vector<1x32xf32>
    %c0_63 = arith.constant 0 : index
    %c0_64 = arith.constant 0 : index
    %227 = vector.load %arg11[%c0_63, %c0_64] : memref<1x32xf32, #tpu.memory_space<vmem>>, vector<1x32xf32>
    %cst_65 = arith.constant dense<0.000000e+00> : vector<8xf32>
    %228 = vector.multi_reduction <add>, %225, %cst_65 [1] : vector<8x32xf32> to vector<8xf32>
    %229 = vector.shape_cast %228 : vector<8xf32> to vector<8x1xf32>
    %cst_66 = arith.constant 3.200000e+01 : f32
    %230 = vector.broadcast %cst_66 : f32 to vector<8x1xf32>
    %231 = arith.divf %229, %230 : vector<8x1xf32>
    %232 = vector.broadcast %231 : vector<8x1xf32> to vector<8x32xf32>
    %233 = arith.subf %225, %232 : vector<8x32xf32>
    %234 = arith.mulf %233, %233 : vector<8x32xf32>
    %cst_67 = arith.constant dense<0.000000e+00> : vector<8xf32>
    %235 = vector.multi_reduction <add>, %234, %cst_67 [1] : vector<8x32xf32> to vector<8xf32>
    %236 = vector.shape_cast %235 : vector<8xf32> to vector<8x1xf32>
    %cst_68 = arith.constant 3.200000e+01 : f32
    %237 = vector.broadcast %cst_68 : f32 to vector<8x1xf32>
    %238 = arith.divf %236, %237 : vector<8x1xf32>
    %239 = vector.broadcast %231 : vector<8x1xf32> to vector<8x32xf32>
    %240 = arith.subf %225, %239 : vector<8x32xf32>
    %cst_69 = arith.constant 9.99999974E-6 : f32
    %241 = vector.broadcast %cst_69 : f32 to vector<8x1xf32>
    %242 = arith.addf %238, %241 : vector<8x1xf32>
    %243 = math.rsqrt %242 : vector<8x1xf32>
    %244 = vector.broadcast %243 : vector<8x1xf32> to vector<8x32xf32>
    %245 = arith.mulf %240, %244 : vector<8x32xf32>
    %246 = vector.broadcast %226 : vector<1x32xf32> to vector<8x32xf32>
    %247 = arith.mulf %245, %246 : vector<8x32xf32>
    %248 = vector.broadcast %227 : vector<1x32xf32> to vector<8x32xf32>
    %249 = arith.addf %247, %248 : vector<8x32xf32>
    %250 = arith.truncf %249 : vector<8x32xf32> to vector<8x32xbf16>
    %c0_70 = arith.constant 0 : index
    %c0_71 = arith.constant 0 : index
    %251 = vector.load %arg12[%c0_70, %c0_71] : memref<32x128xbf16, #tpu.memory_space<vmem>>, vector<32x128xbf16>
    %cst_72 = arith.constant dense<0.000000e+00> : vector<8x128xf32>
    %252 = tpu.matmul %250, %251, %cst_72 {dimension_numbers = #tpu.dot_dimension_numbers<[1], [0], [0], [1], [0, 0, 1, 1], [], []>} : vector<8x32xbf16>, vector<32x128xbf16>, vector<8x128xf32> -> vector<8x128xf32>
    %253 = vector.extract_strided_slice %252 {offsets = [0, 0], sizes = [8, 64], strides = [1, 1]} : vector<8x128xf32> to vector<8x64xf32>
    %254 = vector.extract_strided_slice %252 {offsets = [0, 64], sizes = [8, 64], strides = [1, 1]} : vector<8x128xf32> to vector<8x64xf32>
    %c0_73 = arith.constant 0 : index
    %c0_74 = arith.constant 0 : index
    %255 = vector.load %arg13[%c0_73, %c0_74] : memref<4x64xf32, #tpu.memory_space<vmem>>, vector<4x64xf32>
    %c0_75 = arith.constant 0 : index
    %c0_76 = arith.constant 0 : index
    %256 = vector.load %arg14[%c0_75, %c0_76] : memref<1x64xf32, #tpu.memory_space<vmem>>, vector<1x64xf32>
    %cst_77 = arith.constant 0.000000e+00 : f32
    %257 = vector.broadcast %cst_77 : f32 to vector<1x3x64xf32>
    %c0_78 = arith.constant 0 : index
    %c0_79 = arith.constant 0 : index
    %c0_80 = arith.constant 0 : index
    %258 = vector.load %arg24[%c0_78, %c0_79, %c0_80] : memref<1x11x64xf32, #tpu.memory_space<vmem>>, vector<1x3x64xf32>
    tpu.vector_store %arg24[%c0_78, %c0_79, %c0_80], %257 {strides = array<i32>} : memref<1x11x64xf32, #tpu.memory_space<vmem>>, vector<1x3x64xf32>,
    %259 = vector.shape_cast %253 : vector<8x64xf32> to vector<1x8x64xf32>
    %c0_81 = arith.constant 0 : index
    %c3 = arith.constant 3 : index
    %c0_82 = arith.constant 0 : index
    %260 = vector.load %arg24[%c0_81, %c3, %c0_82] : memref<1x11x64xf32, #tpu.memory_space<vmem>>, vector<1x8x64xf32>
    tpu.vector_store %arg24[%c0_81, %c3, %c0_82], %259 {strides = array<i32>} : memref<1x11x64xf32, #tpu.memory_space<vmem>>, vector<1x8x64xf32>,
    %cst_83 = arith.constant 0.000000e+00 : f32
    %261 = vector.broadcast %cst_83 : f32 to vector<1x8x64xf32>
    %c0_84 = arith.constant 0 : index
    %c0_85 = arith.constant 0 : index
    %c0_86 = arith.constant 0 : index
    %262 = vector.load %arg24[%c0_84, %c0_85, %c0_86] : memref<1x11x64xf32, #tpu.memory_space<vmem>>, vector<1x8x64xf32>
    %263 = vector.extract_strided_slice %255 {offsets = [0, 0], sizes = [1, 64], strides = [1, 1]} : vector<4x64xf32> to vector<1x64xf32>
    %264 = vector.shape_cast %263 : vector<1x64xf32> to vector<1x1x64xf32>
    %265 = vector.broadcast %264 : vector<1x1x64xf32> to vector<1x8x64xf32>
    %266 = arith.mulf %262, %265 : vector<1x8x64xf32>
    %267 = arith.addf %261, %266 : vector<1x8x64xf32>
    %c0_87 = arith.constant 0 : index
    %c1 = arith.constant 1 : index
    %c0_88 = arith.constant 0 : index
    %268 = vector.load %arg24[%c0_87, %c1, %c0_88] : memref<1x11x64xf32, #tpu.memory_space<vmem>>, vector<1x8x64xf32>
    %269 = vector.extract_strided_slice %255 {offsets = [1, 0], sizes = [1, 64], strides = [1, 1]} : vector<4x64xf32> to vector<1x64xf32>
    %270 = vector.shape_cast %269 : vector<1x64xf32> to vector<1x1x64xf32>
    %271 = vector.broadcast %270 : vector<1x1x64xf32> to vector<1x8x64xf32>
    %272 = arith.mulf %268, %271 : vector<1x8x64xf32>
    %273 = arith.addf %267, %272 : vector<1x8x64xf32>
    %c0_89 = arith.constant 0 : index
    %c2 = arith.constant 2 : index
    %c0_90 = arith.constant 0 : index
    %274 = vector.load %arg24[%c0_89, %c2, %c0_90] : memref<1x11x64xf32, #tpu.memory_space<vmem>>, vector<1x8x64xf32>
    %275 = vector.extract_strided_slice %255 {offsets = [2, 0], sizes = [1, 64], strides = [1, 1]} : vector<4x64xf32> to vector<1x64xf32>
    %276 = vector.shape_cast %275 : vector<1x64xf32> to vector<1x1x64xf32>
    %277 = vector.broadcast %276 : vector<1x1x64xf32> to vector<1x8x64xf32>
    %278 = arith.mulf %274, %277 : vector<1x8x64xf32>
    %279 = arith.addf %273, %278 : vector<1x8x64xf32>
    %c0_91 = arith.constant 0 : index
    %c3_92 = arith.constant 3 : index
    %c0_93 = arith.constant 0 : index
    %280 = vector.load %arg24[%c0_91, %c3_92, %c0_93] : memref<1x11x64xf32, #tpu.memory_space<vmem>>, vector<1x8x64xf32>
    %281 = vector.extract_strided_slice %255 {offsets = [3, 0], sizes = [1, 64], strides = [1, 1]} : vector<4x64xf32> to vector<1x64xf32>
    %282 = vector.shape_cast %281 : vector<1x64xf32> to vector<1x1x64xf32>
    %283 = vector.broadcast %282 : vector<1x1x64xf32> to vector<1x8x64xf32>
    %284 = arith.mulf %280, %283 : vector<1x8x64xf32>
    %285 = arith.addf %279, %284 : vector<1x8x64xf32>
    %286 = vector.shape_cast %256 : vector<1x64xf32> to vector<1x1x64xf32>
    %287 = vector.broadcast %286 : vector<1x1x64xf32> to vector<1x8x64xf32>
    %288 = arith.addf %285, %287 : vector<1x8x64xf32>
    %289 = arith.negf %288 : vector<1x8x64xf32>
    %290 = math.exp %289 : vector<1x8x64xf32>
    %cst_94 = arith.constant 1.000000e+00 : f32
    %291 = vector.broadcast %cst_94 : f32 to vector<1x8x64xf32>
    %292 = arith.addf %291, %290 : vector<1x8x64xf32>
    %293 = arith.divf %291, %292 : vector<1x8x64xf32>
    %294 = arith.mulf %288, %293 : vector<1x8x64xf32>
    %295 = vector.shape_cast %294 : vector<1x8x64xf32> to vector<8x64xf32>
    %296 = arith.truncf %295 : vector<8x64xf32> to vector<8x64xbf16>
    %c0_95 = arith.constant 0 : index
    %c0_96 = arith.constant 0 : index
    %297 = vector.load %arg15[%c0_95, %c0_96] : memref<64x18xbf16, #tpu.memory_space<vmem>>, vector<64x18xbf16>
    %cst_97 = arith.constant dense<0.000000e+00> : vector<8x18xf32>
    %298 = tpu.matmul %296, %297, %cst_97 {dimension_numbers = #tpu.dot_dimension_numbers<[1], [0], [0], [1], [0, 0, 1, 1], [], []>} : vector<8x64xbf16>, vector<64x18xbf16>, vector<8x18xf32> -> vector<8x18xf32>
    %299 = vector.extract_strided_slice %298 {offsets = [0, 0], sizes = [8, 2], strides = [1, 1]} : vector<8x18xf32> to vector<8x2xf32>
    %300 = vector.extract_strided_slice %298 {offsets = [0, 2], sizes = [8, 8], strides = [1, 1]} : vector<8x18xf32> to vector<8x8xf32>
    %301 = vector.extract_strided_slice %298 {offsets = [0, 10], sizes = [8, 8], strides = [1, 1]} : vector<8x18xf32> to vector<8x8xf32>
    %302 = arith.truncf %299 : vector<8x2xf32> to vector<8x2xbf16>
    %c0_98 = arith.constant 0 : index
    %c0_99 = arith.constant 0 : index
    %303 = vector.load %arg16[%c0_98, %c0_99] : memref<2x64xbf16, #tpu.memory_space<vmem>>, vector<2x64xbf16>
    %cst_100 = arith.constant dense<0.000000e+00> : vector<8x64xf32>
    %304 = tpu.matmul %302, %303, %cst_100 {dimension_numbers = #tpu.dot_dimension_numbers<[1], [0], [0], [1], [0, 0, 1, 1], [], []>} : vector<8x2xbf16>, vector<2x64xbf16>, vector<8x64xf32> -> vector<8x64xf32>
    %c0_101 = arith.constant 0 : index
    %c0_102 = arith.constant 0 : index
    %305 = vector.load %arg17[%c0_101, %c0_102] : memref<1x64xf32, #tpu.memory_space<vmem>>, vector<1x64xf32>
    %306 = vector.broadcast %305 : vector<1x64xf32> to vector<8x64xf32>
    %307 = arith.addf %304, %306 : vector<8x64xf32>
    %cst_103 = arith.constant 2.000000e+01 : f32
    %308 = vector.broadcast %cst_103 : f32 to vector<8x64xf32>
    %309 = arith.cmpf ogt, %307, %308 : vector<8x64xf32>
    %cst_104 = arith.constant 2.000000e+01 : f32
    %310 = vector.broadcast %cst_104 : f32 to vector<8x64xf32>
    %311 = arith.minimumf %307, %310 : vector<8x64xf32>
    %312 = math.exp %311 : vector<8x64xf32>
    %313 = math.log1p %312 : vector<8x64xf32>
    %314 = arith.select %309, %307, %313 : vector<8x64xi1>, vector<8x64xf32>
    %c0_105 = arith.constant 0 : index
    %c0_106 = arith.constant 0 : index
    %315 = vector.load %arg18[%c0_105, %c0_106] : memref<8x64xf32, #tpu.memory_space<vmem>>, vector<8x64xf32>
    %316 = math.exp %315 : vector<8x64xf32>
    %cst_107 = arith.constant 0.000000e+00 : f32
    %317 = vector.broadcast %cst_107 : f32 to vector<8x64xf32>
    %318 = arith.subf %317, %316 : vector<8x64xf32>
    %319 = vector.shape_cast %314 : vector<8x64xf32> to vector<1x8x64xf32>
    %320 = arith.mulf %314, %295 : vector<8x64xf32>
    %321 = vector.shape_cast %320 : vector<8x64xf32> to vector<1x8x64xf32>
    %322 = vector.shape_cast %300 : vector<8x8xf32> to vector<1x8x8xf32>
    %323 = vector.shape_cast %301 : vector<8x8xf32> to vector<1x8x8xf32>
    %324 = vector.shape_cast %323 : vector<1x8x8xf32> to vector<8x8xf32>
    %c0_108 = arith.constant 0 : index
    %c0_109 = arith.constant 0 : index
    %c0_110 = arith.constant 0 : index
    %325 = vector.load %arg27[%c0_108, %c0_109, %c0_110] : memref<8x1x8xf32, #tpu.memory_space<vmem>>, vector<8x1x8xf32>
    %326 = vector.shape_cast %325 : vector<8x1x8xf32> to vector<8x8xf32>
    %327 = vector.shape_cast %324 : vector<8x8xf32> to vector<8x1x8xf32>
    tpu.vector_store %arg27[%c0_108, %c0_109, %c0_110], %327 {strides = array<i32>} : memref<8x1x8xf32, #tpu.memory_space<vmem>>, vector<8x1x8xf32>,
    %cst_111 = arith.constant 0.000000e+00 : f32
    %328 = vector.broadcast %cst_111 : f32 to vector<1x8x64xf32>
    %329 = vector.shape_cast %319 : vector<1x8x64xf32> to vector<1x8x1x64xf32>
    %330 = vector.shape_cast %318 : vector<8x64xf32> to vector<1x1x8x64xf32>
    %331 = vector.broadcast %329 : vector<1x8x1x64xf32> to vector<1x8x8x64xf32>
    %332 = vector.broadcast %330 : vector<1x1x8x64xf32> to vector<1x8x8x64xf32>
    %333 = arith.mulf %331, %332 : vector<1x8x8x64xf32>
    %334 = math.exp %333 : vector<1x8x8x64xf32>
    %c0_112 = arith.constant 0 : index
    %c0_113 = arith.constant 0 : index
    %c0_114 = arith.constant 0 : index
    %c0_115 = arith.constant 0 : index
    %335 = vector.load %arg25[%c0_112, %c0_113, %c0_114, %c0_115] : memref<1x8x8x64xf32, #tpu.memory_space<vmem>>, vector<1x8x8x64xf32>
    tpu.vector_store %arg25[%c0_112, %c0_113, %c0_114, %c0_115], %334 {strides = array<i32>} : memref<1x8x8x64xf32, #tpu.memory_space<vmem>>, vector<1x8x8x64xf32>,
    %336 = vector.shape_cast %322 : vector<1x8x8xf32> to vector<1x8x8x1xf32>
    %337 = vector.shape_cast %321 : vector<1x8x64xf32> to vector<1x8x1x64xf32>
    %338 = vector.broadcast %336 : vector<1x8x8x1xf32> to vector<1x8x8x64xf32>
    %339 = vector.broadcast %337 : vector<1x8x1x64xf32> to vector<1x8x8x64xf32>
    %340 = arith.mulf %338, %339 : vector<1x8x8x64xf32>
    %c0_116 = arith.constant 0 : index
    %c0_117 = arith.constant 0 : index
    %c0_118 = arith.constant 0 : index
    %c0_119 = arith.constant 0 : index
    %341 = vector.load %arg26[%c0_116, %c0_117, %c0_118, %c0_119] : memref<1x8x8x64xf32, #tpu.memory_space<vmem>>, vector<1x8x8x64xf32>
    tpu.vector_store %arg26[%c0_116, %c0_117, %c0_118, %c0_119], %340 {strides = array<i32>} : memref<1x8x8x64xf32, #tpu.memory_space<vmem>>, vector<1x8x8x64xf32>,
    %c0_i32 = arith.constant 0 : i32
    %c8_i32 = arith.constant 8 : i32
    %342 = arith.addi %c0_i32, %c8_i32 : i32
    %c1_i32 = arith.constant 1 : i32
    %343 = scf.for %arg29 = %c0_i32 to %342 step %c1_i32 iter_args(%arg30 = %328) -> (vector<1x8x64xf32>)  : i32 {
      %c0_142 = arith.constant 0 : index
      %387 = arith.index_cast %arg29 : i32 to index
      %c0_143 = arith.constant 0 : index
      %c0_144 = arith.constant 0 : index
      %388 = vector.load %arg25[%c0_142, %387, %c0_143, %c0_144] : memref<1x8x8x64xf32, #tpu.memory_space<vmem>>, vector<1x1x8x64xf32>
      %389 = vector.shape_cast %388 : vector<1x1x8x64xf32> to vector<1x8x64xf32>
      %390 = arith.mulf %389, %arg30 : vector<1x8x64xf32>
      %c0_145 = arith.constant 0 : index
      %391 = arith.index_cast %arg29 : i32 to index
      %c0_146 = arith.constant 0 : index
      %c0_147 = arith.constant 0 : index
      %392 = vector.load %arg26[%c0_145, %391, %c0_146, %c0_147] : memref<1x8x8x64xf32, #tpu.memory_space<vmem>>, vector<1x1x8x64xf32>
      %393 = vector.shape_cast %392 : vector<1x1x8x64xf32> to vector<1x8x64xf32>
      %394 = arith.addf %390, %393 : vector<1x8x64xf32>
      %c0_i32_148 = arith.constant 0 : i32
      %395 = arith.addi %c0_i32_148, %arg29 : i32
      %396 = arith.index_cast %395 : i32 to index
      %c0_149 = arith.constant 0 : index
      %c0_150 = arith.constant 0 : index
      %397 = vector.load %arg27[%396, %c0_149, %c0_150] : memref<8x1x8xf32, #tpu.memory_space<vmem>>, vector<1x1x8xf32>
      %398 = vector.shape_cast %397 : vector<1x1x8xf32> to vector<1x8xf32>
      %399 = vector.shape_cast %398 : vector<1x8xf32> to vector<1x8x1xf32>
      %400 = vector.broadcast %399 : vector<1x8x1xf32> to vector<1x8x64xf32>
      %401 = arith.mulf %394, %400 : vector<1x8x64xf32>
      %cst_151 = arith.constant dense<0.000000e+00> : vector<1x64xf32>
      %402 = vector.multi_reduction <add>, %401, %cst_151 [1] : vector<1x8x64xf32> to vector<1x64xf32>
      %c0_i32_152 = arith.constant 0 : i32
      %403 = arith.addi %c0_i32_152, %arg29 : i32
      %404 = arith.index_cast %403 : i32 to index
      %c0_153 = arith.constant 0 : index
      %c0_154 = arith.constant 0 : index
      %405 = vector.load %arg28[%404, %c0_153, %c0_154] : memref<8x1x64xf32, #tpu.memory_space<vmem>>, vector<1x1x64xf32>
      %406 = vector.shape_cast %405 : vector<1x1x64xf32> to vector<1x64xf32>
      %407 = vector.shape_cast %402 : vector<1x64xf32> to vector<1x1x64xf32>
      tpu.vector_store %arg28[%404, %c0_153, %c0_154], %407 {strides = array<i32>} : memref<8x1x64xf32, #tpu.memory_space<vmem>>, vector<1x1x64xf32>,
      scf.yield %394 : vector<1x8x64xf32>
    }
    %c8_i32_120 = arith.constant 8 : i32
    %c0_121 = arith.constant 0 : index
    %c0_122 = arith.constant 0 : index
    %c0_123 = arith.constant 0 : index
    %344 = vector.load %arg28[%c0_121, %c0_122, %c0_123] : memref<8x1x64xf32, #tpu.memory_space<vmem>>, vector<8x1x64xf32>
    %345 = vector.shape_cast %344 : vector<8x1x64xf32> to vector<8x64xf32>
    %c0_124 = arith.constant 0 : index
    %c0_125 = arith.constant 0 : index
    %346 = vector.load %arg19[%c0_124, %c0_125] : memref<1x64xf32, #tpu.memory_space<vmem>>, vector<1x64xf32>
    %347 = vector.broadcast %346 : vector<1x64xf32> to vector<8x64xf32>
    %348 = arith.mulf %347, %295 : vector<8x64xf32>
    %349 = arith.addf %345, %348 : vector<8x64xf32>
    %350 = arith.negf %254 : vector<8x64xf32>
    %351 = math.exp %350 : vector<8x64xf32>
    %cst_126 = arith.constant 1.000000e+00 : f32
    %352 = vector.broadcast %cst_126 : f32 to vector<8x64xf32>
    %353 = arith.addf %352, %351 : vector<8x64xf32>
    %354 = arith.divf %352, %353 : vector<8x64xf32>
    %355 = arith.mulf %254, %354 : vector<8x64xf32>
    %356 = arith.mulf %349, %355 : vector<8x64xf32>
    %357 = arith.truncf %356 : vector<8x64xf32> to vector<8x64xbf16>
    %c0_127 = arith.constant 0 : index
    %c0_128 = arith.constant 0 : index
    %358 = vector.load %arg20[%c0_127, %c0_128] : memref<64x32xbf16, #tpu.memory_space<vmem>>, vector<64x32xbf16>
    %cst_129 = arith.constant dense<0.000000e+00> : vector<8x32xf32>
    %359 = tpu.matmul %357, %358, %cst_129 {dimension_numbers = #tpu.dot_dimension_numbers<[1], [0], [0], [1], [0, 0, 1, 1], [], []>} : vector<8x64xbf16>, vector<64x32xbf16>, vector<8x32xf32> -> vector<8x32xf32>
    %360 = arith.addf %249, %359 : vector<8x32xf32>
    %c0_130 = arith.constant 0 : index
    %c0_131 = arith.constant 0 : index
    %361 = vector.load %arg21[%c0_130, %c0_131] : memref<1x32xf32, #tpu.memory_space<vmem>>, vector<1x32xf32>
    %c0_132 = arith.constant 0 : index
    %c0_133 = arith.constant 0 : index
    %362 = vector.load %arg22[%c0_132, %c0_133] : memref<1x32xf32, #tpu.memory_space<vmem>>, vector<1x32xf32>
    %cst_134 = arith.constant dense<0.000000e+00> : vector<8xf32>
    %363 = vector.multi_reduction <add>, %360, %cst_134 [1] : vector<8x32xf32> to vector<8xf32>
    %364 = vector.shape_cast %363 : vector<8xf32> to vector<8x1xf32>
    %cst_135 = arith.constant 3.200000e+01 : f32
    %365 = vector.broadcast %cst_135 : f32 to vector<8x1xf32>
    %366 = arith.divf %364, %365 : vector<8x1xf32>
    %367 = vector.broadcast %366 : vector<8x1xf32> to vector<8x32xf32>
    %368 = arith.subf %360, %367 : vector<8x32xf32>
    %369 = arith.mulf %368, %368 : vector<8x32xf32>
    %cst_136 = arith.constant dense<0.000000e+00> : vector<8xf32>
    %370 = vector.multi_reduction <add>, %369, %cst_136 [1] : vector<8x32xf32> to vector<8xf32>
    %371 = vector.shape_cast %370 : vector<8xf32> to vector<8x1xf32>
    %cst_137 = arith.constant 3.200000e+01 : f32
    %372 = vector.broadcast %cst_137 : f32 to vector<8x1xf32>
    %373 = arith.divf %371, %372 : vector<8x1xf32>
    %374 = vector.broadcast %366 : vector<8x1xf32> to vector<8x32xf32>
    %375 = arith.subf %360, %374 : vector<8x32xf32>
    %cst_138 = arith.constant 9.99999974E-6 : f32
    %376 = vector.broadcast %cst_138 : f32 to vector<8x1xf32>
    %377 = arith.addf %373, %376 : vector<8x1xf32>
    %378 = math.rsqrt %377 : vector<8x1xf32>
    %379 = vector.broadcast %378 : vector<8x1xf32> to vector<8x32xf32>
    %380 = arith.mulf %375, %379 : vector<8x32xf32>
    %381 = vector.broadcast %361 : vector<1x32xf32> to vector<8x32xf32>
    %382 = arith.mulf %380, %381 : vector<8x32xf32>
    %383 = vector.broadcast %362 : vector<1x32xf32> to vector<8x32xf32>
    %384 = arith.addf %382, %383 : vector<8x32xf32>
    %385 = vector.shape_cast %384 : vector<8x32xf32> to vector<1x8x32xf32>
    %c0_139 = arith.constant 0 : index
    %c0_140 = arith.constant 0 : index
    %c0_141 = arith.constant 0 : index
    %386 = vector.load %arg23[%c0_139, %c0_140, %c0_141] : memref<1x8x32xf32, #tpu.memory_space<vmem>>, vector<1x8x32xf32>
    tpu.vector_store %arg23[%c0_139, %c0_140, %c0_141], %385 {strides = array<i32>} : memref<1x8x32xf32, #tpu.memory_space<vmem>>, vector<1x8x32xf32>,
    return
  }
  func.func @transform_0(%arg0: i32) -> (i32, i32, i32) {
    %c0_i32 = arith.constant 0 : i32
    %c0_i32_0 = arith.constant 0 : i32
    %c0_i32_1 = arith.constant 0 : i32
    return %arg0, %c0_i32, %c0_i32_0 : i32, i32, i32
  }
  func.func @transform_1(%arg0: i32) -> (i32, i32) {
    %c0_i32 = arith.constant 0 : i32
    %c0_i32_0 = arith.constant 0 : i32
    %c0_i32_1 = arith.constant 0 : i32
    return %c0_i32, %c0_i32_0 : i32, i32
  }
  func.func @transform_2(%arg0: i32) -> (i32, i32) {
    %c0_i32 = arith.constant 0 : i32
    %c0_i32_0 = arith.constant 0 : i32
    %c0_i32_1 = arith.constant 0 : i32
    return %c0_i32, %c0_i32_0 : i32, i32
  }
  func.func @transform_3(%arg0: i32) -> (i32, i32) {
    %c0_i32 = arith.constant 0 : i32
    %c0_i32_0 = arith.constant 0 : i32
    %c0_i32_1 = arith.constant 0 : i32
    return %c0_i32, %c0_i32_0 : i32, i32
  }
  func.func @transform_4(%arg0: i32) -> (i32, i32) {
    %c0_i32 = arith.constant 0 : i32
    %c0_i32_0 = arith.constant 0 : i32
    %c0_i32_1 = arith.constant 0 : i32
    return %c0_i32, %c0_i32_0 : i32, i32
  }
  func.func @transform_5(%arg0: i32) -> (i32, i32) {
    %c0_i32 = arith.constant 0 : i32
    %c0_i32_0 = arith.constant 0 : i32
    %c0_i32_1 = arith.constant 0 : i32
    return %c0_i32, %c0_i32_0 : i32, i32
  }
  func.func @transform_6(%arg0: i32) -> (i32, i32) {
    %c0_i32 = arith.constant 0 : i32
    %c0_i32_0 = arith.constant 0 : i32
    %c0_i32_1 = arith.constant 0 : i32
    return %c0_i32, %c0_i32_0 : i32, i32
  }
  func.func @transform_7(%arg0: i32) -> (i32, i32) {
    %c0_i32 = arith.constant 0 : i32
    %c0_i32_0 = arith.constant 0 : i32
    %c0_i32_1 = arith.constant 0 : i32
    return %c0_i32, %c0_i32_0 : i32, i32
  }
  func.func @transform_8(%arg0: i32) -> (i32, i32) {
    %c0_i32 = arith.constant 0 : i32
    %c0_i32_0 = arith.constant 0 : i32
    %c0_i32_1 = arith.constant 0 : i32
    return %c0_i32, %c0_i32_0 : i32, i32
  }
  func.func @transform_9(%arg0: i32) -> (i32, i32) {
    %c0_i32 = arith.constant 0 : i32
    %c0_i32_0 = arith.constant 0 : i32
    %c0_i32_1 = arith.constant 0 : i32
    return %c0_i32, %c0_i32_0 : i32, i32
  }
  func.func @transform_10(%arg0: i32) -> (i32, i32) {
    %c0_i32 = arith.constant 0 : i32
    %c0_i32_0 = arith.constant 0 : i32
    %c0_i32_1 = arith.constant 0 : i32
    return %c0_i32, %c0_i32_0 : i32, i32
  }
  func.func @transform_11(%arg0: i32) -> (i32, i32) {
    %c0_i32 = arith.constant 0 : i32
    %c0_i32_0 = arith.constant 0 : i32
    %c0_i32_1 = arith.constant 0 : i32
    return %c0_i32, %c0_i32_0 : i32, i32
  }
  func.func @transform_12(%arg0: i32) -> (i32, i32) {
    %c0_i32 = arith.constant 0 : i32
    %c0_i32_0 = arith.constant 0 : i32
    %c0_i32_1 = arith.constant 0 : i32
    return %c0_i32, %c0_i32_0 : i32, i32
  }
  func.func @transform_13(%arg0: i32) -> (i32, i32) {
    %c0_i32 = arith.constant 0 : i32
    %c0_i32_0 = arith.constant 0 : i32
    %c0_i32_1 = arith.constant 0 : i32
    return %c0_i32, %c0_i32_0 : i32, i32
  }
  func.func @transform_14(%arg0: i32) -> (i32, i32) {
    %c0_i32 = arith.constant 0 : i32
    %c0_i32_0 = arith.constant 0 : i32
    %c0_i32_1 = arith.constant 0 : i32
    return %c0_i32, %c0_i32_0 : i32, i32
  }
  func.func @transform_15(%arg0: i32) -> (i32, i32) {
    %c0_i32 = arith.constant 0 : i32
    %c0_i32_0 = arith.constant 0 : i32
    %c0_i32_1 = arith.constant 0 : i32
    return %c0_i32, %c0_i32_0 : i32, i32
  }
  func.func @transform_16(%arg0: i32) -> (i32, i32) {
    %c0_i32 = arith.constant 0 : i32
    %c0_i32_0 = arith.constant 0 : i32
    %c0_i32_1 = arith.constant 0 : i32
    return %c0_i32, %c0_i32_0 : i32, i32
  }
  func.func @transform_17(%arg0: i32) -> (i32, i32) {
    %c0_i32 = arith.constant 0 : i32
    %c0_i32_0 = arith.constant 0 : i32
    %c0_i32_1 = arith.constant 0 : i32
    return %c0_i32, %c0_i32_0 : i32, i32
  }
  func.func @transform_18(%arg0: i32) -> (i32, i32) {
    %c0_i32 = arith.constant 0 : i32
    %c0_i32_0 = arith.constant 0 : i32
    %c0_i32_1 = arith.constant 0 : i32
    return %c0_i32, %c0_i32_0 : i32, i32
  }
  func.func @transform_19(%arg0: i32) -> (i32, i32) {
    %c0_i32 = arith.constant 0 : i32
    %c0_i32_0 = arith.constant 0 : i32
    %c0_i32_1 = arith.constant 0 : i32
    return %c0_i32, %c0_i32_0 : i32, i32
  }
  func.func @transform_20(%arg0: i32) -> (i32, i32) {
    %c0_i32 = arith.constant 0 : i32
    %c0_i32_0 = arith.constant 0 : i32
    %c0_i32_1 = arith.constant 0 : i32
    return %c0_i32, %c0_i32_0 : i32, i32
  }
  func.func @transform_21(%arg0: i32) -> (i32, i32) {
    %c0_i32 = arith.constant 0 : i32
    %c0_i32_0 = arith.constant 0 : i32
    %c0_i32_1 = arith.constant 0 : i32
    return %c0_i32, %c0_i32_0 : i32, i32
  }
  func.func @transform_22(%arg0: i32) -> (i32, i32, i32) {
    %c0_i32 = arith.constant 0 : i32
    %c0_i32_0 = arith.constant 0 : i32
    %c0_i32_1 = arith.constant 0 : i32
    return %arg0, %c0_i32, %c0_i32_0 : i32, i32, i32
  }
}

</mosaic_0001>

<bundles_post_ra>
// kernel: tpu_custom_call.1
= control target key start
LH: loop header
LB: loop body
LE: loop exit
PB: predicated region body
PF: predicated region fallthrough
CT: control target
= control target key end

     0   :  { %s4692_s0 = inlined_call_operand.vmem [shape: f32[2,8,32], index: 0, kind: input, shape index: {}]   ;;  %s4693_s1 = inlined_call_operand.vmem [shape: bf16[32,32], index: 1, kind: input, shape index: {}]   ;;  %s4694_s2 = inlined_call_operand.vmem [shape: f32[1,32], index: 2, kind: input, shape index: {}]   ;;  %s4695_s3 = inlined_call_operand.vmem [shape: bf16[32,32], index: 3, kind: input, shape index: {}]   ;;  %s4696_s4 = inlined_call_operand.hbm [shape: f32[1,32], index: 4, kind: input, shape index: {}]   ;;  %s4697_s5 = inlined_call_operand.vmem [shape: bf16[32,32], index: 5, kind: input, shape index: {}]   ;;  %s4698_s6 = inlined_call_operand.hbm [shape: f32[1,32], index: 6, kind: input, shape index: {}]   ;;  %s4699_s7 = inlined_call_operand.vmem [shape: bf16[32,32], index: 7, kind: input, shape index: {}]   ;;  %s4700_s8 = inlined_call_operand.hbm [shape: f32[1,32], index: 8, kind: input, shape index: {}]   ;;  %s4701_s9 = inlined_call_operand.hbm [shape: f32[1,32], index: 9, kind: input, shape index: {}]   ;;  %s4702_s10 = inlined_call_operand.hbm [shape: f32[1,32], index: 10, kind: input, shape index: {}]   ;;  %s4703_s11 = inlined_call_operand.vmem [shape: bf16[32,128], index: 11, kind: input, shape index: {}]   ;;  %s4704_s12 = inlined_call_operand.vmem [shape: f32[4,64], index: 12, kind: input, shape index: {}]   ;;  %s4705_s13 = inlined_call_operand.vmem [shape: f32[1,64], index: 13, kind: input, shape index: {}]   ;;  %s4706_s14 = inlined_call_operand.vmem [shape: bf16[64,18], index: 14, kind: input, shape index: {}]   ;;  %s4707_s15 = inlined_call_operand.vmem [shape: bf16[2,64], index: 15, kind: input, shape index: {}]   ;;  %s4708_s16 = inlined_call_operand.vmem [shape: f32[1,64], index: 16, kind: input, shape index: {}]   ;;  %s4709_s17 = inlined_call_operand.vmem [shape: f32[8,64], index: 17, kind: input, shape index: {}]   ;;  %s4710_s18 = inlined_call_operand.vmem [shape: f32[1,64], index: 18, kind: input, shape index: {}]   ;;  %s4711_s19 = inlined_call_operand.vmem [shape: bf16[64,32], index: 19, kind: input, shape index: {}]   ;;  %s4712_s20 = inlined_call_operand.vmem [shape: f32[1,32], index: 20, kind: input, shape index: {}]   ;;  %s4713_s21 = inlined_call_operand.vmem [shape: f32[1,32], index: 21, kind: input, shape index: {}]   ;;  %s4714_s22 = inlined_call_operand.hbm [shape: f32[2,8,32], index: 22, kind: output, shape index: {}]  }
   0x1   :  { %4735 = sst [smem:[#allocation28_spill]] %s4692_s0 }
   0x2   :  { %4736 = sst [smem:[#allocation29_spill]] %s4693_s1 }
   0x3   :  { %4737 = sst [smem:[#allocation30_spill]] %s4694_s2 }
   0x4   :  { %4738 = sst [smem:[#allocation31_spill]] %s4695_s3 }
   0x5   :  { %4739 = sst [smem:[#allocation32_spill]] %s4696_s4 }
   0x6   :  { %4740 = sst [smem:[#allocation33_spill]] %s4697_s5 }
   0x7   :  { %4741 = sst [smem:[#allocation34_spill]] %s4698_s6 }
   0x8   :  { %4742 = sst [smem:[#allocation35_spill]] %s4699_s7 }
   0x9   :  { %4743 = sst [smem:[#allocation36_spill]] %s4701_s9 }
   0xa   :  { %4744 = sst [smem:[#allocation37_spill]] %s4712_s20 }
   0xb   :  { %4745 = sst [smem:[#allocation38_spill]] %s4713_s21 }
   0xc   :  { %4746 = sst [smem:[#allocation39_spill]] %s4714_s22 }
   0xd   :  { %27 = vsyncpa [#allocation8], 0 }
   0xe   :  { %28 = vsyncpa [#allocation11], 0 }
   0xf   :  { %29 = vsyncpa [#allocation14], 0 }
  0x10   :  { %30 = vsyncpa [#allocation9], 0 }
  0x11   :  { %32 = vsyncpa [#allocation9 + $0x1], 0  ;;  %s4011_s3 = smov 0   ;;  %s4013_s28 = smov 0  }
  0x12   :  { %s4015_s29 = smov 0   ;;  %s4017_s30 = smov 0  }
  0x13 LB: > { %4747 = sst [smem:[#allocation21_spill]] %s3849_s3  ;;  %s4032_s4 = sadd.s32 4294967295, %s3861_s30   ;;  %s3861_s30 = sphi %s4017_s30, %s4787_s30   ;;  %s3857_s29 = sphi %s4015_s29, %s4789_s29   ;;  %s3853_s28 = sphi %s4013_s28, %s4791_s28   ;;  %s3849_s3 = sphi %s4011_s3, %s4790_s3  }
  0x14   : > { %4748 = sst [smem:[#allocation22_spill]] %s3857_s29  ;;  %s3128_s0 = sadd.s32 4294967294, %s3861_s30  }
  0x15   : > { %4749 = sst [smem:[#allocation23_spill]] %s3861_s30  ;;  %s4036_s23 = sadd.s32 1, %s3861_s30  }
  0x16   : > { %4750 = sst [smem:[#allocation24_spill]] %s4036_s23  ;;  %s512_s1 = sadd.s32 1, %s3857_s29 }
  0x17   : > { %s509_s5 = ssub.s32 %s3861_s30, %s4036_s23  ;;  %p522_p0 = scmp.ne.s32.totalorder %s3857_s29, %s3853_s28 }
  0x18   : > { %p510_p1 = scmp.eq.s32.totalorder %s509_s5, 0  ;;  %p523_p2 = scmp.eq.s32.totalorder %s4032_s4, 1 }
  0x19   : > { %p528_p3 = scmp.ne.s32.totalorder %s3853_s28, %s3849_s3  ;;  %p529_p4 = scmp.eq.s32.totalorder %s3128_s0, 1 }
  0x1a   : > { %s4047_s24 = scalar_select %p510_p1, %s3857_s29, %s512_s1  }
  0x1b   : > { %p4049_p5 = por %p523_p2, %p522_p0  ;;  %p4053_p6 = por %p529_p4, %p528_p3 }
  0x1c   : > { %4751 = sst [smem:[#allocation25_spill]] %s4047_s24  ;;  %p3129_p7 = scmp.ge.s32.totalorder %s3861_s30, 1 }
  0x1d   : > { %s4752_s6 = scalar_select %p4049_p5, 1, 0 }
  0x1e   : > { %s4754_s25 = scalar_select %p4053_p6, 1, 0 }
  0x1f   : > { %4753 = sst [smem:[#allocation26_spill]] %s4752_s6  ;;  %p536_p8 = scmp.lt.s32.totalorder %s3861_s30, 3 }
  0x20   : > { %4755 = sst [smem:[#allocation27_spill]] %s4754_s25  ;;  %p4727_p9 = scmp.eq.s32.totalorder %s4032_s4, 0 }
  0x21   : > { %p4060_p10 = pnand %p3129_p7, %p536_p8  ;;  %s3871_s2 = smov [#allocation10]  }
  0x22   : > { %s572_s27 = sshll.u32 %s3871_s2, 4  ;;  %s3872_s0 = smov [#allocation13]   ;;  %s573_s27 = int_to_ptr.vmem [resolvable:$true] %s572_s27 }
  0x23   : > { %s4756_s26 = scalar_select %p4060_p10, 1, 0 }
  0x24   : > { %p3452_p11 = pneg %p4060_p10  ;;  %s597_s1 = sshll.u32 %s3872_s0, 4  ;;  %s4072_s1 = int_to_ptr.vmem [resolvable:$true] %s597_s1 }
  0x25   : > { %s3873_s24 = smov [#allocation7]   ;;  %s4758_s2 = sld [smem:[#allocation34_spill]] }
  0x26   : > { %p4068_p12 = pnand %p4727_p9, %p3452_p11  ;;  %s558_s29 = sshll.u32 %s3873_s24, 4  ;;  %s4074_s29 = int_to_ptr.vmem [resolvable:$true] %s558_s29 }
  0x28   : > { %p4084_p0 = pneg %p4068_p12 }
  0x2b   : > { %s3639_s3 = scalar_lea.hbm %s4758_s2, 16 }
  0x2c   : > { %p3640_p13 = scmp.ne.s32.totalorder %s4758_s2, %s3639_s3  ;;  %p3646_p3 = scmp.lt.u32.totalorder %s3639_s3, %s4758_s2 }
  0x2e   : > { %p3642_p1 = pnand %p4084_p0, %p3640_p13 }
  0x30   : > { %p3643_p2 = pneg %p3642_p1 }
  0x32   : > { %p3648_p4 = pnand %p3646_p3, %p3643_p2 }
  0x34   : > { %3651 = shalt.err (!%p3648_p4)
}
  0x35   : > { %s3652_s23 = scalar_lea.vmem %s573_s27, 16  ;;  %s3659_s22 = scalar_lea.vmem %s573_s27, 32 }
  0x36   : > { %p3653_p7 = scmp.ne.s32.totalorder %s573_s27, %s3652_s23  ;;  %p3660_p9 = scmp.lt.s32.totalorder %s573_s27, %s573_s27 }
  0x37   : > { %p3661_p6 = scmp.lt.s32.totalorder %s3659_s22, %s3652_s23 }
  0x38   : > { %p3655_p8 = pnand %p3653_p7, %p4084_p0 }
  0x39   : > { %p3662_p5 = por %p3661_p6, %p3660_p9 }
  0x3a   : > { %p3656_p11 = pneg %p3655_p8 }
  0x3c   : > { %p3663_p10 = pnand %p3662_p5, %p3656_p11 }
  0x3e   : > { %3666 = shalt.err (!%p3663_p10)
}
  0x3f   : > { %3458 = dma.hbm_to_vmem [thread:$0]  (!%p4068_p12), %s4758_s2, 16, %s573_s27, [#allocation11]  }
  0x40   : > { %s4760_s9 = sld [smem:[#allocation36_spill]] }
  0x46   : > { %s3667_s24 = scalar_lea.hbm %s4760_s9, 16 }
  0x47   : > { %p3668_p13 = scmp.ne.s32.totalorder %s4760_s9, %s3667_s24  ;;  %p3674_p5 = scmp.lt.u32.totalorder %s3667_s24, %s4760_s9 }
  0x49   : > { %p3670_p1 = pnand %p3668_p13, %p4084_p0 }
  0x4b   : > { %p3671_p6 = pneg %p3670_p1 }
  0x4d   : > { %p3676_p9 = pnand %p3674_p5, %p3671_p6 }
  0x4f   : > { %3679 = shalt.err (!%p3676_p9)
}
  0x50   : > { %s3680_s27 = scalar_lea.vmem %s4072_s1, 16  ;;  %s3687_s20 = scalar_lea.vmem %s4072_s1, 32 }
  0x51   : > { %p3681_p10 = scmp.ne.s32.totalorder %s4072_s1, %s3680_s27  ;;  %p3688_p4 = scmp.lt.s32.totalorder %s4072_s1, %s4072_s1 }
  0x52   : > { %p3689_p7 = scmp.lt.s32.totalorder %s3687_s20, %s3680_s27 }
  0x53   : > { %p3683_p2 = pnand %p3681_p10, %p4084_p0 }
  0x54   : > { %p3690_p8 = por %p3689_p7, %p3688_p4 }
  0x55   : > { %p3684_p3 = pneg %p3683_p2 }
  0x57   : > { %p3691_p11 = pnand %p3690_p8, %p3684_p3 }
  0x59   : > { %3694 = shalt.err (!%p3691_p11)
}
  0x5a   : > { %3464 = dma.hbm_to_vmem [thread:$0]  (!%p4068_p12), %s4760_s9, 16, %s4072_s1, [#allocation14]  }
  0x5b   : > { %s4761_s3 = sld [smem:[#allocation32_spill]] }
  0x61   : > { %s4762_s24 = smov %s4761_s3  ;;  %s3695_s23 = scalar_lea.hbm %s4761_s3, 16 }
  0x62   : > { %p3696_p13 = scmp.ne.s32.totalorder %s4762_s24, %s3695_s23  ;;  %p3702_p5 = scmp.lt.u32.totalorder %s3695_s23, %s4762_s24 }
  0x64   : > { %p3698_p1 = pnand %p3696_p13, %p4084_p0 }
  0x66   : > { %p3699_p6 = pneg %p3698_p1 }
  0x68   : > { %p3704_p9 = pnand %p3702_p5, %p3699_p6 }
  0x6a   : > { %3707 = shalt.err (!%p3704_p9)
}
  0x6b   : > { %s3708_s1 = scalar_lea.vmem %s4074_s29, 16  ;;  %s3715_s2 = scalar_lea.vmem %s4074_s29, 32 }
  0x6c   : > { %p3709_p10 = scmp.ne.s32.totalorder %s4074_s29, %s3708_s1  ;;  %p3716_p4 = scmp.lt.s32.totalorder %s4074_s29, %s4074_s29 }
  0x6d   : > { %p3717_p7 = scmp.lt.s32.totalorder %s3715_s2, %s3708_s1 }
  0x6e   : > { %p3711_p2 = pnand %p3709_p10, %p4084_p0 }
  0x6f   : > { %p3718_p8 = por %p3717_p7, %p3716_p4 }
  0x70   : > { %p3712_p3 = pneg %p3711_p2 }
  0x72   : > { %p3719_p11 = pnand %p3718_p8, %p3712_p3 }
  0x74   : > { %3722 = shalt.err (!%p3719_p11)
}
  0x75   : > { %3455 = dma.hbm_to_vmem [thread:$0]  (!%p4068_p12), %s4762_s24, 16, %s4074_s29, [#allocation8]  }
  0x76   : > { %s3874_s25 = smov [#allocation12]   ;;  %s3875_s3 = smov [#allocation15]  }
  0x77   : > { %s586_s21 = sshll.u32 %s3874_s25, 4  ;;  %s608_s23 = sshll.u32 %s3875_s3, 4  ;;  %s587_s21 = int_to_ptr.vmem [resolvable:$true] %s586_s21  ;;  %s609_s23 = int_to_ptr.vmem [resolvable:$true] %s608_s23 }
  0x78   : > { %s3723_s20 = scalar_lea.hbm %s4700_s8, 16 }
  0x79   : > { %p3724_p13 = scmp.ne.s32.totalorder %s4700_s8, %s3723_s20  ;;  %p3730_p5 = scmp.lt.u32.totalorder %s3723_s20, %s4700_s8 }
  0x7b   : > { %p3726_p1 = pnand %p3724_p13, %p4084_p0 }
  0x7d   : > { %p3727_p6 = pneg %p3726_p1 }
  0x7f   : > { %p3732_p9 = pnand %p3730_p5, %p3727_p6 }
  0x81   : > { %3735 = shalt.err (!%p3732_p9)
}
  0x82   : > { %s3736_s29 = scalar_lea.vmem %s587_s21, 16  ;;  %s3743_s30 = scalar_lea.vmem %s587_s21, 32 }
  0x83   : > { %p3737_p10 = scmp.ne.s32.totalorder %s587_s21, %s3736_s29  ;;  %p3744_p4 = scmp.lt.s32.totalorder %s587_s21, %s587_s21 }
  0x84   : > { %p3745_p7 = scmp.lt.s32.totalorder %s3743_s30, %s3736_s29 }
  0x85   : > { %p3739_p2 = pnand %p3737_p10, %p4084_p0 }
  0x86   : > { %p3746_p8 = por %p3745_p7, %p3744_p4 }
  0x87   : > { %p3740_p3 = pneg %p3739_p2 }
  0x89   : > { %p3747_p11 = pnand %p3746_p8, %p3740_p3 }
  0x8b   : > { %3750 = shalt.err (!%p3747_p11)
}
  0x8c   : > { %3461 = dma.hbm_to_vmem [thread:$0]  (!%p4068_p12), %s4700_s8, 16, %s587_s21, [#allocation11]  }
  0x8d   : > { %s3751_s27 = scalar_lea.hbm %s4702_s10, 16 }
  0x8e   : > { %p3752_p13 = scmp.ne.s32.totalorder %s4702_s10, %s3751_s27  ;;  %p3758_p5 = scmp.lt.u32.totalorder %s3751_s27, %s4702_s10 }
  0x90   : > { %p3754_p1 = pnand %p3752_p13, %p4084_p0 }
  0x92   : > { %p3755_p6 = pneg %p3754_p1 }
  0x94   : > { %p3760_p9 = pnand %p3758_p5, %p3755_p6 }
  0x96   : > { %3763 = shalt.err (!%p3760_p9)
}
  0x97   : > { %s3764_s29 = scalar_lea.vmem %s609_s23, 16  ;;  %s3771_s21 = scalar_lea.vmem %s609_s23, 32 }
  0x98   : > { %p3765_p10 = scmp.ne.s32.totalorder %s609_s23, %s3764_s29  ;;  %p3772_p4 = scmp.lt.s32.totalorder %s609_s23, %s609_s23 }
  0x99   : > { %p3773_p7 = scmp.lt.s32.totalorder %s3771_s21, %s3764_s29 }
  0x9a   : > { %p3767_p2 = pnand %p3765_p10, %p4084_p0 }
  0x9b   : > { %p3774_p8 = por %p3773_p7, %p3772_p4 }
  0x9c   : > { %p3768_p3 = pneg %p3767_p2 }
  0x9e   : > { %p3775_p11 = pnand %p3774_p8, %p3768_p3 }
  0xa0   : > { %3778 = shalt.err (!%p3775_p11)
}
  0xa1   : > { %3467 = dma.hbm_to_vmem [thread:$0]  (!%p4068_p12), %s4702_s10, 16, %s609_s23, [#allocation14]  }
  0xa2   : > { %p4763_p13 = scmp.ne.s32.totalorder %s4756_s26, 0 }
  0xa3   : > { %p4764_p1 = scmp.eq.s32.totalorder (!%p4763_p13), %s4032_s4, 0 }
  0xa4   : > { %661 = sbr.rel (%p4763_p13) target bundleno = 3490 (0xda2), region = 108 }
  0xab   : > { %3832 = dma.done.wait (%p4764_p1), [#allocation8], 16   ;;  %p4765_p0 = pmov %p4764_p1 }
  0xad   : > { %3834 = vsyncadd (%p4765_p0), [#allocation8], 4294967280  ;;  %p4766_p6 = pmov %p4765_p0 }
  0xae   : > { %p4767_p5 = pmov %p4765_p0 }
  0xaf   : > { %3836 = dma.done.wait (%p4766_p6), [#allocation11], 32  }
  0xb0   : > { %3838 = vsyncadd (%p4767_p5), [#allocation11], 4294967264  ;;  %p4768_p9 = pmov %p4765_p0 }
  0xb1   : > { %p4769_p12 = pmov %p4765_p0 }
  0xb2   : > { %3840 = dma.done.wait (%p4768_p9), [#allocation14], 32  }
  0xb3   : > { %3842 = vsyncadd (%p4769_p12), [#allocation14], 4294967264  ;;  %s4733_s26 = sand.u32 1, %s3853_s28   ;;  %p738_p10 = scmp.lt.s32.totalorder %s4032_s4, 1  ;;  %v3876_v0 = vmov 0.0   ;;  %vm3877_vm0 = vmmov 0  }
  0xb4   : > { %s4202_s5 = sshll.u32 %s4733_s26, 3  ;;  %3264 = vmatprep.subr.bf16.mxu1 %v3876_v0  ;;  %3268 = vmatprep.mubr.msk.bf16.mxu1 %vm3877_vm0, %v3876_v0  ;;  %s4770_s22 = sld [smem:[#allocation28_spill]]  ;;  %vm768_vm1 = vcmask 261120   ;;  %v3148_v11 = vld [vmem:[#allocation7] ss:$0 sm:$0xff]  ;;  %vm940_vm2 = vcmask 31744  }
  0xb5   : > { %3280 = vmatprep.subr.bf16.mxu0 %v3876_v0  ;;  %3284 = vmatprep.mubr.msk.bf16.mxu0 %vm3877_vm0, %v3876_v0  ;;  %s739_s0 = scalar_select %p738_p10, %s4032_s4, 1  ;;  %vm988_vm3 = vcmask 64512   ;;  %v3152_v51 = vld [vmem:[#allocation10] ss:$0 sm:$0xff]  ;;  %vm1005_vm4 = vcmask 1043456   ;;  %vm1859_vm5 = vcmask 97280  }
  0xb6   : > { %s4771_s2 = sld [smem:[#allocation29_spill]]  ;;  %s4772_s25 = sld [smem:[#allocation31_spill]]  ;;  %vm1861_vm6 = vcmask 130048   ;;  %vm1863_vm7 = vcmask 162816   ;;  %vm1865_vm8 = vcmask 195584   ;;  %vm1867_vm9 = vcmask 228352  }
  0xb7   : > { %s3143_s23 = sshll.u32 %s739_s0, 3  ;;  %s3879_s20 = smov 124   ;;  %vm2029_vm10 = vcmask 518144   ;;  %vm2164_vm11 = vcmask 1040384   ;;  %vm2031_vm12 = vcmask 523264   ;;  %vm2160_vm13 = vcmask 15360  }
  0xb8   : > { %s3880_s1 = smov 116   ;;  %s3881_s6 = smov 112   ;;  %2030 = vst.msk [vmem:[#allocation2] sm:$0x7] %vm2029_vm10, %v3876_v0  ;;  %vm2333_vm14 = vcmask 57344  }
  0xb9   : > { %s3882_s29 = smov 108   ;;  %s3883_s21 = smov 104  }
  0xba   : > { %s741_s27 = scalar_lea.vmem %s4770_s22, %s3143_s23  ;;  %s4773_s22 = sld [smem:[#allocation30_spill]] }
  0xbb   : > { %v4220_v3 = vld [vmem:[%s741_s27] sm:$0xff]  ;;  %s3878_s27 = smov 120   ;;  %s3884_s30 = smov 100  }
  0xbc   : > { %v3555_v1 = vld [vmem:[%s4771_s2] sm:$0xff]   ;;  %v3556_v2 = vld [vmem:[%s4771_s2 + $0x8] sm:$0xff]   ;;  %v744_v5 = vpack.c.bf16 %v4220_v3, %v4220_v3  ;;  %s4774_s3 = sld [smem:[#allocation33_spill]]  ;;  %s3885_s26 = smov 4  }
  0xbd   : > { %3265 = vmatpush3.bf16.msra.mxu1 %v3555_v1  ;;  %v3557_v4 = vld [vmem:[%s4772_s25] sm:$0xff]   ;;  %v3558_v6 = vld [vmem:[%s4772_s25 + $0x8] sm:$0xff]   ;;  %s4776_s7 = sld [smem:[#allocation35_spill]]  ;;  %s3890_s23 = smov 24  }
  0xbe   : > { %3266 = vmatprep.subr.bf16.mxu1 %v3876_v0 }
  0xc0   : > { %v3144_v12 = vld [vmem:[%s4773_s22] ss:$0 sm:$0xff]  ;;  %s4587_s22 = smov 0  }
  0xc1   : > { %3267 = vmatpush3.bf16.msra.mxu1 %v3556_v2 }
  0xc2   : > { %3272 = vmatprep.subr.bf16.mxu1 %v3876_v0  ;;  %s4775_s9 = smov %s4774_s3  ;;  %v3559_v22 = vld [vmem:[%s4774_s3] sm:$0xff]   ;;  %s3891_s3 = smov 28  }
  0xc3   : > { %3281 = vmatpush3.bf16.msra.mxu0 %v3559_v22  ;;  %v3560_v23 = vld [vmem:[%s4775_s9 + $0x8] sm:$0xff]  }
  0xc4   : > { %3269 = vmatmul.mubr.msk.bf16.vlgmr.msra.gmra.mrb[0].mxu1 %vm768_vm1, %v744_v5  ;;  %3282 = vmatprep.subr.bf16.mxu0 %v3876_v0 }
  0xc5   : > { %3273 = vmatpush3.bf16.msra.mxu1 %v3557_v4  ;;  %3276 = vmatprep.mubr.msk.bf16.mxu1 %vm3877_vm0, %v3876_v0 }
  0xc6   : > { %3274 = vmatprep.subr.bf16.mxu1 %v3876_v0 }
  0xc7   : > { %3283 = vmatpush3.bf16.msra.mxu0 %v3560_v23 }
  0xc8   : > { %3294 = vmatprep.subr.bf16.mxu0 %v3876_v0 }
  0xc9   : > { %3275 = vmatpush3.bf16.msra.mxu1 %v3558_v6 }
  0xca   : > { %3288 = vmatprep.subr.bf16.mxu1 %v3876_v0  ;;  %3285 = vmatmul.mubr.msk.bf16.vlgmr.msra.gmra.mrb[0].mxu0 %vm768_vm1, %v744_v5 }
  0xcb   : > { %3296 = vmatprep.mubr.msk.bf16.mxu0 %vm3877_vm0, %v3876_v0 }
  0xcc   : > { %3277 = vmatmul.mubr.msk.bf16.vlgmr.msra.gmra.mrb[4].mxu1 %vm768_vm1, %v744_v5 }
  0xcd   : > { %3290 = vmatprep.mubr.msk.bf16.mxu1 %vm3877_vm0, %v3876_v0 }
 0x197   : > { %v806_v7 = vpop.f32.mrb[0].mxu1 }
 0x198   : > { %v3270_v8 = vpop.f32.mrb[1].mxu1  ;;  %v807_v17 = vadd.f32 %v3144_v12, %v806_v7 }
 0x199   : > { %v809_v9 = vpop.f32.mrb[2].mxu1 }
 0x19a   : > { %v3271_v10 = vpop.f32.mrb[3].mxu1  ;;  %v938_v21 = vpack.c.bf16 %v807_v17, %v807_v17 }
 0x19d   : > { %v932_v52 = vpop.f32.mrb[0].mxu0 }
 0x19e   : > { %v933_v53 = vadd.f32 %v3152_v51, %v932_v52  ;;  %v3286_v54 = vpop.f32.mrb[1].mxu0 }
 0x19f   : > { %v869_v13 = vpop.f32.mrb[4].mxu1  ;;  %v935_v55 = vpop.f32.mrb[2].mxu0 }
 0x1a0   : > { %v870_v14 = vadd.f32 %v3148_v11, %v869_v13  ;;  %v3278_v15 = vpop.f32.mrb[5].mxu1  ;;  %v4309_v56 = vpack.c.bf16 %v933_v53, %v933_v53  ;;  %v3287_v57 = vpop.f32.mrb[3].mxu0 }
 0x1a1   : > { %v872_v16 = vpop.f32.mrb[6].mxu1 }
 0x1a2   : > { %v939_v18 = vpack.c.bf16 %v870_v14, %v870_v14  ;;  %v3279_v19 = vpop.f32.mrb[7].mxu1  ;;  %v1007_v58 = vsel %vm1005_vm4, %v4309_v56, 0 }
 0x1a3   : > { %3295 = vmatpush3.bf16.msra.mxu0 %v1007_v58 }
 0x1a4   : > { %1165 = vrot.lane.b32.xlu1 %v939_v18, %s3878_s27  ;;  %1053 = vrot.lane.b32.xlu0 %v939_v18, %s3879_s20  ;;  %v945_v20 = vsel %vm940_vm2, %v939_v18, 0 }
 0x1a5   : > { %3289 = vmatpush3.bf16.xpose.msra.mxu1 %v945_v20  ;;  %3306 = vmatprep.subr.bf16.mxu0 %v3876_v0 }
 0x1a6   : > { %3300 = vmatprep.subr.bf16.mxu1 %v3876_v0 }
 0x1a8   : > { %1163 = vrot.lane.b32.xlu1 %v938_v21, %s3878_s27  ;;  %1050 = vrot.lane.b32.xlu0 %v938_v21, %s3879_s20 }
 0x1ac   : > { %1274 = vrot.lane.b32.xlu1 %v938_v21, %s3880_s1  ;;  %1276 = vrot.lane.b32.xlu0 %v939_v18, %s3880_s1 }
 0x1ad   : > { %3291 = vmatmul.mubr.msk.bf16.vlgmr.msra.gmra.mrb[8].mxu1 %vm940_vm2, %v938_v21 }
 0x1ae   : > { %3302 = vmatprep.mubr.msk.bf16.mxu1 %vm3877_vm0, %v3876_v0 }
 0x1b0   : > { %1385 = vrot.lane.b32.xlu1 %v938_v21, %s3881_s6  ;;  %1387 = vrot.lane.b32.xlu0 %v939_v18, %s3881_s6 }
 0x1b4   : > { %1496 = vrot.lane.b32.xlu1 %v938_v21, %s3882_s29  ;;  %1498 = vrot.lane.b32.xlu0 %v939_v18, %s3882_s29 }
 0x1b8   : > { %1607 = vrot.lane.b32.xlu1 %v938_v21, %s3883_s21  ;;  %1609 = vrot.lane.b32.xlu0 %v939_v18, %s3883_s21 }
 0x1bc   : > { %1718 = vrot.lane.b32.xlu1 %v938_v21, %s3884_s30  ;;  %1720 = vrot.lane.b32.xlu0 %v939_v18, %s3884_s30 }
 0x216   : > { %v1054_v24 = vpop.permute.xlu0 %1053  ;;  %v1166_v26 = vpop.permute.xlu1 %1165 }
 0x217   : > { %v1059_v25 = vsel %vm940_vm2, %v1054_v24, 0  ;;  %v1171_v28 = vsel %vm940_vm2, %v1166_v26, 0 }
 0x218   : > { %3301 = vmatpush3.bf16.xpose.msra.mxu1 %v1059_v25 }
 0x219   : > { %3312 = vmatprep.subr.bf16.mxu1 %v3876_v0 }
 0x21a   : > { %v1051_v27 = vpop.permute.xlu0 %1050  ;;  %v1164_v30 = vpop.permute.xlu1 %1163 }
 0x21e   : > { %v1277_v29 = vpop.permute.xlu0 %1276  ;;  %v1275_v33 = vpop.permute.xlu1 %1274 }
 0x21f   : > { %3303 = vmatmul.mubr.msk.bf16.vlgmr.msra.gmra.mrb[12].mxu1 %vm940_vm2, %v1051_v27  ;;  %v1282_v31 = vsel %vm940_vm2, %v1277_v29, 0 }
 0x220   : > { %3313 = vmatpush3.bf16.xpose.msra.mxu1 %v1171_v28  ;;  %3314 = vmatprep.mubr.msk.bf16.mxu1 %vm3877_vm0, %v3876_v0 }
 0x221   : > { %3324 = vmatprep.subr.bf16.mxu1 %v3876_v0 }
 0x222   : > { %v1388_v32 = vpop.permute.xlu0 %1387  ;;  %v1386_v36 = vpop.permute.xlu1 %1385 }
 0x223   : > { %v1393_v34 = vsel %vm940_vm2, %v1388_v32, 0 }
 0x226   : > { %v1499_v35 = vpop.permute.xlu0 %1498  ;;  %v1497_v39 = vpop.permute.xlu1 %1496 }
 0x227   : > { %3315 = vmatmul.mubr.msk.bf16.vlgmr.msra.gmra.mrb[16].mxu1 %vm940_vm2, %v1164_v30  ;;  %v1504_v37 = vsel %vm940_vm2, %v1499_v35, 0 }
 0x228   : > { %3325 = vmatpush3.bf16.xpose.msra.mxu1 %v1282_v31  ;;  %3326 = vmatprep.mubr.msk.bf16.mxu1 %vm3877_vm0, %v3876_v0 }
 0x229   : > { %3336 = vmatprep.subr.bf16.mxu1 %v3876_v0 }
 0x22a   : > { %v1610_v38 = vpop.permute.xlu0 %1609  ;;  %v1608_v42 = vpop.permute.xlu1 %1607 }
 0x22b   : > { %v1615_v40 = vsel %vm940_vm2, %v1610_v38, 0 }
 0x22e   : > { %v1721_v41 = vpop.permute.xlu0 %1720  ;;  %v1719_v44 = vpop.permute.xlu1 %1718 }
 0x22f   : > { %3327 = vmatmul.mubr.msk.bf16.vlgmr.msra.gmra.mrb[20].mxu1 %vm940_vm2, %v1275_v33  ;;  %v1726_v43 = vsel %vm940_vm2, %v1721_v41, 0 }
 0x230   : > { %3337 = vmatpush3.bf16.xpose.msra.mxu1 %v1393_v34  ;;  %3338 = vmatprep.mubr.msk.bf16.mxu1 %vm3877_vm0, %v3876_v0 }
 0x231   : > { %3348 = vmatprep.subr.bf16.mxu1 %v3876_v0 }
 0x237   : > { %3339 = vmatmul.mubr.msk.bf16.vlgmr.msra.gmra.mrb[24].mxu1 %vm940_vm2, %v1386_v36 }
 0x238   : > { %3349 = vmatpush3.bf16.xpose.msra.mxu1 %v1504_v37  ;;  %3350 = vmatprep.mubr.msk.bf16.mxu1 %vm3877_vm0, %v3876_v0 }
 0x239   : > { %3360 = vmatprep.subr.bf16.mxu1 %v3876_v0 }
 0x23f   : > { %3351 = vmatmul.mubr.msk.bf16.vlgmr.msra.gmra.mrb[28].mxu1 %vm940_vm2, %v1497_v39 }
 0x240   : > { %3361 = vmatpush3.bf16.xpose.msra.mxu1 %v1615_v40  ;;  %3362 = vmatprep.mubr.msk.bf16.mxu1 %vm3877_vm0, %v3876_v0 }
 0x241   : > { %3372 = vmatprep.subr.bf16.mxu1 %v3876_v0 }
 0x247   : > { %3363 = vmatmul.mubr.msk.bf16.vlgmr.msra.gmra.mrb[32].mxu1 %vm940_vm2, %v1608_v42 }
 0x248   : > { %3373 = vmatpush3.bf16.xpose.msra.mxu1 %v1726_v43  ;;  %3374 = vmatprep.mubr.msk.bf16.mxu1 %vm3877_vm0, %v3876_v0 }
 0x249   : > { %3384 = vmatprep.subr.bf16.mxu1 %v3876_v0 }
 0x24f   : > { %3375 = vmatmul.mubr.msk.bf16.vlgmr.msra.gmra.mrb[36].mxu1 %vm940_vm2, %v1719_v44 }
 0x250   : > { %3388 = vmatprep.mubr.msk.bf16.mxu1 %vm3877_vm0, %v3876_v0 }
 0x280   : > { %v981_v45 = vpop.f32.mrb[8].mxu1 }
 0x281   : > { %v987_v46 = vmul.f32 0.5, %v981_v45  ;;  %v3292_v47 = vpop.f32.mrb[9].mxu1 }
 0x282   : > { %v984_v48 = vpop.f32.mrb[10].mxu1 }
 0x283   : > { %v3293_v49 = vpop.f32.mrb[11].mxu1  ;;  %v989_v50 = vsel %vm988_vm3, %v987_v46, -inf }
 0x284   : > { %990 = vmax.xlane.f32.xlu0 %v989_v50 }
 0x2f2   : > { %v1095_v59 = vpop.f32.mrb[12].mxu1 }
 0x2f3   : > { %v1101_v60 = vmul.f32 0.5, %v1095_v59  ;;  %v3304_v61 = vpop.f32.mrb[13].mxu1 }
 0x2f4   : > { %v1098_v62 = vpop.f32.mrb[14].mxu1 }
 0x2f5   : > { %v3305_v63 = vpop.f32.mrb[15].mxu1  ;;  %v1102_v1 = vsel %vm988_vm3, %v1101_v60, -inf }
 0x2f6   : > { %1103 = vmax.xlane.f32.xlu1 %v1102_v1 }
 0x2fa   : > { %v1207_v2 = vpop.f32.mrb[16].mxu1 }
 0x2fb   : > { %v1213_v4 = vmul.f32 0.5, %v1207_v2  ;;  %v3316_v5 = vpop.f32.mrb[17].mxu1 }
 0x2fc   : > { %v1210_v6 = vpop.f32.mrb[18].mxu1 }
 0x2fd   : > { %v3317_v7 = vpop.f32.mrb[19].mxu1  ;;  %v1214_v8 = vsel %vm988_vm3, %v1213_v4, -inf }
 0x2fe   : > { %1215 = vmax.xlane.f32.xlu0 %v1214_v8 }
 0x302   : > { %v1318_v9 = vpop.f32.mrb[20].mxu1 }
 0x303   : > { %v1324_v10 = vmul.f32 0.5, %v1318_v9  ;;  %v3328_v11 = vpop.f32.mrb[21].mxu1 }
 0x304   : > { %v1321_v12 = vpop.f32.mrb[22].mxu1 }
 0x305   : > { %v3329_v13 = vpop.f32.mrb[23].mxu1  ;;  %v1325_v14 = vsel %vm988_vm3, %v1324_v10, -inf }
 0x306   : > { %1326 = vmax.xlane.f32.xlu0 %v1325_v14 }
 0x30a   : > { %v1429_v15 = vpop.f32.mrb[24].mxu1 }
 0x30b   : > { %v4317_v16 = vmul.f32 0.5, %v1429_v15  ;;  %v3340_v17 = vpop.f32.mrb[25].mxu1 }
 0x30c   : > { %v1432_v18 = vpop.f32.mrb[26].mxu1 }
 0x30d   : > { %v3341_v19 = vpop.f32.mrb[27].mxu1  ;;  %v1436_v20 = vsel %vm988_vm3, %v4317_v16, -inf }
 0x30e   : > { %1437 = vmax.xlane.f32.xlu1 %v1436_v20 }
 0x311   : > { %v991_v21 = vpop.xlane.xlu0 %990 }
 0x312   : > { %v992_v22 = vsub.f32 %v987_v46, %v991_v21  ;;  %v1540_v23 = vpop.f32.mrb[28].mxu1 }
 0x313   : > { %v4321_v24 = vmul.f32 0.5, %v1540_v23  ;;  %v3352_v25 = vpop.f32.mrb[29].mxu1 }
 0x314   : > { %v993_v26 = vmul.f32 1.442695, %v992_v22  ;;  %v1543_v27 = vpop.f32.mrb[30].mxu1 }
 0x315   : > { %v3353_v28 = vpop.f32.mrb[31].mxu1  ;;  %v1547_v29 = vsel %vm988_vm3, %v4321_v24, -inf }
 0x316   : > { %3569 = vpow2.f32 %v993_v26  ;;  %1548 = vmax.xlane.f32.xlu0 %v1547_v29 }
 0x31a   : > { %v1651_v30 = vpop.f32.mrb[32].mxu1 }
 0x31b   : > { %v4325_v31 = vmul.f32 0.5, %v1651_v30  ;;  %v3364_v32 = vpop.f32.mrb[33].mxu1 }
 0x31c   : > { %v1654_v33 = vpop.f32.mrb[34].mxu1 }
 0x31d   : > { %v3365_v34 = vpop.f32.mrb[35].mxu1  ;;  %v1658_v35 = vsel %vm988_vm3, %v4325_v31, -inf }
 0x31e   : > { %1659 = vmax.xlane.f32.xlu1 %v1658_v35 }
 0x320   : > { %v3570_v36 = vpop.eup %3569 }
 0x321   : > { %v995_v37 = vsel %vm988_vm3, %v3570_v36, 0.0 }
 0x322   : > { %996 = vadd.xlane.f32.xlu1 %v995_v37  ;;  %v1762_v38 = vpop.f32.mrb[36].mxu1 }
 0x323   : > { %v1768_v39 = vmul.f32 0.5, %v1762_v38  ;;  %v3376_v40 = vpop.f32.mrb[37].mxu1 }
 0x324   : > { %v1765_v41 = vpop.f32.mrb[38].mxu1 }
 0x325   : > { %v3377_v42 = vpop.f32.mrb[39].mxu1  ;;  %v1769_v43 = vsel %vm988_vm3, %v1768_v39, -inf }
 0x326   : > { %1770 = vmax.xlane.f32.xlu0 %v1769_v43 }
 0x333   : > { %1226 = vrot.lane.b32.xlu1 %v4309_v56, %s3878_s27  ;;  %s3886_s27 = smov 8  }
 0x33c   : > { %1115 = vrot.lane.b32.xlu0 %v4309_v56, %s3879_s20  ;;  %s3887_s20 = smov 12  }
 0x383   : > { %v1104_v44 = vpop.xlane.xlu1 %1103 }
 0x384   : > { %v1105_v45 = vsub.f32 %v1101_v60, %v1104_v44 }
 0x386   : > { %v1106_v46 = vmul.f32 1.442695, %v1105_v45 }
 0x388   : > { %3571 = vpow2.f32 %v1106_v46 }
 0x38b   : > { %v1216_v47 = vpop.xlane.xlu0 %1215 }
 0x38c   : > { %v1217_v48 = vsub.f32 %v1213_v4, %v1216_v47 }
 0x38e   : > { %v1218_v49 = vmul.f32 1.442695, %v1217_v48 }
 0x390   : > { %3573 = vpow2.f32 %v1218_v49 }
 0x392   : > { %v4335_v50 = vpop.eup %3571 }
 0x393   : > { %v1327_v51 = vpop.xlane.xlu0 %1326  ;;  %v1108_v52 = vsel %vm988_vm3, %v4335_v50, 0.0 }
 0x394   : > { %v1328_v53 = vsub.f32 %v1324_v10, %v1327_v51  ;;  %1109 = vadd.xlane.f32.xlu0 %v1108_v52 }
 0x396   : > { %v1329_v54 = vmul.f32 1.442695, %v1328_v53 }
 0x398   : > { %3575 = vpow2.f32 %v1329_v54 }
 0x39a   : > { %v4339_v55 = vpop.eup %3573 }
 0x39b   : > { %v1220_v57 = vsel %vm988_vm3, %v4339_v55, 0.0  ;;  %v1438_v60 = vpop.xlane.xlu1 %1437 }
 0x39c   : > { %1221 = vadd.xlane.f32.xlu1 %v1220_v57  ;;  %v1439_v4 = vsub.f32 %v4317_v16, %v1438_v60 }
 0x39e   : > { %v1440_v9 = vmul.f32 1.442695, %v1439_v4 }
 0x3a2   : > { %v4343_v58 = vpop.eup %3575 }
 0x3a3   : > { %v1331_v59 = vsel %vm988_vm3, %v4343_v58, 0.0  ;;  %v1549_v63 = vpop.xlane.xlu0 %1548 }
 0x3a4   : > { %1332 = vadd.xlane.f32.xlu0 %v1331_v59  ;;  %v1550_v10 = vsub.f32 %v4321_v24, %v1549_v63 }
 0x3a6   : > { %v1551_v12 = vmul.f32 1.442695, %v1550_v10 }
 0x3ab   : > { %v1660_v61 = vpop.xlane.xlu1 %1659 }
 0x3ac   : > { %v1661_v11 = vsub.f32 %v4325_v31, %v1660_v61 }
 0x3ad   : > { %1337 = vrot.lane.b32.xlu1 %v4309_v56, %s3880_s1  ;;  %s3888_s1 = smov 16  }
 0x3ae   : > { %v1662_v14 = vmul.f32 1.442695, %v1661_v11 }
 0x3af   : > { %v997_v62 = vpop.xlane.xlu1 %996 }
 0x3b0   : > { %3577 = vrcp.f32 %v997_v62 }
 0x3b1   : > { %3579 = vpow2.f32 %v1440_v9 }
 0x3b2   : > { %3581 = vpow2.f32 %v1551_v12 }
 0x3b3   : > { %v1771_v1 = vpop.xlane.xlu0 %1770  ;;  %3583 = vpow2.f32 %v1662_v14  ;;  %v1227_v25 = vpop.permute.xlu1 %1226 }
 0x3b4   : > { %v1772_v13 = vsub.f32 %v1768_v39, %v1771_v1  ;;  %v1232_v30 = vsel %vm1005_vm4, %v1227_v25, 0 }
 0x3b6   : > { %v1773_v15 = vmul.f32 1.442695, %v1772_v13 }
 0x3b7   : > { %v1116_v5 = vpop.permute.xlu0 %1115 }
 0x3b8   : > { %v1121_v8 = vsel %vm1005_vm4, %v1116_v5, 0  ;;  %3585 = vpow2.f32 %v1773_v15 }
 0x3ba   : > { %1448 = vrot.lane.b32.xlu0 %v4309_v56, %s3881_s6  ;;  %v3578_v2 = vpop.eup %3577 }
 0x3bb   : > { %v999_v6 = vmul.f32 %v3578_v2, %v3570_v36  ;;  %v3580_v16 = vpop.eup %3579 }
 0x3bc   : > { %v1442_v17 = vsel %vm988_vm3, %v3580_v16, 0.0  ;;  %v3582_v18 = vpop.eup %3581 }
 0x3bd   : > { %v1000_v7 = vpack.c.bf16 %v999_v6, %v999_v6  ;;  %v4360_v19 = vpop.eup %3583  ;;  %v1553_v20 = vsel %vm988_vm3, %v3582_v18, 0.0 }
 0x3be   : > { %v1664_v22 = vsel %vm988_vm3, %v4360_v19, 0.0 }
 0x3bf   : > { %3297 = vmatmul.mubr.msk.bf16.vlgmr.msra.gmra.mrb[4].mxu0 %vm988_vm3, %v1000_v7 }
 0x3c0   : > { %3307 = vmatpush3.bf16.msra.mxu0 %v1121_v8  ;;  %3308 = vmatprep.mubr.msk.bf16.mxu0 %vm3877_vm0, %v3876_v0 }
 0x3c1   : > { %3318 = vmatprep.subr.bf16.mxu0 %v3876_v0 }
 0x3c2   : > { %v4363_v21 = vpop.eup %3585 }
 0x3c3   : > { %v1775_v23 = vsel %vm988_vm3, %v4363_v21, 0.0 }
 0x3d1   : > { %1443 = vadd.xlane.f32.xlu1 %v1442_v17 }
 0x3d5   : > { %1554 = vadd.xlane.f32.xlu1 %v1553_v20 }
 0x3d9   : > { %1665 = vadd.xlane.f32.xlu0 %v1664_v22  ;;  %1776 = vadd.xlane.f32.xlu1 %v1775_v23  ;;  %v3561_v22 = vld [vmem:[%s4776_s7] sm:$0xff]  }
 0x3da   : > { %3385 = vmatpush3.bf16.msra.mxu1 %v3561_v22 }
 0x3db   : > { %3386 = vmatprep.subr.bf16.mxu1 %v3876_v0 }
 0x3ea   : > { %1559 = vrot.lane.b32.xlu1 %v4309_v56, %s3882_s29  ;;  %s3893_s29 = smov 118  }
 0x3ef   : > { %1670 = vrot.lane.b32.xlu0 %v4309_v56, %s3883_s21  ;;  %s3889_s21 = smov 20  }
 0x3f3   : > { %1781 = vrot.lane.b32.xlu0 %v4309_v56, %s3884_s30 }
 0x421   : > { %v1110_v24 = vpop.xlane.xlu0 %1109 }
 0x422   : > { %3587 = vrcp.f32 %v1110_v24 }
 0x429   : > { %v1222_v26 = vpop.xlane.xlu1 %1221 }
 0x42a   : > { %3589 = vrcp.f32 %v1222_v26 }
 0x42c   : > { %v3588_v27 = vpop.eup %3587 }
 0x42d   : > { %v1112_v28 = vmul.f32 %v3588_v27, %v4335_v50  ;;  %v1338_v33 = vpop.permute.xlu1 %1337  ;;  %v3562_v27 = vld [vmem:[%s4776_s7 + $0x8] sm:$0xff]  }
 0x42e   : > { %v1343_v35 = vsel %vm1005_vm4, %v1338_v33, 0  ;;  %3387 = vmatpush3.bf16.msra.mxu1 %v3562_v27 }
 0x42f   : > { %v1113_v29 = vpack.c.bf16 %v1112_v28, %v1112_v28  ;;  %3400 = vmatprep.subr.bf16.mxu1 %v3876_v0 }
 0x431   : > { %3309 = vmatmul.mubr.msk.bf16.vlgmr.msra.gmra.mrb[8].mxu0 %vm988_vm3, %v1113_v29  ;;  %v1333_v31 = vpop.xlane.xlu0 %1332 }
 0x432   : > { %3319 = vmatpush3.bf16.msra.mxu0 %v1232_v30  ;;  %3591 = vrcp.f32 %v1333_v31  ;;  %3320 = vmatprep.mubr.msk.bf16.mxu0 %vm3877_vm0, %v3876_v0 }
 0x433   : > { %3330 = vmatprep.subr.bf16.mxu0 %v3876_v0 }
 0x434   : > { %v3590_v56 = vpop.eup %3589 }
 0x435   : > { %v1224_v32 = vmul.f32 %v3590_v56, %v4339_v55  ;;  %v1449_v38 = vpop.permute.xlu0 %1448 }
 0x436   : > { %v1454_v40 = vsel %vm1005_vm4, %v1449_v38, 0 }
 0x437   : > { %v1225_v34 = vpack.c.bf16 %v1224_v32, %v1224_v32 }
 0x439   : > { %3321 = vmatmul.mubr.msk.bf16.vlgmr.msra.gmra.mrb[12].mxu0 %vm988_vm3, %v1225_v34 }
 0x43a   : > { %3331 = vmatpush3.bf16.msra.mxu0 %v1343_v35  ;;  %3332 = vmatprep.mubr.msk.bf16.mxu0 %vm3877_vm0, %v3876_v0 }
 0x43b   : > { %3342 = vmatprep.subr.bf16.mxu0 %v3876_v0 }
 0x43c   : > { %v3592_v36 = vpop.eup %3591 }
 0x43d   : > { %v1335_v37 = vmul.f32 %v3592_v36, %v4343_v58 }
 0x43f   : > { %v1336_v39 = vpack.c.bf16 %v1335_v37, %v1335_v37 }
 0x441   : > { %3333 = vmatmul.mubr.msk.bf16.vlgmr.msra.gmra.mrb[16].mxu0 %vm988_vm3, %v1336_v39 }
 0x442   : > { %3343 = vmatpush3.bf16.msra.mxu0 %v1454_v40  ;;  %3344 = vmatprep.mubr.msk.bf16.mxu0 %vm3877_vm0, %v3876_v0 }
 0x443   : > { %3354 = vmatprep.subr.bf16.mxu0 %v3876_v0 }
 0x45e   : > { %v1444_v41 = vpop.xlane.xlu1 %1443 }
 0x45f   : > { %3593 = vrcp.f32 %v1444_v41 }
 0x462   : > { %v1555_v42 = vpop.xlane.xlu1 %1554 }
 0x463   : > { %3595 = vrcp.f32 %v1555_v42 }
 0x466   : > { %v1777_v43 = vpop.xlane.xlu1 %1776  ;;  %v1666_v44 = vpop.xlane.xlu0 %1665 }
 0x467   : > { %3597 = vrcp.f32 %v1666_v44 }
 0x468   : > { %3599 = vrcp.f32 %v1777_v43 }
 0x469   : > { %v3594_v45 = vpop.eup %3593 }
 0x46a   : > { %v1446_v46 = vmul.f32 %v3594_v45, %v3580_v16  ;;  %v1560_v47 = vpop.permute.xlu1 %1559  ;;  %v1671_v52 = vpop.permute.xlu0 %1670 }
 0x46b   : > { %v1565_v50 = vsel %vm1005_vm4, %v1560_v47, 0  ;;  %v1676_v55 = vsel %vm1005_vm4, %v1671_v52, 0 }
 0x46c   : > { %v1447_v48 = vpack.c.bf16 %v1446_v46, %v1446_v46 }
 0x46d   : > { %v3596_v49 = vpop.eup %3595 }
 0x46e   : > { %3345 = vmatmul.mubr.msk.bf16.vlgmr.msra.gmra.mrb[20].mxu0 %vm988_vm3, %v1447_v48  ;;  %v1557_v51 = vmul.f32 %v3596_v49, %v3582_v18  ;;  %v1782_v58 = vpop.permute.xlu0 %1781 }
 0x46f   : > { %3355 = vmatpush3.bf16.msra.mxu0 %v1565_v50  ;;  %3356 = vmatprep.mubr.msk.bf16.mxu0 %vm3877_vm0, %v3876_v0  ;;  %v1787_v61 = vsel %vm1005_vm4, %v1782_v58, 0  ;;  %v3172_v50 = vld [vmem:[#allocation12] ss:$0 sm:$0xff] }
 0x470   : > { %3366 = vmatprep.subr.bf16.mxu0 %v3876_v0  ;;  %v1558_v53 = vpack.c.bf16 %v1557_v51, %v1557_v51 }
 0x471   : > { %v3598_v54 = vpop.eup %3597 }
 0x472   : > { %v1668_v57 = vmul.f32 %v3598_v54, %v4360_v19  ;;  %v3600_v60 = vpop.eup %3599 }
 0x473   : > { %v1779_v62 = vmul.f32 %v3600_v60, %v4363_v21 }
 0x474   : > { %v1669_v59 = vpack.c.bf16 %v1668_v57, %v1668_v57 }
 0x475   : > { %v1780_v63 = vpack.c.bf16 %v1779_v62, %v1779_v62 }
 0x476   : > { %3357 = vmatmul.mubr.msk.bf16.vlgmr.msra.gmra.mrb[24].mxu0 %vm988_vm3, %v1558_v53 }
 0x477   : > { %3367 = vmatpush3.bf16.msra.mxu0 %v1676_v55  ;;  %3368 = vmatprep.mubr.msk.bf16.mxu0 %vm3877_vm0, %v3876_v0 }
 0x478   : > { %3378 = vmatprep.subr.bf16.mxu0 %v3876_v0 }
 0x47e   : > { %3369 = vmatmul.mubr.msk.bf16.vlgmr.msra.gmra.mrb[28].mxu0 %vm988_vm3, %v1669_v59 }
 0x47f   : > { %3379 = vmatpush3.bf16.msra.mxu0 %v1787_v61  ;;  %3380 = vmatprep.mubr.msk.bf16.mxu0 %vm3877_vm0, %v3876_v0 }
 0x480   : > { %3392 = vmatprep.subr.bf16.mxu0 %v3876_v0 }
 0x486   : > { %3381 = vmatmul.mubr.msk.bf16.vlgmr.msra.gmra.mrb[32].mxu0 %vm988_vm3, %v1780_v63 }
 0x487   : > { %3396 = vmatprep.mubr.msk.bf16.mxu0 %vm3877_vm0, %v3876_v0 }
 0x492   : > { %v1043_v1 = vpop.f32.mrb[4].mxu0 }
 0x493   : > { %v3298_v2 = vpop.f32.mrb[5].mxu0 }
 0x494   : > { %v1046_v4 = vpop.f32.mrb[6].mxu0  ;;  %v3564_v2 = vld [vmem:[%s4703_s11 + $0x8] sm:$0xff]  }
 0x495   : > { %v3299_v5 = vpop.f32.mrb[7].mxu0 }
 0x504   : > { %v1157_v6 = vpop.f32.mrb[8].mxu0 }
 0x505   : > { %1830 = vrot.lane.b32.xlu1 %v1157_v6, %s3885_s26  ;;  %v3310_v7 = vpop.f32.mrb[9].mxu0 }
 0x506   : > { %v1160_v8 = vpop.f32.mrb[10].mxu0  ;;  %v3176_v7 = vld [vmem:[#allocation13] ss:$0 sm:$0xff] }
 0x507   : > { %v3311_v9 = vpop.f32.mrb[11].mxu0 }
 0x508   : > { %v3177_v9 = vld [vmem:[#allocation15] ss:$0 sm:$0xff] }
 0x50c   : > { %v1268_v10 = vpop.f32.mrb[12].mxu0 }
 0x50d   : > { %1834 = vrot.lane.b32.xlu0 %v1268_v10, %s3886_s27  ;;  %v3322_v11 = vpop.f32.mrb[13].mxu0 }
 0x50e   : > { %v1271_v12 = vpop.f32.mrb[14].mxu0 }
 0x50f   : > { %v3323_v13 = vpop.f32.mrb[15].mxu0 }
 0x510   : > { %v3565_v13 = vld [vmem:[%s4706_s14] sm:$0xff]  }
 0x514   : > { %v1379_v14 = vpop.f32.mrb[16].mxu0 }
 0x515   : > { %1838 = vrot.lane.b32.xlu1 %v1379_v14, %s3887_s20  ;;  %v3334_v15 = vpop.f32.mrb[17].mxu0  ;;  %v3566_v14 = vld [vmem:[%s4706_s14 + $0x8] sm:$0xff]  }
 0x516   : > { %v1382_v16 = vpop.f32.mrb[18].mxu0  ;;  %v3567_v15 = vld [vmem:[%s4706_s14 + $0x10] sm:$0xff]  }
 0x517   : > { %v3335_v17 = vpop.f32.mrb[19].mxu0  ;;  %v3568_v16 = vld [vmem:[%s4706_s14 + $0x18] sm:$0xff]  }
 0x518   : > { %v2152_v17 = vld [vmem:[%s4707_s15] sm:$0x1] }
 0x541   : > { %v1490_v18 = vpop.f32.mrb[20].mxu0 }
 0x542   : > { %1842 = vrot.lane.b32.xlu0 %v1490_v18, %s3888_s1  ;;  %v3346_v19 = vpop.f32.mrb[21].mxu0  ;;  %v2166_v18 = vsel %vm2164_vm11, %v2152_v17, 0 }
 0x543   : > { %v1493_v20 = vpop.f32.mrb[22].mxu0  ;;  %v2034_v19 = vlaneseq }
 0x544   : > { %v3347_v21 = vpop.f32.mrb[23].mxu0 }
 0x545   : > { %v4463_v20 = vshrl.u32 %v2034_v19, 7 }
 0x549   : > { %v1601_v23 = vpop.f32.mrb[24].mxu0 }
 0x54a   : > { %1846 = vrot.lane.b32.xlu1 %v1601_v23, %s3889_s21  ;;  %v3358_v24 = vpop.f32.mrb[25].mxu0  ;;  %v4470_v23 = vsub.s32 0, %v4463_v20 }
 0x54b   : > { %v1604_v25 = vpop.f32.mrb[26].mxu0  ;;  %v2043_v24 = vsub.s32 1, %v4463_v20 }
 0x54c   : > { %v3359_v26 = vpop.f32.mrb[27].mxu0 }
 0x54d   : > { %v2027_v26 = vld [vmem:[%s4704_s12] sm:$0xf] }
 0x551   : > { %v1712_v28 = vpop.f32.mrb[28].mxu0 }
 0x552   : > { %1850 = vrot.lane.b32.xlu0 %v1712_v28, %s3890_s23  ;;  %v3370_v29 = vpop.f32.mrb[29].mxu0  ;;  %v2050_v28 = vsub.s32 2, %v4463_v20 }
 0x553   : > { %v1715_v30 = vpop.f32.mrb[30].mxu0  ;;  %v2037_v29 = vrot.slane %v2027_v26, %v4470_v23 }
 0x554   : > { %v3371_v31 = vpop.f32.mrb[31].mxu0  ;;  %v2044_v30 = vrot.slane %v2027_v26, %v2043_v24 }
 0x555   : > { %v2057_v31 = vsub.s32 3, %v4463_v20 }
 0x559   : > { %v1823_v56 = vpop.f32.mrb[32].mxu0 }
 0x55a   : > { %1854 = vrot.lane.b32.xlu1 %v1823_v56, %s3891_s3  ;;  %v3382_v32 = vpop.f32.mrb[33].mxu0  ;;  %v2051_v56 = vrot.slane %v2027_v26, %v2050_v28  ;;  %s737_s3 = scalar_lea.vmem [#allocation16], %s4202_s5 }
 0x55b   : > { %v1826_v33 = vpop.f32.mrb[34].mxu0 }
 0x55c   : > { %v3383_v34 = vpop.f32.mrb[35].mxu0 }
 0x577   : > { %v1831_v35 = vpop.permute.xlu1 %1830 }
 0x578   : > { %v1857_v39 = vsel %vm940_vm2, %v1043_v1, %v1831_v35  ;;  %v3563_v1 = vld [vmem:[%s4703_s11] sm:$0xff]  }
 0x579   : > { %3393 = vmatpush3.bf16.msra.mxu0 %v3563_v1 }
 0x57a   : > { %3394 = vmatprep.subr.bf16.mxu0 %v3876_v0 }
 0x57d   : > { %3395 = vmatpush3.bf16.msra.mxu0 %v3564_v2  ;;  %v2506_v2 = vsub.s32 5, %v4463_v20 }
 0x57e   : > { %3412 = vmatprep.subr.bf16.mxu0 %v3876_v0 }
 0x57f   : > { %v1835_v36 = vpop.permute.xlu0 %1834 }
 0x580   : > { %v1858_v40 = vsel %vm988_vm3, %v1857_v39, %v1835_v36 }
 0x587   : > { %v1839_v37 = vpop.permute.xlu1 %1838 }
 0x588   : > { %v1860_v42 = vsel %vm1859_vm5, %v1858_v40, %v1839_v37  ;;  %v2058_v37 = vrot.slane %v2027_v26, %v2057_v31 }
 0x5b4   : > { %v1843_v38 = vpop.permute.xlu0 %1842 }
 0x5b5   : > { %v1862_v44 = vsel %vm1861_vm6, %v1860_v42, %v1843_v38 }
 0x5bc   : > { %v1847_v41 = vpop.permute.xlu1 %1846 }
 0x5bd   : > { %v1864_v45 = vsel %vm1863_vm7, %v1862_v44, %v1847_v41 }
 0x5c4   : > { %v1851_v43 = vpop.permute.xlu0 %1850 }
 0x5c5   : > { %v1866_v46 = vsel %vm1865_vm8, %v1864_v45, %v1851_v43  ;;  %v3181_v43 = vld [vmem:[%s4705_s13] ss:$0 sm:$0xff] }
 0x5cc   : > { %v1855_v47 = vpop.permute.xlu1 %1854 }
 0x5cd   : > { %v1868_v48 = vsel %vm1867_vm9, %v1866_v46, %v1855_v47 }
 0x5ce   : > { %v1869_v49 = vpack.c.bf16 %v1868_v48, %v1868_v48 }
 0x5d0   : > { %3389 = vmatmul.mubr.msk.bf16.vlgmr.msra.gmra.mrb[40].mxu1 %vm768_vm1, %v1869_v49 }
 0x5d1   : > { %3408 = vmatprep.mubr.msk.bf16.mxu1 %vm3877_vm0, %v3876_v0  ;;  %3401 = vmatpush3.bf16.msra.mxu1 %v3565_v13 }
 0x5d2   : > { %3402 = vmatprep.subr.bf16.mxu1 %v3876_v0 }
 0x5d5   : > { %3403 = vmatpush3.bf16.msra.mxu1 %v3566_v14 }
 0x5d6   : > { %3404 = vmatprep.subr.bf16.mxu1 %v3876_v0 }
 0x5d9   : > { %3405 = vmatpush3.bf16.msra.mxu1 %v3567_v15 }
 0x5da   : > { %3406 = vmatprep.subr.bf16.mxu1 %v3876_v0 }
 0x5dd   : > { %3407 = vmatpush3.bf16.msra.mxu1 %v3568_v16 }
 0x6a3   : > { %v1930_v51 = vpop.f32.mrb[40].mxu1 }
 0x6a4   : > { %v1931_v52 = vadd.f32 %v3172_v50, %v1930_v51  ;;  %v3390_v53 = vpop.f32.mrb[41].mxu1 }
 0x6a5   : > { %v1933_v54 = vpop.f32.mrb[42].mxu1 }
 0x6a6   : > { %v3391_v55 = vpop.f32.mrb[43].mxu1  ;;  %v1936_v57 = vadd.f32 %v1931_v52, %v4220_v3  ;;  %v3892_v52 = vmov 1966171168  }
 0x6a7   : > { %v2230_v53 = vunpack.c.l.s4 %v3892_v52 }
 0x6a8   : > { %v1939_v58 = vsel %vm768_vm1, %v1936_v57, 0.0 }
 0x6a9   : > { %1940 = vadd.xlane.f32.xlu0 %v1939_v58  ;;  %v2231_v54 = vunpack.c.0.s8 %v2230_v53 }
 0x6ab   : > { %v4488_v55 = vsub.s32 %v2231_v54, %v4463_v20 }
 0x736   : > { %v1941_v59 = vpop.xlane.xlu0 %1940 }
 0x737   : > { %v1943_v60 = vmul.f32 0.03125, %v1941_v59 }
 0x739   : > { %v1944_v61 = vsub.f32 %v1936_v57, %v1943_v60 }
 0x73b   : > { %v1945_v62 = vmul.f32 %v1944_v61, %v1944_v61 }
 0x73d   : > { %v1946_v63 = vsel %vm768_vm1, %v1945_v62, 0.0 }
 0x73e   : > { %1947 = vadd.xlane.f32.xlu1 %v1946_v63 }
 0x7cb   : > { %v1948_v3 = vpop.xlane.xlu1 %1947 }
 0x7cc   : > { %v1949_v4 = vmul.f32 0.03125, %v1948_v3  ;;  %v2498_v3 = vsub.s32 4, %v4463_v20 }
 0x7ce   : > { %v1950_v5 = vadd.f32 1e-05, %v1949_v4 }
 0x7d0   : > { %3601 = vrsqrt.f32 %v1950_v5 }
 0x7da   : > { %v3602_v6 = vpop.eup %3601 }
 0x7db   : > { %v1952_v8 = vmul.f32 %v3602_v6, %v1944_v61 }
 0x7dd   : > { %v1959_v10 = vmul.f32 %v3176_v7, %v1952_v8 }
 0x7df   : > { %v4437_v11 = vadd.f32 %v3177_v9, %v1959_v10 }
 0x7e1   : > { %v1967_v12 = vpack.c.bf16 %v4437_v11, %v4437_v11 }
 0x7e3   : > { %3397 = vmatmul.mubr.msk.bf16.vlgmr.msra.gmra.mrb[36].mxu0 %vm768_vm1, %v1967_v12 }
 0x7e4   : > { %3414 = vmatprep.mubr.msk.bf16.mxu0 %vm3877_vm0, %v3876_v0  ;;  %3413 = vmatpush3.bf16.msra.mxu0 %v2166_v18 }
 0x8b6   : > { %v4465_v21 = vpop.f32.mrb[36].mxu0 }
 0x8b7   : > { %2032 = vst.msk [vmem:[#allocation2 + $0x3] sm:$0xff] %vm2031_vm12, %v4465_v21  ;;  %v3398_v22 = vpop.f32.mrb[37].mxu0 }
 0x8b8   : > { %v2024_v25 = vpop.f32.mrb[38].mxu0 }
 0x8b9   : > { %v3399_v27 = vpop.f32.mrb[39].mxu0 }
 0x8be   : > { %v2033_v32 = vld [vmem:[#allocation2] sm:$0xff] }
 0x8bf   : > { %v2040_v33 = vld [vmem:[#allocation2 + $0x1] sm:$0xff]  ;;  %v2038_v35 = vmul.f32 %v2037_v29, %v2033_v32  ;;  %v2522_v32 = vsub.s32 7, %v4463_v20 }
 0x8c0   : > { %v2047_v34 = vld [vmem:[#allocation2 + $0x2] sm:$0xff]  ;;  %v2045_v36 = vmul.f32 %v2044_v30, %v2040_v33 }
 0x8c1   : > { %v2054_v38 = vld [vmem:[#allocation2 + $0x3] sm:$0xff]  ;;  %v2052_v40 = vmul.f32 %v2051_v56, %v2047_v34  ;;  %v2514_v56 = vsub.s32 6, %v4463_v20 }
 0x8c2   : > { %v2046_v39 = vadd.f32 %v2045_v36, %v2038_v35  ;;  %v2059_v42 = vmul.f32 %v2058_v37, %v2054_v38 }
 0x8c4   : > { %v2053_v41 = vadd.f32 %v2052_v40, %v2046_v39 }
 0x8c6   : > { %v2060_v44 = vadd.f32 %v2059_v42, %v2053_v41 }
 0x8c8   : > { %v2067_v45 = vadd.f32 %v3181_v43, %v2060_v44 }
 0x8ca   : > { %v3182_v46 = vmul.f32 -1.442695, %v2067_v45 }
 0x8cc   : > { %3603 = vpow2.f32 %v3182_v46 }
 0x8d6   : > { %v3604_v47 = vpop.eup %3603 }
 0x8d7   : > { %v2071_v48 = vadd.f32 1.0, %v3604_v47 }
 0x8d9   : > { %3605 = vrcp.f32 %v2071_v48  ;;  %v3188_v48 = vld [vmem:[%s4708_s16] ss:$0 sm:$0xff] }
 0x8e3   : > { %v3606_v49 = vpop.eup %3605 }
 0x8e4   : > { %v4482_v50 = vmul.f32 %v3606_v49, %v2067_v45 }
 0x8e6   : > { %v2075_v51 = vpack.c.bf16 %v4482_v50, %v4482_v50 }
 0x8e8   : > { %3409 = vmatmul.mubr.msk.bf16.vlgmr.msra.gmra.mrb[44].mxu1 %vm2031_vm12, %v2075_v51 }
 0x9bb   : > { %v2145_v57 = vpop.f32.mrb[44].mxu1 }
 0x9bc   : > { %v3410_v58 = vpop.f32.mrb[45].mxu1  ;;  %v2475_v59 = vrot.slane %v2145_v57, %v2043_v24  ;;  %v2467_v60 = vrot.slane %v2145_v57, %v4470_v23  ;;  %v2151_v61 = vpack.c.bf16 %v2145_v57, %v2145_v57  ;;  %v2235_v63 = vrot.slane %v2145_v57, %v4488_v55 }
 0x9bd   : > { %v2148_v62 = vpop.f32.mrb[46].mxu1  ;;  %v2491_v4 = vrot.slane %v2145_v57, %v2057_v31  ;;  %v2483_v5 = vrot.slane %v2145_v57, %v2050_v28  ;;  %v2228_v7 = vcombine.high %v2145_v57, %v2145_v57  ;;  %v2507_v9 = vrot.slane %v2145_v57, %v2506_v2 }
 0x9be   : > { %2478 = vbcast.lane.b32.xlu1 %v2475_v59, 258  ;;  %2470 = vbcast.lane.b32.xlu0 %v2467_v60, 258  ;;  %v3411_v1 = vpop.f32.mrb[47].mxu1  ;;  %v2243_v6 = vcombine.high %v2235_v63, %v2235_v63  ;;  %v2251_v8 = vrot.slane %v2235_v63, %v4488_v55  ;;  %v2499_v10 = vrot.slane %v2145_v57, %v2498_v3 }
 0x9bf   : > { %3415 = vmatmul.mubr.msk.bf16.vlgmr.msra.gmra.mrb[40].mxu0 %vm2160_vm13, %v2151_v61  ;;  %v2242_v13 = vrot.slane %v2228_v7, %v4488_v55  ;;  %v2515_v33 = vrot.slane %v2145_v57, %v2514_v56  ;;  %v2523_v34 = vrot.slane %v2145_v57, %v2522_v32  ;;  %v2222_v61 = vld [vmem:[%s4709_s17] sm:$0xff] }
 0x9c0   : > { %v2265_v12 = vrot.slane %v2243_v6, %v4488_v55  ;;  %v2280_v14 = vrot.slane %v2251_v8, %v4470_v23  ;;  %v2273_v16 = vcombine.high %v2251_v8, %v2251_v8  ;;  %v2223_v62 = vmul.f32 1.442695, %v2222_v61 }
 0x9c1   : > { %v2244_v18 = vcombine.high %v2242_v13, %v2242_v13  ;;  %v2258_v24 = vrot.slane %v2242_v13, %v4488_v55 }
 0x9c2   : > { %2494 = vbcast.lane.b32.xlu1 %v2491_v4, 258  ;;  %2486 = vbcast.lane.b32.xlu0 %v2483_v5, 258  ;;  %v2284_v15 = vrot.slane %v2265_v12, %v4470_v23  ;;  %v2275_v17 = vcombine.high %v2265_v12, %v2265_v12  ;;  %v2288_v19 = vrot.slane %v2273_v16, %v4470_v23 }
 0x9c3   : > { %v2272_v25 = vrot.slane %v2244_v18, %v4488_v55  ;;  %v2296_v26 = vrot.slane %v2258_v24, %v4470_v23  ;;  %v2274_v28 = vcombine.high %v2258_v24, %v2258_v24 }
 0x9c4   : > { %v2292_v22 = vrot.slane %v2275_v17, %v4470_v23 }
 0x9c5   : > { %v2300_v27 = vrot.slane %v2272_v25, %v4470_v23  ;;  %v2276_v29 = vcombine.high %v2272_v25, %v2272_v25  ;;  %v2304_v30 = vrot.slane %v2274_v28, %v4470_v23 }
 0x9c6   : > { %2510 = vbcast.lane.b32.xlu1 %v2507_v9, 258  ;;  %2502 = vbcast.lane.b32.xlu0 %v2499_v10, 258 }
 0x9c7   : > { %v2308_v31 = vrot.slane %v2276_v29, %v4470_v23 }
 0x9ca   : > { %2309 = vrot.lane.b32.xlu0 %v2280_v14, %s3893_s29  ;;  %2311 = vrot.lane.b32.xlu1 %v2284_v15, %s3893_s29 }
 0x9ce   : > { %2313 = vrot.lane.b32.xlu0 %v2288_v19, %s3893_s29  ;;  %2315 = vrot.lane.b32.xlu1 %v2292_v22, %s3893_s29 }
 0x9d2   : > { %2317 = vrot.lane.b32.xlu0 %v2296_v26, %s3893_s29  ;;  %2319 = vrot.lane.b32.xlu1 %v2300_v27, %s3893_s29 }
 0x9d6   : > { %2321 = vrot.lane.b32.xlu0 %v2304_v30, %s3893_s29  ;;  %2323 = vrot.lane.b32.xlu1 %v2308_v31, %s3893_s29 }
 0x9da   : > { %2518 = vbcast.lane.b32.xlu0 %v2515_v33, 258  ;;  %2526 = vbcast.lane.b32.xlu1 %v2523_v34, 258 }
 0xa30   : > { %v4509_v35 = vpop.permute.xlu1 %2478  ;;  %v4511_v36 = vpop.permute.xlu0 %2470 }
 0xa34   : > { %v4513_v37 = vpop.permute.xlu1 %2494  ;;  %v4515_v38 = vpop.permute.xlu0 %2486 }
 0xa38   : > { %v4517_v39 = vpop.permute.xlu1 %2510  ;;  %v4519_v40 = vpop.permute.xlu0 %2502 }
 0xa3c   : > { %v2310_v20 = vpop.permute.xlu0 %2309  ;;  %v2312_v41 = vpop.permute.xlu1 %2311 }
 0xa3d   : > { %2334 = vst.msk [vmem:[#allocation5] sm:$0x1] %vm2333_vm14, %v2310_v20  ;;  %2335 = vst.msk [vmem:[#allocation5 + $0x1] sm:$0x1] %vm2333_vm14, %v2312_v41 }
 0xa40   : > { %v2314_v42 = vpop.permute.xlu0 %2313  ;;  %v2316_v43 = vpop.permute.xlu1 %2315 }
 0xa41   : > { %2336 = vst.msk [vmem:[#allocation5 + $0x2] sm:$0x1] %vm2333_vm14, %v2314_v42  ;;  %2337 = vst.msk [vmem:[#allocation5 + $0x3] sm:$0x1] %vm2333_vm14, %v2316_v43 }
 0xa44   : > { %v2318_v44 = vpop.permute.xlu0 %2317  ;;  %v2320_v45 = vpop.permute.xlu1 %2319 }
 0xa45   : > { %2338 = vst.msk [vmem:[#allocation5 + $0x4] sm:$0x1] %vm2333_vm14, %v2318_v44  ;;  %2339 = vst.msk [vmem:[#allocation5 + $0x5] sm:$0x1] %vm2333_vm14, %v2320_v45 }
 0xa48   : > { %v2322_v46 = vpop.permute.xlu0 %2321  ;;  %v2324_v47 = vpop.permute.xlu1 %2323 }
 0xa49   : > { %2340 = vst.msk [vmem:[#allocation5 + $0x6] sm:$0x1] %vm2333_vm14, %v2322_v46  ;;  %2341 = vst.msk [vmem:[#allocation5 + $0x7] sm:$0x1] %vm2333_vm14, %v2324_v47 }
 0xa92   : > { %v2202_v49 = vpop.f32.mrb[40].mxu0 }
 0xa93   : > { %v2203_v51 = vadd.f32 %v3188_v48, %v2202_v49  ;;  %v3416_v52 = vpop.f32.mrb[41].mxu0 }
 0xa94   : > { %v2205_v53 = vpop.f32.mrb[42].mxu0 }
 0xa95   : > { %v2209_v54 = vmin.f32 %v2203_v51, 20.0  ;;  %v3417_v57 = vpop.f32.mrb[43].mxu0  ;;  %vm2208_vm2 = vcmp.gt.f32.partialorder %v2203_v51, 20.0 }
 0xa97   : > { %v2210_v58 = vmul.f32 1.442695, %v2209_v54 }
 0xa99   : > { %3607 = vpow2.f32 %v2210_v58 }
 0xaa3   : > { %v3608_v59 = vpop.eup %3607 }
 0xaa4   : > { %v2212_v60 = vadd.f32 1.0, %v3608_v59  ;;  %v2215_v63 = vmul.f32 -0.5, %v3608_v59  ;;  %v2218_v2 = vand.u32 2147483647, %v3608_v59 }
 0xaa6   : > { %3609 = vlog2.f32 %v2212_v60  ;;  %v2216_v1 = vadd.f32 1.0, %v2215_v63  ;;  %vm2219_vm15 = vcmp.lt.f32.partialorder %v2218_v2, 0.0004427343 }
 0xaa7   : > { %3611 = vpow2.f32 %v2223_v62 }
 0xaa8   : > { %v2217_v5 = vmul.f32 %v3608_v59, %v2216_v1 }
 0xab0   : > { %v3610_v3 = vpop.eup %3609 }
 0xab1   : > { %v2214_v4 = vmul.f32 0.6931472, %v3610_v3  ;;  %v3612_v8 = vpop.eup %3611 }
 0xab2   : > { %v2225_v17 = vsub.f32 0.0, %v3612_v8 }
 0xab3   : > { %v2220_v6 = vsel %vm2219_vm15, %v2217_v5, %v2214_v4 }
 0xab4   : > { %v2221_v7 = vsel %vm2208_vm2, %v2203_v51, %v2220_v6 }
 0xab5   : > { %v2226_v9 = vmul.f32 %v2221_v7, %v4482_v50  ;;  %v2343_v10 = vcombine.high %v2221_v7, %v2221_v7  ;;  %v2350_v12 = vrot.slane %v2221_v7, %v4488_v55 }
 0xab7   : > { %v2357_v13 = vrot.slane %v2343_v10, %v4488_v55  ;;  %v2358_v14 = vcombine.high %v2350_v12, %v2350_v12  ;;  %v2366_v15 = vrot.slane %v2350_v12, %v4488_v55  ;;  %v2529_v16 = vcombine.high %v2226_v9, %v2226_v9 }
 0xab8   : > { %v2536_v18 = vrot.slane %v2226_v9, %v4488_v55 }
 0xab9   : > { %v2359_v19 = vcombine.high %v2357_v13, %v2357_v13  ;;  %v2373_v22 = vrot.slane %v2357_v13, %v4488_v55  ;;  %v2380_v24 = vrot.slane %v2358_v14, %v4488_v55  ;;  %v2388_v25 = vcombine.high %v2366_v15, %v2366_v15 }
 0xaba   : > { %v2395_v26 = vrot.slane %v2366_v15, %v4470_v23  ;;  %v2543_v27 = vrot.slane %v2529_v16, %v4488_v55  ;;  %v2544_v28 = vcombine.high %v2536_v18, %v2536_v18  ;;  %v2552_v29 = vrot.slane %v2536_v18, %v4488_v55 }
 0xabb   : > { %v2387_v30 = vrot.slane %v2359_v19, %v4488_v55  ;;  %v2389_v31 = vcombine.high %v2373_v22, %v2373_v22  ;;  %v2390_v56 = vcombine.high %v2380_v24, %v2380_v24  ;;  %v2399_v32 = vrot.slane %v2380_v24, %v4470_v23  ;;  %v2527_v24 = vpop.permute.xlu1 %2526 }
 0xabc   : > { %v2403_v33 = vrot.slane %v2388_v25, %v4470_v23  ;;  %v2411_v34 = vrot.slane %v2373_v22, %v4470_v23  ;;  %v2432_v20 = vmul.f32 %v2395_v26, %v2225_v17  ;;  %v2545_v41 = vcombine.high %v2543_v27, %v2543_v27  ;;  %v2519_v22 = vpop.permute.xlu0 %2518 }
 0xabd   : > { %v2391_v42 = vcombine.high %v2387_v30, %v2387_v30  ;;  %v2407_v43 = vrot.slane %v2390_v56, %v4470_v23  ;;  %v2415_v44 = vrot.slane %v2387_v30, %v4470_v23  ;;  %v2419_v45 = vrot.slane %v2389_v31, %v4470_v23 }
 0xabe   : > { %v2433_v46 = vmul.f32 %v2399_v32, %v2225_v17  ;;  %v2434_v47 = vmul.f32 %v2403_v33, %v2225_v17  ;;  %v2436_v48 = vmul.f32 %v2411_v34, %v2225_v17  ;;  %v2440_v49 = vmul.f32 1.442695, %v2432_v20 }
 0xabf   : > { %v2423_v51 = vrot.slane %v2391_v42, %v4470_v23  ;;  %v2435_v52 = vmul.f32 %v2407_v43, %v2225_v17  ;;  %v2437_v53 = vmul.f32 %v2415_v44, %v2225_v17  ;;  %v2438_v54 = vmul.f32 %v2419_v45, %v2225_v17 }
 0xac0   : > { %3613 = vpow2.f32 %v2440_v49  ;;  %v2442_v57 = vmul.f32 1.442695, %v2433_v46  ;;  %v2444_v58 = vmul.f32 1.442695, %v2434_v47  ;;  %v2448_v59 = vmul.f32 1.442695, %v2436_v48 }
 0xac1   : > { %v2439_v60 = vmul.f32 %v2423_v51, %v2225_v17  ;;  %v2446_v61 = vmul.f32 1.442695, %v2435_v52  ;;  %v2450_v62 = vmul.f32 1.442695, %v2437_v53  ;;  %v2452_v63 = vmul.f32 1.442695, %v2438_v54 }
 0xac2   : > { %3615 = vpow2.f32 %v2442_v57  ;;  %v2559_v1 = vrot.slane %v2543_v27, %v4488_v55  ;;  %v2566_v2 = vrot.slane %v2544_v28, %v4488_v55  ;;  %v2573_v3 = vrot.slane %v2545_v41, %v4488_v55 }
 0xac3   : > { %3617 = vpow2.f32 %v2444_v58  ;;  %v2454_v4 = vmul.f32 1.442695, %v2439_v60  ;;  %v2574_v5 = vcombine.high %v2552_v29, %v2552_v29  ;;  %v2581_v6 = vrot.slane %v2552_v29, %v4470_v23 }
 0xac4   : > { %3619 = vpow2.f32 %v2446_v61  ;;  %v2575_v7 = vcombine.high %v2559_v1, %v2559_v1  ;;  %v2576_v8 = vcombine.high %v2566_v2, %v2566_v2  ;;  %v2577_v9 = vcombine.high %v2573_v3, %v2573_v3 }
 0xac5   : > { %3621 = vpow2.f32 %v2448_v59  ;;  %v2585_v10 = vrot.slane %v2566_v2, %v4470_v23  ;;  %v2589_v12 = vrot.slane %v2574_v5, %v4470_v23  ;;  %v2597_v13 = vrot.slane %v2559_v1, %v4470_v23 }
 0xac6   : > { %3623 = vpow2.f32 %v2450_v62  ;;  %v2593_v14 = vrot.slane %v2576_v8, %v4470_v23  ;;  %v2601_v15 = vrot.slane %v2573_v3, %v4470_v23  ;;  %v2605_v16 = vrot.slane %v2575_v7, %v4470_v23 }
 0xac7   : > { %3625 = vpow2.f32 %v2452_v63  ;;  %v2609_v17 = vrot.slane %v2577_v9, %v4470_v23  ;;  %v2618_v18 = vmul.f32 %v2581_v6, %v4511_v36  ;;  %v2619_v19 = vmul.f32 %v2585_v10, %v4509_v35 }
 0xac8   : > { %3627 = vpow2.f32 %v2454_v4  ;;  %v2620_v25 = vmul.f32 %v2589_v12, %v4515_v38  ;;  %v2621_v26 = vmul.f32 %v2593_v14, %v4513_v37  ;;  %v2622_v27 = vmul.f32 %v2597_v13, %v4519_v40 }
 0xac9   : > { %v2623_v28 = vmul.f32 %v2601_v15, %v4517_v39  ;;  %v2624_v29 = vmul.f32 %v2605_v16, %v2519_v22  ;;  %v2625_v30 = vmul.f32 %v2609_v17, %v2527_v24  ;;  %2626 = vst.msk [vmem:[#allocation4] sm:$0xff] %vm2031_vm12, %v2618_v18  ;;  %2627 = vst.msk [vmem:[#allocation4 + $0x8] sm:$0xff] %vm2031_vm12, %v2619_v19  ;;  %v3863_v56 = vmov 0.0  }
 0xaca   : > { %v3614_v23 = vpop.eup %3613  ;;  %2628 = vst.msk [vmem:[#allocation4 + $0x10] sm:$0xff] %vm2031_vm12, %v2620_v25  ;;  %2629 = vst.msk [vmem:[#allocation4 + $0x18] sm:$0xff] %vm2031_vm12, %v2621_v26 }
 0xacb   : > { %2630 = vst.msk [vmem:[#allocation4 + $0x20] sm:$0xff] %vm2031_vm12, %v2622_v27  ;;  %2456 = vst.msk [vmem:[#allocation3] sm:$0xff] %vm2031_vm12, %v3614_v23 }
 0xacc   : > { %2631 = vst.msk [vmem:[#allocation4 + $0x28] sm:$0xff] %vm2031_vm12, %v2623_v28  ;;  %2632 = vst.msk [vmem:[#allocation4 + $0x30] sm:$0xff] %vm2031_vm12, %v2624_v29  ;;  %v3616_v35 = vpop.eup %3615 }
 0xacd   : > { %2633 = vst.msk [vmem:[#allocation4 + $0x38] sm:$0xff] %vm2031_vm12, %v2625_v30  ;;  %v3618_v36 = vpop.eup %3617  ;;  %2457 = vst.msk [vmem:[#allocation3 + $0x8] sm:$0xff] %vm2031_vm12, %v3616_v35 }
 0xace   : > { %v3620_v37 = vpop.eup %3619  ;;  %2458 = vst.msk [vmem:[#allocation3 + $0x10] sm:$0xff] %vm2031_vm12, %v3618_v36 }
 0xacf   : > { %v3622_v38 = vpop.eup %3621  ;;  %2459 = vst.msk [vmem:[#allocation3 + $0x18] sm:$0xff] %vm2031_vm12, %v3620_v37 }
 0xad0   : > { %v3624_v39 = vpop.eup %3623  ;;  %2460 = vst.msk [vmem:[#allocation3 + $0x20] sm:$0xff] %vm2031_vm12, %v3622_v38 }
 0xad1   : > { %v3626_v40 = vpop.eup %3625  ;;  %2461 = vst.msk [vmem:[#allocation3 + $0x28] sm:$0xff] %vm2031_vm12, %v3624_v39 }
 0xad2   : > { %v3628_v31 = vpop.eup %3627  ;;  %2462 = vst.msk [vmem:[#allocation3 + $0x30] sm:$0xff] %vm2031_vm12, %v3626_v40 }
 0xad3   : > { %2463 = vst.msk [vmem:[#allocation3 + $0x38] sm:$0xff] %vm2031_vm12, %v3628_v31 }
 0xad4 LB: >> { %s2648_s26 = scalar_lea.vmem [#allocation5], %s3869_s22  ;;  %s3190_s27 = sshll.u32 %s3869_s22, 3  ;;  %vm2666_vm3 = vcmask 516096   ;;  %s3869_s22 = sphi %s4587_s22, %s2639_s22   ;;  %v3865_v56 = vphi %v3863_v56, %v2647_v56  }
 0xad5   : >> { %v3191_v32 = vld [vmem:[%s2648_s26] ss:$0 sm:$0xff]  ;;  %s2642_s20 = scalar_lea.vmem [#allocation3], %s3190_s27  ;;  %s2645_s1 = scalar_lea.vmem [#allocation4], %s3190_s27 }
 0xad6   : >> { %2655 = vbcast.lane.b32.xlu0 %v3191_v32, 256  ;;  %v2646_v20 = vld [vmem:[%s2645_s1] sm:$0xff]  ;;  %s2665_s6 = scalar_lea.vmem [#allocation6], %s3869_s22  ;;  %s2639_s22 = sadd.s32 1, %s3869_s22  }
 0xad7   : >> { %p2636_p2 = scmp.ge.s32.totalorder %s2639_s22, 8  }
 0xad8   : > { %v3193_v51 = vmul.f32 (%p2636_p2), -1.442695, %v4465_v21  ;;  %3418 = vmatprep.subr.bf16.mxu0 (%p2636_p2), %v3876_v0  ;;  %3426 = vmatprep.mubr.msk.bf16.mxu0 (%p2636_p2), %vm3877_vm0, %v3876_v0  ;;  %v3629_v60 = vld [vmem:[%s4711_s19] sm:$0xff] (%p2636_p2)   ;;  %s3894_s30 = smov (%p2636_p2), 64   ;;  %v3630_v2 = vld [vmem:[%s4711_s19 + $0x8] sm:$0xff] (%p2636_p2)   ;;  %v3631_v6 = vld [vmem:[%s4711_s19 + $0x10] sm:$0xff] (%p2636_p2)  }
 0xad9   : > { %3419 = vmatpush3.bf16.msra.mxu0 (%p2636_p2), %v3629_v60  ;;  %v3632_v8 = vld [vmem:[%s4711_s19 + $0x18] sm:$0xff] (%p2636_p2)   ;;  %v3192_v12 = vld [vmem:[%s4710_s18] ss:$0 sm:$0xff] (%p2636_p2)  ;;  %vm2872_vm0 = vcmask (%p2636_p2), 1041409   ;;  %vm2875_vm4 = vcmask (%p2636_p2), 1042434   ;;  %vm2878_vm5 = vcmask (%p2636_p2), 1043459  }
 0xada   : >> { %v2643_v33 = vld [vmem:[%s2642_s20] sm:$0xff]  ;;  %3633 = vpow2.f32 (%p2636_p2), %v3193_v51  ;;  %3420 = vmatprep.subr.bf16.mxu0 (%p2636_p2), %v3876_v0  ;;  %v2683_v13 = vmul.f32 (%p2636_p2), %v3192_v12, %v4482_v50  ;;  %vm2881_vm6 = vcmask (%p2636_p2), 1044484   ;;  %vm2884_vm7 = vcmask (%p2636_p2), 1045509   ;;  %s4777_s29 = sld [smem:[#allocation26_spill]] (%p2636_p2)  ;;  %s4779_s26 = sld [smem:[#allocation38_spill]] (%p2636_p2) }
 0xadb   : >> { %v2644_v34 = vmul.f32 %v3865_v56, %v2643_v33  ;;  %vm2887_vm8 = vcmask (%p2636_p2), 1046534   ;;  %vm2890_vm9 = vcmask (%p2636_p2), 1047559   ;;  %s4778_s0 = sld [smem:[#allocation37_spill]] (%p2636_p2)  ;;  %s3202_s27 = sshll.u32 (%p2636_p2), %s4032_s4, 7 }
 0xadc   : > { %v2692_v14 = vrot.slane (%p2636_p2), %v2683_v13, %v4488_v55  ;;  %s3005_s20 = sshll.u32 (%p2636_p2), %s737_s3, 4  ;;  %s4780_s2 = sld [smem:[#allocation39_spill]] (%p2636_p2)  ;;  %s4647_s20 = int_to_ptr.vmem [resolvable:$true] %s3005_s20 }
 0xadd   : >> { %v2647_v56 = vadd.f32 %v2646_v20, %v2644_v34   ;;  %3421 = vmatpush3.bf16.msra.mxu0 (%p2636_p2), %v3630_v2  ;;  %s4781_s21 = sand.u32 (%p2636_p2), 1, %s3853_s28   ;;  %s3779_s4 = scalar_lea.vmem (%p2636_p2), %s4647_s20, 128 }
 0xade   : > { %3422 = vmatprep.subr.bf16.mxu0 (%p2636_p2), %v3876_v0  ;;  %v2700_v15 = vcombine.high (%p2636_p2), %v2692_v14, %v2692_v14  ;;  %v2708_v17 = vrot.slane (%p2636_p2), %v2692_v14, %v4488_v55  ;;  %p3780_p3 = scmp.ne.s32.totalorder (%p2636_p2), %s4647_s20, %s3779_s4 }
 0xae0   : > { %v2722_v18 = vrot.slane (%p2636_p2), %v2700_v15, %v4488_v55  ;;  %v2730_v29 = vcombine.high (%p2636_p2), %v2708_v17, %v2708_v17  ;;  %p4782_p4 = scmp.ne.s32.totalorder (%p2636_p2), %s4777_s29, 0 }
 0xae1   : > { %3423 = vmatpush3.bf16.msra.mxu0 (%p2636_p2), %v3631_v6 }
 0xae2   : > { %3424 = vmatprep.subr.bf16.mxu0 (%p2636_p2), %v3876_v0  ;;  %v2685_v0 = vcombine.high (%p2636_p2), %v2683_v13, %v2683_v13  ;;  %v2732_v24 = vcombine.high (%p2636_p2), %v2722_v18, %v2722_v18  ;;  %s4645_s7 = scalar_lea.hbm (%p2636_p2), %s4780_s2, %s3202_s27  ;;  %p3781_p7 = pnand (%p2636_p2), %p3780_p3, %p4782_p4 }
 0xae4   : > { %v3634_v52 = vpop.eup (%p2636_p2), %3633  ;;  %v2699_v16 = vrot.slane (%p2636_p2), %v2685_v0, %v4488_v55  ;;  %p3782_p8 = pneg (%p2636_p2), %p3781_p7 }
 0xae5   : > { %v2753_v53 = vadd.f32 (%p2636_p2), 1.0, %v3634_v52  ;;  %3425 = vmatpush3.bf16.msra.mxu0 (%p2636_p2), %v3632_v8 }
 0xae6   : > { %v2701_v25 = vcombine.high (%p2636_p2), %v2699_v16, %v2699_v16  ;;  %v2715_v38 = vrot.slane (%p2636_p2), %v2699_v16, %v4488_v55 }
 0xae7   : > { %3635 = vrcp.f32 (%p2636_p2), %v2753_v53 }
 0xae8   : > { %v2729_v35 = vrot.slane (%p2636_p2), %v2701_v25, %v4488_v55 }
 0xaf1   : > { %v3636_v54 = vpop.eup (%p2636_p2), %3635 }
 0xaf2   : > { %v2756_v57 = vmul.f32 (%p2636_p2), %v3636_v54, %v4465_v21 }
 0xaf4   : > { %v2765_v58 = vrot.slane (%p2636_p2), %v2756_v57, %v4488_v55  ;;  %v2758_v59 = vcombine.high (%p2636_p2), %v2756_v57, %v2756_v57 }
 0xaf6   : > { %v2773_v61 = vcombine.high (%p2636_p2), %v2765_v58, %v2765_v58  ;;  %v2781_v62 = vrot.slane (%p2636_p2), %v2765_v58, %v4488_v55  ;;  %v2772_v63 = vrot.slane (%p2636_p2), %v2758_v59, %v4488_v55 }
 0xaf8   : > { %v2795_v1 = vrot.slane (%p2636_p2), %v2773_v61, %v4488_v55  ;;  %2807 = vrot.lane.b32.xlu1 (%p2636_p2), %v2781_v62, %s3894_s30  ;;  %v2774_v21 = vcombine.high (%p2636_p2), %v2772_v63, %v2772_v63  ;;  %v2803_v4 = vcombine.high (%p2636_p2), %v2781_v62, %v2781_v62  ;;  %v2788_v7 = vrot.slane (%p2636_p2), %v2772_v63, %v4488_v55 }
 0xafa   : > { %2809 = vrot.lane.b32.xlu0 (%p2636_p2), %v2795_v1, %s3894_s30  ;;  %v2805_v3 = vcombine.high (%p2636_p2), %v2795_v1, %v2795_v1  ;;  %v2802_v5 = vrot.slane (%p2636_p2), %v2774_v21, %v4488_v55  ;;  %v2804_v10 = vcombine.high (%p2636_p2), %v2788_v7, %v2788_v7 }
 0xafc   : > { %2813 = vrot.lane.b32.xlu1 (%p2636_p2), %v2805_v3, %s3894_s30  ;;  %v2806_v9 = vcombine.high (%p2636_p2), %v2802_v5, %v2802_v5 }
 0xafe   : > { %2811 = vrot.lane.b32.xlu0 (%p2636_p2), %v2803_v4, %s3894_s30 }
 0xb00   : > { %2817 = vrot.lane.b32.xlu1 (%p2636_p2), %v2802_v5, %s3894_s30 }
 0xb02   : > { %2815 = vrot.lane.b32.xlu0 (%p2636_p2), %v2788_v7, %s3894_s30 }
 0xb04   : > { %2821 = vrot.lane.b32.xlu1 (%p2636_p2), %v2806_v9, %s3894_s30 }
 0xb06   : > { %2819 = vrot.lane.b32.xlu0 (%p2636_p2), %v2804_v10, %s3894_s30  ;;  %s2992_s30 = scalar_lea.sflag (%p2636_p2), [#allocation9], %s4781_s21 }
 0xb48   : >> { %v2656_v41 = vpop.permute.xlu0 %2655 }
 0xb49   : >> { %v2657_v42 = vmul.f32 %v2656_v41, %v2647_v56  ;;  %v2733_v41 = vcombine.high (%p2636_p2), %v2729_v35, %v2729_v35 }
 0xb4b   : >> { %v2658_v43 = vsel %vm2031_vm12, %v2657_v42, 0.0 }
 0xb4c   : >> { %v2659_v44 = vrot.slane %v2658_v43, 4 }
 0xb4e   : >> { %v2660_v45 = vadd.f32 %v2659_v44, %v2658_v43 }
 0xb50   : >> { %v2661_v46 = vrot.slane %v2660_v45, 2 }
 0xb52   : >> { %v2662_v47 = vadd.f32 %v2661_v46, %v2660_v45  ;;  %2638 = sbr.rel (!%p2636_p2) target bundleno = 2772 (0xad4), region = 175 }
 0xb54   : >> { %v2663_v48 = vrot.slane %v2662_v47, 1 }
 0xb56   : >> { %v2664_v49 = vadd.f32 %v2663_v48, %v2662_v47 }
 0xb58   : >> { %2667 = vst.msk [vmem:[%s2665_s6] sm:$0x1] %vm2666_vm3, %v2664_v49  ;;  %v2731_v49 = vcombine.high (%p2636_p2), %v2715_v38, %v2715_v38 }
 0xb5f   : > { %v2668_v19 = vld [vmem:[#allocation6] sm:$0x1]  ;;  %v2669_v22 = vld [vmem:[#allocation6 + $0x1] sm:$0x1]  ;;  %v2671_v27 = vld [vmem:[#allocation6 + $0x3] sm:$0x1] }
 0xb60   : > { %v2742_v26 = vadd.f32 %v2708_v17, %v2668_v19  ;;  %v2743_v28 = vadd.f32 %v2722_v18, %v2669_v22  ;;  %v2670_v50 = vld [vmem:[#allocation6 + $0x2] sm:$0x1]  ;;  %v2745_v23 = vadd.f32 %v2732_v24, %v2671_v27  ;;  %v2673_v39 = vld [vmem:[#allocation6 + $0x5] sm:$0x1]  ;;  %v2672_v56 = vld [vmem:[#allocation6 + $0x4] sm:$0x1] }
 0xb61   : > { %v2744_v31 = vadd.f32 %v2730_v29, %v2670_v50  ;;  %v2747_v20 = vadd.f32 %v2729_v35, %v2673_v39  ;;  %v2746_v44 = vadd.f32 %v2715_v38, %v2672_v56  ;;  %v2675_v45 = vld [vmem:[#allocation6 + $0x7] sm:$0x1]  ;;  %v2674_v52 = vld [vmem:[#allocation6 + $0x6] sm:$0x1] }
 0xb62   : > { %v2749_v54 = vadd.f32 %v2733_v41, %v2675_v45  ;;  %v2748_v63 = vadd.f32 %v2731_v49, %v2674_v52  ;;  %v3200_v41 = vld [vmem:[%s4779_s26] ss:$0 sm:$0xff] }
 0xb6a   : > { %v2808_v30 = vpop.permute.xlu1 %2807 }
 0xb6b   : > { %v2831_v37 = vmul.f32 %v2808_v30, %v2742_v26 }
 0xb6c   : > { %v2810_v36 = vpop.permute.xlu0 %2809 }
 0xb6d   : > { %v2832_v40 = vmul.f32 %v2810_v36, %v2743_v28  ;;  %v2839_v42 = vpack.c.bf16 %v2831_v37, %v2831_v37 }
 0xb6e   : > { %v2814_v32 = vpop.permute.xlu1 %2813 }
 0xb6f   : > { %v2840_v33 = vpack.c.bf16 %v2832_v40, %v2832_v40  ;;  %v2834_v34 = vmul.f32 %v2814_v32, %v2745_v23  ;;  %v2863_v58 = vunpack.c.l.b16 %v2839_v42 }
 0xb70   : > { %v2812_v43 = vpop.permute.xlu0 %2811 }
 0xb71   : > { %v2864_v46 = vunpack.c.l.b16 %v2840_v33  ;;  %v2833_v47 = vmul.f32 %v2812_v43, %v2744_v31  ;;  %v2842_v48 = vpack.c.bf16 %v2834_v34, %v2834_v34  ;;  %v3199_v34 = vld [vmem:[%s4778_s0] ss:$0 sm:$0xff]  ;;  %s3895_s0 = smov [#allocation16]  }
 0xb72   : > { %v2818_v51 = vpop.permute.xlu1 %2817  ;;  %s3783_s23 = sshll.u32 %s3895_s0, 4  ;;  %s3784_s23 = int_to_ptr.vmem [resolvable:$false] %s3783_s23 }
 0xb73   : > { %v2841_v55 = vpack.c.bf16 %v2833_v47, %v2833_v47  ;;  %v2836_v53 = vmul.f32 %v2818_v51, %v2747_v20  ;;  %v2871_v57 = vrot.slane %v2864_v46, 7  ;;  %v2866_v59 = vunpack.c.l.b16 %v2842_v48  ;;  %s3785_s22 = scalar_lea.vmem %s3784_s23, 256  ;;  %p3786_p11 = scmp.lt.s32.totalorder %s4647_s20, %s3784_s23 }
 0xb74   : > { %v2816_v60 = vpop.permute.xlu0 %2815  ;;  %p3787_p13 = scmp.lt.s32.totalorder %s3785_s22, %s3779_s4 }
 0xb75   : > { %v2865_v61 = vunpack.c.l.b16 %v2841_v55  ;;  %v2835_v62 = vmul.f32 %v2816_v60, %v2746_v44  ;;  %v2844_v1 = vpack.c.bf16 %v2836_v53, %v2836_v53  ;;  %v2873_v5 = vsel %vm2872_vm0, %v2871_v57, %v2863_v58 }
 0xb76   : > { %v2822_v21 = vpop.permute.xlu1 %2821  ;;  %v2877_v6 = vrot.slane %v2866_v59, 5  ;;  %p3788_p1 = por %p3787_p13, %p3786_p11 }
 0xb77   : > { %v2874_v2 = vrot.slane %v2865_v61, 6  ;;  %v2843_v3 = vpack.c.bf16 %v2835_v62, %v2835_v62  ;;  %v2838_v4 = vmul.f32 %v2822_v21, %v2749_v54  ;;  %v2868_v7 = vunpack.c.l.b16 %v2844_v1 }
 0xb78   : > { %v2820_v8 = vpop.permute.xlu0 %2819  ;;  %p3789_p0 = pnand %p3788_p1, %p3782_p8 }
 0xb79   : > { %v2876_v9 = vsel %vm2875_vm4, %v2874_v2, %v2873_v5  ;;  %v2867_v10 = vunpack.c.l.b16 %v2843_v3  ;;  %v2837_v12 = vmul.f32 %v2820_v8, %v2748_v63  ;;  %v2846_v13 = vpack.c.bf16 %v2838_v4, %v2838_v4 }
 0xb7a   : > { %v2879_v16 = vsel %vm2878_vm5, %v2877_v6, %v2876_v9  ;;  %v2883_v17 = vrot.slane %v2868_v7, 3 }
 0xb7b   : > { %v2880_v14 = vrot.slane %v2867_v10, 4  ;;  %v2845_v0 = vpack.c.bf16 %v2837_v12, %v2837_v12  ;;  %v2870_v15 = vunpack.c.l.b16 %v2846_v13 }
 0xb7d   : > { %v2882_v18 = vsel %vm2881_vm6, %v2880_v14, %v2879_v16  ;;  %v2869_v19 = vunpack.c.l.b16 %v2845_v0  ;;  %v2889_v22 = vrot.slane %v2870_v15, 1 }
 0xb7e   : > { %v2885_v25 = vsel %vm2884_vm7, %v2883_v17, %v2882_v18 }
 0xb7f   : > { %v2886_v24 = vrot.slane %v2869_v19, 2 }
 0xb81   : > { %v2888_v26 = vsel %vm2887_vm8, %v2886_v24, %v2885_v25 }
 0xb82   : > { %v2891_v27 = vsel %vm2890_vm9, %v2889_v22, %v2888_v26 }
 0xb83   : > { %v2892_v28 = vpack.c.b16 %v2891_v27, %v2891_v27 }
 0xb85   : > { %3427 = vmatmul.mubr.msk.bf16.vlgmr.msra.gmra.mrb[44].mxu0 %vm2031_vm12, %v2892_v28 }
 0xc58   : > { %v2954_v29 = vpop.f32.mrb[44].mxu0 }
 0xc59   : > { %v2960_v30 = vadd.f32 %v2954_v29, %v4437_v11  ;;  %v3428_v50 = vpop.f32.mrb[45].mxu0 }
 0xc5a   : > { %v2957_v23 = vpop.f32.mrb[46].mxu0 }
 0xc5b   : > { %v3429_v35 = vpop.f32.mrb[47].mxu0  ;;  %v2963_v36 = vsel %vm768_vm1, %v2960_v30, 0.0 }
 0xc5c   : > { %2964 = vadd.xlane.f32.xlu0 %v2963_v36 }
 0xce9   : > { %v2965_v37 = vpop.xlane.xlu0 %2964 }
 0xcea   : > { %v2966_v38 = vmul.f32 0.03125, %v2965_v37 }
 0xcec   : > { %v2967_v39 = vsub.f32 %v2960_v30, %v2966_v38 }
 0xcee   : > { %v2968_v40 = vmul.f32 %v2967_v39, %v2967_v39 }
 0xcf0   : > { %v2969_v31 = vsel %vm768_vm1, %v2968_v40, 0.0 }
 0xcf1   : > { %2970 = vadd.xlane.f32.xlu1 %v2969_v31 }
 0xd7e   : > { %v2971_v56 = vpop.xlane.xlu1 %2970 }
 0xd7f   : > { %v2972_v32 = vmul.f32 0.03125, %v2971_v56 }
 0xd81   : > { %v2973_v11 = vadd.f32 1e-05, %v2972_v32 }
 0xd83   : > { %3637 = vrsqrt.f32 %v2973_v11 }
 0xd8d   : > { %v3638_v33 = vpop.eup %3637 }
 0xd8e   : > { %v2975_v20 = vmul.f32 %v3638_v33, %v2967_v39 }
 0xd90   : > { %v2982_v42 = vmul.f32 %v3199_v34, %v2975_v20 }
 0xd92   : > { %v2989_v43 = vadd.f32 %v3200_v41, %v2982_v42 }
 0xd94   : > { %2990 = vst.msk [vmem:[%s737_s3] sm:$0xff] %vm768_vm1, %v2989_v43 }
 0xd95   : > { %3792 = shalt.err (!%p3789_p0)
}
 0xd96   : > { %s3793_s5 = scalar_lea.hbm %s4645_s7, 128  ;;  %s3797_s27 = scalar_lea.hbm %s4780_s2, 256 }
 0xd97   : > { %p3794_p6 = scmp.ne.s32.totalorder %s4645_s7, %s3793_s5  ;;  %p3798_p12 = scmp.lt.u32.totalorder %s4645_s7, %s4780_s2 }
 0xd98   : > { %p3799_p10 = scmp.lt.u32.totalorder %s3797_s27, %s3793_s5  ;;  %p3801_p3 = scmp.lt.u32.totalorder %s3793_s5, %s4645_s7 }
 0xd99   : > { %p3795_p5 = pnand %p3794_p6, %p4782_p4 }
 0xd9a   : > { %p3800_p2 = por %p3799_p10, %p3798_p12 }
 0xd9b   : > { %p3796_p9 = pneg %p3795_p5 }
 0xd9c   : > { %p3802_p7 = por %p3801_p3, %p3800_p2 }
 0xd9e   : > { %p3803_p8 = pnand %p3802_p7, %p3796_p9 }
 0xda0   : > { %3806 = shalt.err (!%p3803_p8)
}
 0xda1   : > { %3450 = dma.vmem_to_hbm [thread:$0]  (%p4782_p4), %s4647_s20, 128, %s4645_s7, %s2992_s30  }
 0xda2 PF: > { %s4783_s21 = sld [smem:[#allocation23_spill]]  ;;  %s4784_s4 = sld [smem:[#allocation21_spill]] }
 0xda3   : > { %s4785_s0 = sld [smem:[#allocation27_spill]] }
 0xda8   : > { %p3482_p11 = scmp.ge.s32.totalorder %s4783_s21, 2  ;;  %s3017_s23 = sand.u32 1, %s4784_s4  }
 0xda9   : > { %p4786_p13 = scmp.ne.s32.totalorder %s4785_s0, 0  ;;  %s3018_s22 = scalar_lea.sflag [#allocation9], %s3017_s23 }
 0xdab   : > { %p3469_p1 = pnand %p3482_p11, %p4786_p13 }
 0xdad   : > { %3844 = dma.done.wait (!%p3469_p1), %s3018_s22, 128  }
 0xdae   : > { %3846 = vsyncadd (!%p3469_p1), %s3018_s22, 4294967168  ;;  %s4787_s30 = sld [smem:[#allocation24_spill]]  ;;  %s4788_s5 = sld [smem:[#allocation22_spill]] }
 0xdaf   : > { %s4789_s29 = sld [smem:[#allocation25_spill]]  ;;  %s4790_s3 = smov %s3853_s28 }
 0xdb4   : > { %p35_p0 = scmp.ge.s32.totalorder %s4787_s30, 4   ;;  %s4791_s28 = smov %s4788_s5 }
 0xdb6   :  { %37 = sbr.rel (!%p35_p0) target bundleno = 19 (0x13), region = 186 }
 0xdbd   :  { %3023 = vsyncpa [#allocation8], 1 }
 0xdbe   :  { %3025 = vsyncpa [#allocation8 + $0x1], 1 }
 0xdbf   :  { %3026 = vsyncpa [#allocation11], 1 }
 0xdc0   :  { %3027 = vsyncpa [#allocation14], 1 }
 0xdc1   :  { %3028 = vsyncpa [#allocation9], 1 }
 0xdc2   :  { %3030 = vsyncpa [#allocation9 + $0x1], 1 }

</bundles_post_ra>
